<compile_context>
chip_gen: v7x
topology: tpu7x:2x2x1
jax: 0.10.0
libtpu: 0.0.40
codegen_flags: <defaults>
</compile_context>

<pallas_src>
import functools

import jax
import jax.numpy as jnp
from jax import lax
from jax.experimental import pallas as pl
from jax.experimental.pallas import tpu as pltpu

_VMEM_LIMIT = 32 * 1024 * 1024


# --------------------- A) grouped 'same' conv (key_embed) ---------------------

def _grouped_conv_kernel(xp_ref, w_ref, o_ref, *, offsets, sp):
    # xp_ref: (1, Hp*Wp, Cin) bf16 padded, flattened image (row-major, width Wp)
    # w_ref : (taps*Cin, Cout) bf16 block-diagonal per-tap weights
    # o_ref : (1, Sp, Cout) f32, Sp = H*Wp (junk columns dropped by the caller)
    # TODO(synk): shifted reads at non-sublane-aligned offsets cost in-VMEM
    # copies; a pltpu.roll-based shift would move them to the idle XLU.
    cols = [xp_ref[0, off:off + sp, :] for off in offsets]
    patch = jnp.concatenate(cols, axis=-1)          # in-VMEM im2col (Sp, taps*Cin)
    o_ref[0] = jnp.dot(patch, w_ref[...], preferred_element_type=jnp.float32)


def grouped_conv_same(x_bhwc, w, groups):
    """'same' conv, stride 1, odd kernel.  w: PyTorch layout (Cout, Cin//g, kh, kw).
    No im2col in HBM: the k*k taps are concatenated in VMEM from shifted reads of
    the padded, flattened activation and consumed by a single deep MXU matmul."""
    B, H, W, Cin = x_bhwc.shape
    Cout, cig, kh, kw = w.shape
    assert Cin == cig * groups and kh % 2 == 1 and kw % 2 == 1
    ph, pw = kh // 2, kw // 2
    Wp = W + 2 * pw
    Sp = H * Wp                     # outputs computed on the padded-width grid
    taps = kh * kw
    cog = Cout // groups

    # block-diagonal dense weight, tap-major rows: row = t*Cin + cin
    dense = jnp.zeros((taps, Cin, Cout), jnp.float32)
    for g in range(groups):
        wg = jnp.transpose(w[g * cog:(g + 1) * cog], (2, 3, 1, 0))  # (kh,kw,cig,cog)
        dense = dense.at[:, g * cig:(g + 1) * cig, g * cog:(g + 1) * cog].set(
            wg.reshape(taps, cig, cog))
    dense = dense.reshape(taps * Cin, Cout).astype(jnp.bfloat16)

    # top pad ph, bottom pad ph+1 (one slack row so every shifted flattened read
    # stays in bounds), left/right pad pw.
    xp = jnp.pad(x_bhwc.astype(jnp.bfloat16),
                 ((0, 0), (ph, ph + 1), (pw, pw), (0, 0)))
    Hp = H + 2 * ph + 1
    xp = xp.reshape(B, Hp * Wp, Cin)
    offsets = tuple(dy * Wp + dx for dy in range(kh) for dx in range(kw))

    out = pl.pallas_call(
        functools.partial(_grouped_conv_kernel, offsets=offsets, sp=Sp),
        out_shape=jax.ShapeDtypeStruct((B, Sp, Cout), jnp.float32),
        grid=(B,),
        in_specs=[pl.BlockSpec((1, Hp * Wp, Cin), lambda b: (b, 0, 0)),
                  pl.BlockSpec((taps * Cin, Cout), lambda b: (0, 0))],
        out_specs=pl.BlockSpec((1, Sp, Cout), lambda b: (b, 0, 0)),
        compiler_params=pltpu.CompilerParams(
            dimension_semantics=("parallel",), vmem_limit_bytes=_VMEM_LIMIT),
    )(xp, dense)
    # drop the 2*pw junk columns per image row, flatten to (B, S, Cout)
    out = out.reshape(B, H, Wp, Cout)[:, :, :W, :]
    return out.reshape(B, H * W, Cout)


# --------- B) fused value 1x1 conv + first attention 1x1 conv over [k1, x] ---------

def _vk_att1_kernel(k1c_ref, x_ref, ks_ref, kb_ref, wk_ref, wx_ref, o_ref):
    # k1 = SiLU(BN(k1_conv)) computed in-prologue (VPU/EUP work hides under MXU).
    y = k1c_ref[...] * ks_ref[...] + kb_ref[...]
    k1 = (y * jax.nn.sigmoid(y)).astype(jnp.bfloat16)
    acc = jnp.dot(k1, wk_ref[...], preferred_element_type=jnp.float32)
    acc = acc + jnp.dot(x_ref[...], wx_ref[...], preferred_element_type=jnp.float32)
    o_ref[...] = acc


def fused_value_att1(k1c_2d, x_2d, k_scale, k_bias, wk, wx, tm=256):
    """out[:, :C]       = x @ wv                      (value_embed conv, raw)
       out[:, C:C+Cm]   = SiLU(BN(k1c)) @ wa1_k + x @ wa1_x   (att conv #1, raw)
    packed into one lane-dense (Np >= 128) f32 output; no HBM concat of [k1, x]."""
    M, C = x_2d.shape
    Np = wx.shape[1]
    tm = min(tm, M)
    Mp = pl.cdiv(M, tm) * tm
    if Mp != M:
        k1c_2d = jnp.pad(k1c_2d, ((0, Mp - M), (0, 0)))
        x_2d = jnp.pad(x_2d, ((0, Mp - M), (0, 0)))

    out = pl.pallas_call(
        _vk_att1_kernel,
        out_shape=jax.ShapeDtypeStruct((Mp, Np), jnp.float32),
        grid=(Mp // tm,),
        in_specs=[pl.BlockSpec((tm, C), lambda i: (i, 0)),
                  pl.BlockSpec((tm, C), lambda i: (i, 0)),
                  pl.BlockSpec((1, C), lambda i: (0, 0)),
                  pl.BlockSpec((1, C), lambda i: (0, 0)),
                  pl.BlockSpec((C, Np), lambda i: (0, 0)),
                  pl.BlockSpec((C, Np), lambda i: (0, 0))],
        out_specs=pl.BlockSpec((tm, Np), lambda i: (i, 0)),
        compiler_params=pltpu.CompilerParams(
            dimension_semantics=("parallel",), vmem_limit_bytes=_VMEM_LIMIT),
    )(k1c_2d, x_2d, k_scale, k_bias, wk, wx)
    return out[:M]


# --- C) fused att conv #2 + spatial softmax + value BN + k1 BN/SiLU + final add ---

def _att2_softmax_kernel(comb_ref, k1c_ref, w2_ref, b2_ref, asc_ref, abi_ref,
                         vsc_ref, vbi_ref, ksc_ref, kbi_ref, o_ref, *, c, cm):
    comb = comb_ref[0]                                          # (S, Np) f32
    v = comb[:, :c] * vsc_ref[...] + vbi_ref[...]               # value BN apply
    ya = comb[:, c:c + cm] * asc_ref[...] + abi_ref[...]        # a1 BN apply
    a1 = (ya * jax.nn.sigmoid(ya)).astype(jnp.bfloat16)         # SiLU
    att = jnp.dot(a1, w2_ref[...], preferred_element_type=jnp.float32) + b2_ref[...]
    # softmax over the spatial axis S (axis 0), per channel
    m = jnp.max(att, axis=0, keepdims=True)
    p = jnp.exp(att - m)
    inv = pl.reciprocal(jnp.sum(p, axis=0, keepdims=True), approx=True)
    yk = k1c_ref[0] * ksc_ref[...] + kbi_ref[...]               # k1 BN + SiLU
    k1 = yk * jax.nn.sigmoid(yk)
    o_ref[0] = p * inv * v + k1


def fused_att2_softmax(comb_bsn, k1c_bsc, w2, b2, a_sc, a_bi, v_sc, v_bi, k_sc, k_bi):
    B, S, Np = comb_bsn.shape
    C = k1c_bsc.shape[-1]
    Cm = w2.shape[0]
    return pl.pallas_call(
        functools.partial(_att2_softmax_kernel, c=C, cm=Cm),
        out_shape=jax.ShapeDtypeStruct((B, S, C), jnp.float32),
        grid=(B,),
        in_specs=[pl.BlockSpec((1, S, Np), lambda b: (b, 0, 0)),
                  pl.BlockSpec((1, S, C), lambda b: (b, 0, 0)),
                  pl.BlockSpec((Cm, C), lambda b: (0, 0)),
                  pl.BlockSpec((1, C), lambda b: (0, 0)),
                  pl.BlockSpec((1, Cm), lambda b: (0, 0)),
                  pl.BlockSpec((1, Cm), lambda b: (0, 0)),
                  pl.BlockSpec((1, C), lambda b: (0, 0)),
                  pl.BlockSpec((1, C), lambda b: (0, 0)),
                  pl.BlockSpec((1, C), lambda b: (0, 0)),
                  pl.BlockSpec((1, C), lambda b: (0, 0))],
        out_specs=pl.BlockSpec((1, S, C), lambda b: (b, 0, 0)),
        compiler_params=pltpu.CompilerParams(
            dimension_semantics=("parallel",), vmem_limit_bytes=_VMEM_LIMIT),
    )(comb_bsn, k1c_bsc, w2, b2, a_sc, a_bi, v_sc, v_bi, k_sc, k_bi)


# ------------------------------ BatchNorm helpers ------------------------------

def _affine_from_stats(mean, var, gamma, beta, eps):
    scale = gamma * lax.rsqrt(var + eps)
    bias = beta - mean * scale
    return (scale.reshape(1, -1).astype(jnp.float32),
            bias.reshape(1, -1).astype(jnp.float32))


# ------------------------------- module forward -------------------------------

def init_params(key, dim, kernel_size=3):
    keys = iter(jax.random.split(key, 16))

    def w(shape, scale=0.1):
        return scale * jax.random.normal(next(keys), shape, jnp.float32)

    def bn(c):
        return (1.0 + 0.05 * jax.random.normal(next(keys), (c,), jnp.float32),
                0.05 * jax.random.normal(next(keys), (c,), jnp.float32))

    factor = 4
    p = {}
    p['key_w'] = w((dim, dim // 4, kernel_size, kernel_size))      # groups=4, no bias
    p['key_bn'] = bn(dim)
    p['val_w'] = w((dim, dim, 1, 1))                               # no bias
    p['val_bn'] = bn(dim)
    p['att_w1'] = w((2 * dim // factor, 2 * dim, 1, 1))            # no bias
    p['att_bn'] = bn(2 * dim // factor)
    p['att_w2'] = w((kernel_size * kernel_size * dim, 2 * dim // factor, 1, 1))
    p['att_b2'] = w((kernel_size * kernel_size * dim,))
    return p


def cot_attention_2d(x_nchw, params, kernel_size=3, eps=1e-5):
    B, C, H, W = x_nchw.shape
    S = H * W
    x_bhwc = jnp.transpose(x_nchw, (0, 2, 3, 1)).astype(jnp.float32)   # (B,H,W,C)
    x_2d = x_bhwc.reshape(B * S, C).astype(jnp.bfloat16)

    # ---- A) key_embed grouped 3x3 conv -> k1_conv; BN batch stats (tiny, JAX) ----
    k1_conv = grouped_conv_same(x_bhwc, params['key_w'], groups=4)      # (B,S,C) f32
    k1_flat = k1_conv.reshape(B * S, C)
    kmean = jnp.mean(k1_flat, axis=0)
    kvar = jnp.mean(jnp.square(k1_flat - kmean), axis=0)
    k_sc, k_bi = _affine_from_stats(kmean, kvar, *params['key_bn'], eps)

    # ---- B) fused value 1x1 conv + first attention 1x1 conv over y=[k1, x] ----
    Cm = params['att_w1'].shape[0]                                      # 2*dim // 4
    wv = jnp.transpose(params['val_w'][:, :, 0, 0])                     # (C, C)
    wa1 = jnp.transpose(params['att_w1'][:, :, 0, 0])                   # (2C, Cm)
    Np = pl.cdiv(C + Cm, 128) * 128                                     # lane-dense N
    wk = jnp.zeros((C, Np), jnp.float32).at[:, C:C + Cm].set(wa1[:C])
    wx = (jnp.zeros((C, Np), jnp.float32)
          .at[:, :C].set(wv).at[:, C:C + Cm].set(wa1[C:]))
    comb = fused_value_att1(k1_flat, x_2d, k_sc, k_bi,
                            wk.astype(jnp.bfloat16), wx.astype(jnp.bfloat16))
    cmean = jnp.mean(comb, axis=0)
    cvar = jnp.mean(jnp.square(comb - cmean), axis=0)
    v_sc, v_bi = _affine_from_stats(cmean[:C], cvar[:C], *params['val_bn'], eps)
    a_sc, a_bi = _affine_from_stats(cmean[C:C + Cm], cvar[C:C + Cm],
                                    *params['att_bn'], eps)

    # ---- C) att conv #2 (tap-mean folded) + softmax(att)*v + k1, one kernel ----
    taps = kernel_size * kernel_size
    w2_avg = params['att_w2'][:, :, 0, 0].reshape(C, taps, Cm).mean(axis=1)  # (C,Cm)
    b2_avg = params['att_b2'].reshape(C, taps).mean(axis=1)                  # (C,)
    out = fused_att2_softmax(comb.reshape(B, S, Np), k1_conv,
                             jnp.transpose(w2_avg).astype(jnp.bfloat16),
                             b2_avg.reshape(1, C).astype(jnp.float32),
                             a_sc, a_bi, v_sc, v_bi, k_sc, k_bi)            # (B,S,C)
    return jnp.transpose(out.reshape(B, H, W, C), (0, 3, 1, 2))             # NCHW


if __name__ == "__main__":
    dim, B, H, W = 64, 2, 16, 16

    key = jax.random.PRNGKey(0)
    kx, kp = jax.random.split(key)
    x = jax.random.normal(kx, (B, dim, H, W), jnp.float32)    # NCHW
    params = init_params(kp, dim)

    fwd = jax.jit(cot_attention_2d)
    out = fwd(x, params)
    out = jax.block_until_ready(out)

    assert out.shape == (B, dim, H, W), out.shape
    assert bool(jnp.isfinite(out).all())
    print("KERNEL_OK")
</pallas_src>

<mosaic_0001>
module attributes {stable_mosaic.version = 11 : i64} {
  func.func @_grouped_conv_kernel(%arg0: i32, %arg1: memref<1x342x64xbf16, #tpu.memory_space<vmem>>, %arg2: memref<576x64xbf16, #tpu.memory_space<vmem>>, %arg3: memref<1x288x64xf32, #tpu.memory_space<vmem>>) attributes {dimension_semantics = [#tpu.dimension_semantics<parallel>], iteration_bounds = array<i64: 2>, scalar_prefetch = 0 : i64, scratch_operands = 0 : i64, tpu.core_type = #tpu.core_type<tc>, window_params = [{transform_indices = @transform_0, window_bounds = array<i64: 1, 342, 64>}, {pipeline_mode = #tpu.pipeline_mode<synchronous>, transform_indices = @transform_1, window_bounds = array<i64: 576, 64>}, {transform_indices = @transform_2, window_bounds = array<i64: 1, 288, 64>}]} {
    %c0 = arith.constant 0 : index
    %c0_0 = arith.constant 0 : index
    %c0_1 = arith.constant 0 : index
    %0 = vector.load %arg1[%c0, %c0_0, %c0_1] : memref<1x342x64xbf16, #tpu.memory_space<vmem>>, vector<1x288x64xbf16>
    %1 = vector.shape_cast %0 : vector<1x288x64xbf16> to vector<288x64xbf16>
    %c0_2 = arith.constant 0 : index
    %c1 = arith.constant 1 : index
    %c0_3 = arith.constant 0 : index
    %2 = vector.load %arg1[%c0_2, %c1, %c0_3] : memref<1x342x64xbf16, #tpu.memory_space<vmem>>, vector<1x288x64xbf16>
    %3 = vector.shape_cast %2 : vector<1x288x64xbf16> to vector<288x64xbf16>
    %c0_4 = arith.constant 0 : index
    %c2 = arith.constant 2 : index
    %c0_5 = arith.constant 0 : index
    %4 = vector.load %arg1[%c0_4, %c2, %c0_5] : memref<1x342x64xbf16, #tpu.memory_space<vmem>>, vector<1x288x64xbf16>
    %5 = vector.shape_cast %4 : vector<1x288x64xbf16> to vector<288x64xbf16>
    %c0_6 = arith.constant 0 : index
    %c18 = arith.constant 18 : index
    %c0_7 = arith.constant 0 : index
    %6 = vector.load %arg1[%c0_6, %c18, %c0_7] : memref<1x342x64xbf16, #tpu.memory_space<vmem>>, vector<1x288x64xbf16>
    %7 = vector.shape_cast %6 : vector<1x288x64xbf16> to vector<288x64xbf16>
    %c0_8 = arith.constant 0 : index
    %c19 = arith.constant 19 : index
    %c0_9 = arith.constant 0 : index
    %8 = vector.load %arg1[%c0_8, %c19, %c0_9] : memref<1x342x64xbf16, #tpu.memory_space<vmem>>, vector<1x288x64xbf16>
    %9 = vector.shape_cast %8 : vector<1x288x64xbf16> to vector<288x64xbf16>
    %c0_10 = arith.constant 0 : index
    %c20 = arith.constant 20 : index
    %c0_11 = arith.constant 0 : index
    %10 = vector.load %arg1[%c0_10, %c20, %c0_11] : memref<1x342x64xbf16, #tpu.memory_space<vmem>>, vector<1x288x64xbf16>
    %11 = vector.shape_cast %10 : vector<1x288x64xbf16> to vector<288x64xbf16>
    %c0_12 = arith.constant 0 : index
    %c36 = arith.constant 36 : index
    %c0_13 = arith.constant 0 : index
    %12 = vector.load %arg1[%c0_12, %c36, %c0_13] : memref<1x342x64xbf16, #tpu.memory_space<vmem>>, vector<1x288x64xbf16>
    %13 = vector.shape_cast %12 : vector<1x288x64xbf16> to vector<288x64xbf16>
    %c0_14 = arith.constant 0 : index
    %c37 = arith.constant 37 : index
    %c0_15 = arith.constant 0 : index
    %14 = vector.load %arg1[%c0_14, %c37, %c0_15] : memref<1x342x64xbf16, #tpu.memory_space<vmem>>, vector<1x288x64xbf16>
    %15 = vector.shape_cast %14 : vector<1x288x64xbf16> to vector<288x64xbf16>
    %c0_16 = arith.constant 0 : index
    %c38 = arith.constant 38 : index
    %c0_17 = arith.constant 0 : index
    %16 = vector.load %arg1[%c0_16, %c38, %c0_17] : memref<1x342x64xbf16, #tpu.memory_space<vmem>>, vector<1x288x64xbf16>
    %17 = vector.shape_cast %16 : vector<1x288x64xbf16> to vector<288x64xbf16>
    %18 = tpu.concatenate %1, %3, %5, %7, %9, %11, %13, %15, %17 in 1 : vector<288x64xbf16>, vector<288x64xbf16>, vector<288x64xbf16>, vector<288x64xbf16>, vector<288x64xbf16>, vector<288x64xbf16>, vector<288x64xbf16>, vector<288x64xbf16>, vector<288x64xbf16> -> vector<288x576xbf16>
    %c0_18 = arith.constant 0 : index
    %c0_19 = arith.constant 0 : index
    %19 = vector.load %arg2[%c0_18, %c0_19] : memref<576x64xbf16, #tpu.memory_space<vmem>>, vector<576x64xbf16>
    %cst = arith.constant dense<0.000000e+00> : vector<288x64xf32>
    %20 = tpu.matmul %18, %19, %cst {dimension_numbers = #tpu.dot_dimension_numbers<[1], [0], [0], [1], [0, 0, 1, 1], [], []>} : vector<288x576xbf16>, vector<576x64xbf16>, vector<288x64xf32> -> vector<288x64xf32>
    %c0_20 = arith.constant 0 : index
    %c0_21 = arith.constant 0 : index
    %c0_22 = arith.constant 0 : index
    %21 = vector.load %arg3[%c0_20, %c0_21, %c0_22] : memref<1x288x64xf32, #tpu.memory_space<vmem>>, vector<1x288x64xf32>
    %22 = vector.shape_cast %21 : vector<1x288x64xf32> to vector<288x64xf32>
    %23 = vector.shape_cast %20 : vector<288x64xf32> to vector<1x288x64xf32>
    tpu.vector_store %arg3[%c0_20, %c0_21, %c0_22], %23 {strides = array<i32>} : memref<1x288x64xf32, #tpu.memory_space<vmem>>, vector<1x288x64xf32>,
    return
  }
  func.func @transform_0(%arg0: i32) -> (i32, i32, i32) {
    %c0_i32 = arith.constant 0 : i32
    %c0_i32_0 = arith.constant 0 : i32
    %c0_i32_1 = arith.constant 0 : i32
    return %arg0, %c0_i32, %c0_i32_0 : i32, i32, i32
  }
  func.func @transform_1(%arg0: i32) -> (i32, i32) {
    %c0_i32 = arith.constant 0 : i32
    %c0_i32_0 = arith.constant 0 : i32
    %c0_i32_1 = arith.constant 0 : i32
    return %c0_i32, %c0_i32_0 : i32, i32
  }
  func.func @transform_2(%arg0: i32) -> (i32, i32, i32) {
    %c0_i32 = arith.constant 0 : i32
    %c0_i32_0 = arith.constant 0 : i32
    %c0_i32_1 = arith.constant 0 : i32
    return %arg0, %c0_i32, %c0_i32_0 : i32, i32, i32
  }
}

module attributes {stable_mosaic.version = 11 : i64} {
  func.func @_vk_att1_kernel(%arg0: i32, %arg1: memref<256x64xf32, #tpu.memory_space<vmem>>, %arg2: memref<256x64xbf16, #tpu.memory_space<vmem>>, %arg3: memref<1x64xf32, #tpu.memory_space<vmem>>, %arg4: memref<1x64xf32, #tpu.memory_space<vmem>>, %arg5: memref<64x128xbf16, #tpu.memory_space<vmem>>, %arg6: memref<64x128xbf16, #tpu.memory_space<vmem>>, %arg7: memref<256x128xf32, #tpu.memory_space<vmem>>) attributes {dimension_semantics = [#tpu.dimension_semantics<parallel>], iteration_bounds = array<i64: 2>, scalar_prefetch = 0 : i64, scratch_operands = 0 : i64, tpu.core_type = #tpu.core_type<tc>, window_params = [{transform_indices = @transform_0, window_bounds = array<i64: 256, 64>}, {transform_indices = @transform_1, window_bounds = array<i64: 256, 64>}, {pipeline_mode = #tpu.pipeline_mode<synchronous>, transform_indices = @transform_2, window_bounds = array<i64: 1, 64>}, {pipeline_mode = #tpu.pipeline_mode<synchronous>, transform_indices = @transform_3, window_bounds = array<i64: 1, 64>}, {pipeline_mode = #tpu.pipeline_mode<synchronous>, transform_indices = @transform_4, window_bounds = array<i64: 64, 128>}, {pipeline_mode = #tpu.pipeline_mode<synchronous>, transform_indices = @transform_5, window_bounds = array<i64: 64, 128>}, {transform_indices = @transform_6, window_bounds = array<i64: 256, 128>}]} {
    %c0 = arith.constant 0 : index
    %c0_0 = arith.constant 0 : index
    %0 = vector.load %arg1[%c0, %c0_0] : memref<256x64xf32, #tpu.memory_space<vmem>>, vector<256x64xf32>
    %c0_1 = arith.constant 0 : index
    %c0_2 = arith.constant 0 : index
    %1 = vector.load %arg3[%c0_1, %c0_2] : memref<1x64xf32, #tpu.memory_space<vmem>>, vector<1x64xf32>
    %2 = vector.broadcast %1 : vector<1x64xf32> to vector<256x64xf32>
    %3 = arith.mulf %0, %2 : vector<256x64xf32>
    %c0_3 = arith.constant 0 : index
    %c0_4 = arith.constant 0 : index
    %4 = vector.load %arg4[%c0_3, %c0_4] : memref<1x64xf32, #tpu.memory_space<vmem>>, vector<1x64xf32>
    %5 = vector.broadcast %4 : vector<1x64xf32> to vector<256x64xf32>
    %6 = arith.addf %3, %5 : vector<256x64xf32>
    %7 = arith.negf %6 : vector<256x64xf32>
    %8 = math.exp %7 : vector<256x64xf32>
    %cst = arith.constant 1.000000e+00 : f32
    %9 = vector.broadcast %cst : f32 to vector<256x64xf32>
    %10 = arith.addf %9, %8 : vector<256x64xf32>
    %11 = arith.divf %9, %10 : vector<256x64xf32>
    %12 = arith.mulf %6, %11 : vector<256x64xf32>
    %13 = arith.truncf %12 : vector<256x64xf32> to vector<256x64xbf16>
    %c0_5 = arith.constant 0 : index
    %c0_6 = arith.constant 0 : index
    %14 = vector.load %arg5[%c0_5, %c0_6] : memref<64x128xbf16, #tpu.memory_space<vmem>>, vector<64x128xbf16>
    %cst_7 = arith.constant dense<0.000000e+00> : vector<256x128xf32>
    %15 = tpu.matmul %13, %14, %cst_7 {dimension_numbers = #tpu.dot_dimension_numbers<[1], [0], [0], [1], [0, 0, 1, 1], [], []>} : vector<256x64xbf16>, vector<64x128xbf16>, vector<256x128xf32> -> vector<256x128xf32>
    %c0_8 = arith.constant 0 : index
    %c0_9 = arith.constant 0 : index
    %16 = vector.load %arg2[%c0_8, %c0_9] : memref<256x64xbf16, #tpu.memory_space<vmem>>, vector<256x64xbf16>
    %c0_10 = arith.constant 0 : index
    %c0_11 = arith.constant 0 : index
    %17 = vector.load %arg6[%c0_10, %c0_11] : memref<64x128xbf16, #tpu.memory_space<vmem>>, vector<64x128xbf16>
    %cst_12 = arith.constant dense<0.000000e+00> : vector<256x128xf32>
    %18 = tpu.matmul %16, %17, %cst_12 {dimension_numbers = #tpu.dot_dimension_numbers<[1], [0], [0], [1], [0, 0, 1, 1], [], []>} : vector<256x64xbf16>, vector<64x128xbf16>, vector<256x128xf32> -> vector<256x128xf32>
    %19 = arith.addf %15, %18 : vector<256x128xf32>
    %c0_13 = arith.constant 0 : index
    %c0_14 = arith.constant 0 : index
    %20 = vector.load %arg7[%c0_13, %c0_14] : memref<256x128xf32, #tpu.memory_space<vmem>>, vector<256x128xf32>
    tpu.vector_store %arg7[%c0_13, %c0_14], %19 {strides = array<i32>} : memref<256x128xf32, #tpu.memory_space<vmem>>, vector<256x128xf32>,
    return
  }
  func.func @transform_0(%arg0: i32) -> (i32, i32) {
    %c0_i32 = arith.constant 0 : i32
    %c0_i32_0 = arith.constant 0 : i32
    return %arg0, %c0_i32 : i32, i32
  }
  func.func @transform_1(%arg0: i32) -> (i32, i32) {
    %c0_i32 = arith.constant 0 : i32
    %c0_i32_0 = arith.constant 0 : i32
    return %arg0, %c0_i32 : i32, i32
  }
  func.func @transform_2(%arg0: i32) -> (i32, i32) {
    %c0_i32 = arith.constant 0 : i32
    %c0_i32_0 = arith.constant 0 : i32
    %c0_i32_1 = arith.constant 0 : i32
    return %c0_i32, %c0_i32_0 : i32, i32
  }
  func.func @transform_3(%arg0: i32) -> (i32, i32) {
    %c0_i32 = arith.constant 0 : i32
    %c0_i32_0 = arith.constant 0 : i32
    %c0_i32_1 = arith.constant 0 : i32
    return %c0_i32, %c0_i32_0 : i32, i32
  }
  func.func @transform_4(%arg0: i32) -> (i32, i32) {
    %c0_i32 = arith.constant 0 : i32
    %c0_i32_0 = arith.constant 0 : i32
    %c0_i32_1 = arith.constant 0 : i32
    return %c0_i32, %c0_i32_0 : i32, i32
  }
  func.func @transform_5(%arg0: i32) -> (i32, i32) {
    %c0_i32 = arith.constant 0 : i32
    %c0_i32_0 = arith.constant 0 : i32
    %c0_i32_1 = arith.constant 0 : i32
    return %c0_i32, %c0_i32_0 : i32, i32
  }
  func.func @transform_6(%arg0: i32) -> (i32, i32) {
    %c0_i32 = arith.constant 0 : i32
    %c0_i32_0 = arith.constant 0 : i32
    return %arg0, %c0_i32 : i32, i32
  }
}

module attributes {stable_mosaic.version = 11 : i64} {
  func.func @_att2_softmax_kernel(%arg0: i32, %arg1: memref<1x256x128xf32, #tpu.memory_space<vmem>>, %arg2: memref<1x256x64xf32, #tpu.memory_space<vmem>>, %arg3: memref<32x64xbf16, #tpu.memory_space<vmem>>, %arg4: memref<1x64xf32, #tpu.memory_space<vmem>>, %arg5: memref<1x32xf32, #tpu.memory_space<vmem>>, %arg6: memref<1x32xf32, #tpu.memory_space<vmem>>, %arg7: memref<1x64xf32, #tpu.memory_space<vmem>>, %arg8: memref<1x64xf32, #tpu.memory_space<vmem>>, %arg9: memref<1x64xf32, #tpu.memory_space<vmem>>, %arg10: memref<1x64xf32, #tpu.memory_space<vmem>>, %arg11: memref<1x256x64xf32, #tpu.memory_space<vmem>>) attributes {dimension_semantics = [#tpu.dimension_semantics<parallel>], iteration_bounds = array<i64: 2>, scalar_prefetch = 0 : i64, scratch_operands = 0 : i64, tpu.core_type = #tpu.core_type<tc>, window_params = [{transform_indices = @transform_0, window_bounds = array<i64: 1, 256, 128>}, {transform_indices = @transform_1, window_bounds = array<i64: 1, 256, 64>}, {pipeline_mode = #tpu.pipeline_mode<synchronous>, transform_indices = @transform_2, window_bounds = array<i64: 32, 64>}, {pipeline_mode = #tpu.pipeline_mode<synchronous>, transform_indices = @transform_3, window_bounds = array<i64: 1, 64>}, {pipeline_mode = #tpu.pipeline_mode<synchronous>, transform_indices = @transform_4, window_bounds = array<i64: 1, 32>}, {pipeline_mode = #tpu.pipeline_mode<synchronous>, transform_indices = @transform_5, window_bounds = array<i64: 1, 32>}, {pipeline_mode = #tpu.pipeline_mode<synchronous>, transform_indices = @transform_6, window_bounds = array<i64: 1, 64>}, {pipeline_mode = #tpu.pipeline_mode<synchronous>, transform_indices = @transform_7, window_bounds = array<i64: 1, 64>}, {pipeline_mode = #tpu.pipeline_mode<synchronous>, transform_indices = @transform_8, window_bounds = array<i64: 1, 64>}, {pipeline_mode = #tpu.pipeline_mode<synchronous>, transform_indices = @transform_9, window_bounds = array<i64: 1, 64>}, {transform_indices = @transform_10, window_bounds = array<i64: 1, 256, 64>}]} {
    %c0 = arith.constant 0 : index
    %c0_0 = arith.constant 0 : index
    %c0_1 = arith.constant 0 : index
    %0 = vector.load %arg1[%c0, %c0_0, %c0_1] : memref<1x256x128xf32, #tpu.memory_space<vmem>>, vector<1x256x128xf32>
    %1 = vector.shape_cast %0 : vector<1x256x128xf32> to vector<256x128xf32>
    %2 = vector.extract_strided_slice %1 {offsets = [0, 0], sizes = [256, 64], strides = [1, 1]} : vector<256x128xf32> to vector<256x64xf32>
    %c0_2 = arith.constant 0 : index
    %c0_3 = arith.constant 0 : index
    %3 = vector.load %arg7[%c0_2, %c0_3] : memref<1x64xf32, #tpu.memory_space<vmem>>, vector<1x64xf32>
    %4 = vector.broadcast %3 : vector<1x64xf32> to vector<256x64xf32>
    %5 = arith.mulf %2, %4 : vector<256x64xf32>
    %c0_4 = arith.constant 0 : index
    %c0_5 = arith.constant 0 : index
    %6 = vector.load %arg8[%c0_4, %c0_5] : memref<1x64xf32, #tpu.memory_space<vmem>>, vector<1x64xf32>
    %7 = vector.broadcast %6 : vector<1x64xf32> to vector<256x64xf32>
    %8 = arith.addf %5, %7 : vector<256x64xf32>
    %9 = vector.extract_strided_slice %1 {offsets = [0, 64], sizes = [256, 32], strides = [1, 1]} : vector<256x128xf32> to vector<256x32xf32>
    %c0_6 = arith.constant 0 : index
    %c0_7 = arith.constant 0 : index
    %10 = vector.load %arg5[%c0_6, %c0_7] : memref<1x32xf32, #tpu.memory_space<vmem>>, vector<1x32xf32>
    %11 = vector.broadcast %10 : vector<1x32xf32> to vector<256x32xf32>
    %12 = arith.mulf %9, %11 : vector<256x32xf32>
    %c0_8 = arith.constant 0 : index
    %c0_9 = arith.constant 0 : index
    %13 = vector.load %arg6[%c0_8, %c0_9] : memref<1x32xf32, #tpu.memory_space<vmem>>, vector<1x32xf32>
    %14 = vector.broadcast %13 : vector<1x32xf32> to vector<256x32xf32>
    %15 = arith.addf %12, %14 : vector<256x32xf32>
    %16 = arith.negf %15 : vector<256x32xf32>
    %17 = math.exp %16 : vector<256x32xf32>
    %cst = arith.constant 1.000000e+00 : f32
    %18 = vector.broadcast %cst : f32 to vector<256x32xf32>
    %19 = arith.addf %18, %17 : vector<256x32xf32>
    %20 = arith.divf %18, %19 : vector<256x32xf32>
    %21 = arith.mulf %15, %20 : vector<256x32xf32>
    %22 = arith.truncf %21 : vector<256x32xf32> to vector<256x32xbf16>
    %c0_10 = arith.constant 0 : index
    %c0_11 = arith.constant 0 : index
    %23 = vector.load %arg3[%c0_10, %c0_11] : memref<32x64xbf16, #tpu.memory_space<vmem>>, vector<32x64xbf16>
    %cst_12 = arith.constant dense<0.000000e+00> : vector<256x64xf32>
    %24 = tpu.matmul %22, %23, %cst_12 {dimension_numbers = #tpu.dot_dimension_numbers<[1], [0], [0], [1], [0, 0, 1, 1], [], []>} : vector<256x32xbf16>, vector<32x64xbf16>, vector<256x64xf32> -> vector<256x64xf32>
    %c0_13 = arith.constant 0 : index
    %c0_14 = arith.constant 0 : index
    %25 = vector.load %arg4[%c0_13, %c0_14] : memref<1x64xf32, #tpu.memory_space<vmem>>, vector<1x64xf32>
    %26 = vector.broadcast %25 : vector<1x64xf32> to vector<256x64xf32>
    %27 = arith.addf %24, %26 : vector<256x64xf32>
    %cst_15 = arith.constant dense<0xFF800000> : vector<64xf32>
    %28 = vector.multi_reduction <maximumf>, %27, %cst_15 [0] : vector<256x64xf32> to vector<64xf32>
    %29 = vector.shape_cast %28 : vector<64xf32> to vector<1x64xf32>
    %30 = vector.broadcast %29 : vector<1x64xf32> to vector<256x64xf32>
    %31 = arith.subf %27, %30 : vector<256x64xf32>
    %32 = math.exp %31 : vector<256x64xf32>
    %cst_16 = arith.constant dense<0.000000e+00> : vector<64xf32>
    %33 = vector.multi_reduction <add>, %32, %cst_16 [0] : vector<256x64xf32> to vector<64xf32>
    %34 = vector.shape_cast %33 : vector<64xf32> to vector<1x64xf32>
    %35 = tpu.reciprocal %34 {approx = true} : vector<1x64xf32> -> vector<1x64xf32>
    %c0_17 = arith.constant 0 : index
    %c0_18 = arith.constant 0 : index
    %c0_19 = arith.constant 0 : index
    %36 = vector.load %arg2[%c0_17, %c0_18, %c0_19] : memref<1x256x64xf32, #tpu.memory_space<vmem>>, vector<1x256x64xf32>
    %37 = vector.shape_cast %36 : vector<1x256x64xf32> to vector<256x64xf32>
    %c0_20 = arith.constant 0 : index
    %c0_21 = arith.constant 0 : index
    %38 = vector.load %arg9[%c0_20, %c0_21] : memref<1x64xf32, #tpu.memory_space<vmem>>, vector<1x64xf32>
    %39 = vector.broadcast %38 : vector<1x64xf32> to vector<256x64xf32>
    %40 = arith.mulf %37, %39 : vector<256x64xf32>
    %c0_22 = arith.constant 0 : index
    %c0_23 = arith.constant 0 : index
    %41 = vector.load %arg10[%c0_22, %c0_23] : memref<1x64xf32, #tpu.memory_space<vmem>>, vector<1x64xf32>
    %42 = vector.broadcast %41 : vector<1x64xf32> to vector<256x64xf32>
    %43 = arith.addf %40, %42 : vector<256x64xf32>
    %44 = arith.negf %43 : vector<256x64xf32>
    %45 = math.exp %44 : vector<256x64xf32>
    %cst_24 = arith.constant 1.000000e+00 : f32
    %46 = vector.broadcast %cst_24 : f32 to vector<256x64xf32>
    %47 = arith.addf %46, %45 : vector<256x64xf32>
    %48 = arith.divf %46, %47 : vector<256x64xf32>
    %49 = arith.mulf %43, %48 : vector<256x64xf32>
    %50 = vector.broadcast %35 : vector<1x64xf32> to vector<256x64xf32>
    %51 = arith.mulf %32, %50 : vector<256x64xf32>
    %52 = arith.mulf %51, %8 : vector<256x64xf32>
    %53 = arith.addf %52, %49 : vector<256x64xf32>
    %c0_25 = arith.constant 0 : index
    %c0_26 = arith.constant 0 : index
    %c0_27 = arith.constant 0 : index
    %54 = vector.load %arg11[%c0_25, %c0_26, %c0_27] : memref<1x256x64xf32, #tpu.memory_space<vmem>>, vector<1x256x64xf32>
    %55 = vector.shape_cast %54 : vector<1x256x64xf32> to vector<256x64xf32>
    %56 = vector.shape_cast %53 : vector<256x64xf32> to vector<1x256x64xf32>
    tpu.vector_store %arg11[%c0_25, %c0_26, %c0_27], %56 {strides = array<i32>} : memref<1x256x64xf32, #tpu.memory_space<vmem>>, vector<1x256x64xf32>,
    return
  }
  func.func @transform_0(%arg0: i32) -> (i32, i32, i32) {
    %c0_i32 = arith.constant 0 : i32
    %c0_i32_0 = arith.constant 0 : i32
    %c0_i32_1 = arith.constant 0 : i32
    return %arg0, %c0_i32, %c0_i32_0 : i32, i32, i32
  }
  func.func @transform_1(%arg0: i32) -> (i32, i32, i32) {
    %c0_i32 = arith.constant 0 : i32
    %c0_i32_0 = arith.constant 0 : i32
    %c0_i32_1 = arith.constant 0 : i32
    return %arg0, %c0_i32, %c0_i32_0 : i32, i32, i32
  }
  func.func @transform_2(%arg0: i32) -> (i32, i32) {
    %c0_i32 = arith.constant 0 : i32
    %c0_i32_0 = arith.constant 0 : i32
    %c0_i32_1 = arith.constant 0 : i32
    return %c0_i32, %c0_i32_0 : i32, i32
  }
  func.func @transform_3(%arg0: i32) -> (i32, i32) {
    %c0_i32 = arith.constant 0 : i32
    %c0_i32_0 = arith.constant 0 : i32
    %c0_i32_1 = arith.constant 0 : i32
    return %c0_i32, %c0_i32_0 : i32, i32
  }
  func.func @transform_4(%arg0: i32) -> (i32, i32) {
    %c0_i32 = arith.constant 0 : i32
    %c0_i32_0 = arith.constant 0 : i32
    %c0_i32_1 = arith.constant 0 : i32
    return %c0_i32, %c0_i32_0 : i32, i32
  }
  func.func @transform_5(%arg0: i32) -> (i32, i32) {
    %c0_i32 = arith.constant 0 : i32
    %c0_i32_0 = arith.constant 0 : i32
    %c0_i32_1 = arith.constant 0 : i32
    return %c0_i32, %c0_i32_0 : i32, i32
  }
  func.func @transform_6(%arg0: i32) -> (i32, i32) {
    %c0_i32 = arith.constant 0 : i32
    %c0_i32_0 = arith.constant 0 : i32
    %c0_i32_1 = arith.constant 0 : i32
    return %c0_i32, %c0_i32_0 : i32, i32
  }
  func.func @transform_7(%arg0: i32) -> (i32, i32) {
    %c0_i32 = arith.constant 0 : i32
    %c0_i32_0 = arith.constant 0 : i32
    %c0_i32_1 = arith.constant 0 : i32
    return %c0_i32, %c0_i32_0 : i32, i32
  }
  func.func @transform_8(%arg0: i32) -> (i32, i32) {
    %c0_i32 = arith.constant 0 : i32
    %c0_i32_0 = arith.constant 0 : i32
    %c0_i32_1 = arith.constant 0 : i32
    return %c0_i32, %c0_i32_0 : i32, i32
  }
  func.func @transform_9(%arg0: i32) -> (i32, i32) {
    %c0_i32 = arith.constant 0 : i32
    %c0_i32_0 = arith.constant 0 : i32
    %c0_i32_1 = arith.constant 0 : i32
    return %c0_i32, %c0_i32_0 : i32, i32
  }
  func.func @transform_10(%arg0: i32) -> (i32, i32, i32) {
    %c0_i32 = arith.constant 0 : i32
    %c0_i32_0 = arith.constant 0 : i32
    %c0_i32_1 = arith.constant 0 : i32
    return %arg0, %c0_i32, %c0_i32_0 : i32, i32, i32
  }
}

</mosaic_0001>

<bundles_post_ra>
// kernel: cot_attention_2d.3
= control target key start
LH: loop header
LB: loop body
LE: loop exit
PB: predicated region body
PF: predicated region fallthrough
CT: control target
= control target key end

     0   :  { %s2522_s9 = smov 0   ;;  %s3877_s0 = inlined_call_operand.vmem [shape: bf16[2,342,64], index: 0, kind: input, shape index: {}]   ;;  %s3878_s1 = inlined_call_operand.vmem [shape: bf16[576,64], index: 1, kind: input, shape index: {}]   ;;  %s3879_s2 = inlined_call_operand.vmem [shape: f32[2,288,64], index: 2, kind: output, shape index: {}]  }
   0x1 LB: > { %s2161_s10 = sadd.s32 4294967295, %s2503_s9   ;;  %p2165_p0 = scmp.ge.s32.totalorder %s2503_s9, 1  ;;  %s2503_s9 = sphi %s2522_s9, %s12_s9  }
   0x2   : > { %p112_p1 = scmp.lt.s32.totalorder %s2503_s9, 3 }
   0x4   : > { %p113_p2 = pnand %p2165_p0, %p112_p1 }
   0x6   : > { %116 = sbr.rel (%p113_p2) target bundleno = 540 (0x21c), region = 28 }
   0xd   : > { %p134_p3 = scmp.lt.s32.totalorder %s2161_s10, 1  ;;  %v2426_v0 = vld [vmem:[%s3878_s1] sm:$0xff]   ;;  %v3885_v1 = vmov 0   ;;  %v2427_v2 = vld [vmem:[%s3878_s1 + $0x8] sm:$0xff]   ;;  %v2430_v4 = vld [vmem:[%s3878_s1 + $0x10] sm:$0xff]   ;;  %vm476_vm0 = vcmask 1046528  }
   0xe   : > { %1539 = vmatprep.subr.bf16.mxu0 %v3885_v1  ;;  %2320 = vmatprep.subr.bf16.mxu1 %v3885_v1  ;;  %v2429_v3 = vld [vmem:[%s3878_s1 + $0x80] sm:$0xff]   ;;  %v2431_v5 = vld [vmem:[%s3878_s1 + $0x88] sm:$0xff]   ;;  %vm288_vm1 = vsmask.f32 7424  ;;  %vm758_vm2 = vsmask.f32 5376 }
   0xf   : > { %s4021_s10 = smov (!%p134_p3, %s2161_s10), 1  ;;  %1540 = vmatpush1.bf16.msra.mxu0 %v2426_v0  ;;  %2336 = vmatpush1.bf16.msra.mxu1 %v2429_v3  ;;  %vm664_vm3 = vcmask 1045504   ;;  %s2506_s25 = smov 64   ;;  %vm570_vm4 = vsmask.f32 6400  ;;  %vm926_vm5 = vcmask 523264  }
  0x10   : > { %s2398_s15 = smul.u32 172, %s4021_s10  ;;  %1541 = vmatprep.subr.bf16.mxu0 %v3885_v1  ;;  %2321 = vmatprep.subr.bf16.mxu1 %v3885_v1  ;;  %vm888_vm6 = vcmask 1044480  }
  0x12   : > { %s2551_s22 = scalar_lea.vmem %s3877_s0, %s2398_s15 }
  0x13   : > { %v148_v6 = vld [vmem:[%s2551_s22 + $0xc] sm:$0xf]  ;;  %v149_v7 = vld [vmem:[%s2551_s22 + $0x10] sm:$0xf]  ;;  %v150_v8 = vld [vmem:[%s2551_s22 + $0x14] sm:$0xf]  ;;  %1542 = vmatpush1.bf16.msra.mxu0 %v2427_v2  ;;  %2337 = vmatpush1.bf16.msra.mxu1 %v2431_v5 }
  0x14   : > { %v183_v9 = vld [vmem:[%s2551_s22 + $0x8] sm:$0xe]  ;;  %v2561_v10 = vcombine.low %v149_v7, %v150_v8  ;;  %1543 = vmatprep.subr.bf16.mxu0 %v3885_v1  ;;  %v2570_v14 = vld [vmem:[%s2551_s22 + $0x18] sm:$0xff]   ;;  %v145_v15 = vld [vmem:[%s2551_s22] sm:$0xf]  ;;  %2322 = vmatprep.subr.bf16.mxu1 %v3885_v1 }
  0x15   : > { %v147_v11 = vld [vmem:[%s2551_s22 + $0x8] sm:$0xf]  ;;  %v2565_v12 = vcombine.low %v183_v9, %v148_v6  ;;  %v146_v17 = vld [vmem:[%s2551_s22 + $0x4] sm:$0xf]  ;;  %v2578_v18 = vld [vmem:[%s2551_s22 + $0x38] sm:$0xff]   ;;  %v482_v20 = vrot.slane %v2570_v14, 1 }
  0x16   : > { %v2567_v13 = vcombine.low %v147_v11, %v148_v6  ;;  %v2574_v16 = vrot.slane %v2561_v10, 1  ;;  %v2582_v21 = vcombine.low %v145_v15, %v146_v17  ;;  %v2586_v23 = vld [vmem:[%s2551_s22 + $0x40] sm:$0xff]   ;;  %v2590_v24 = vshll.u32 %v2578_v18, 16  ;;  %v2615_v34 = vld [vmem:[%s2551_s22 + $0x30] sm:$0xff]   ;;  %v2618_v35 = vld [vmem:[%s2551_s22 + $0x48] sm:$0xff]  }
  0x17   : > { %3929 = vst [vmem:[#allocation2_spill] sm:$0xff] %v2565_v12  ;;  %v525_v19 = vrot.slane %v2565_v12, 1  ;;  %1544 = vmatpush1.bf16.msra.mxu0 %v2430_v4  ;;  %v2593_v25 = vshrl.u32 %v2578_v18, 16  ;;  %v2608_v31 = vshll.u32 %v2586_v23, 16  ;;  %v2611_v32 = vshrl.u32 %v2586_v23, 16  ;;  %3931 = vst [vmem:[#allocation4_spill] sm:$0xff] %v2615_v34 }
  0x18   : > { %v297_v22 = vshll.u32 %v2567_v13, 16  ;;  %1545 = vmatprep.subr.bf16.mxu0 %v3885_v1  ;;  %v2600_v27 = vsel %vm476_vm0, %v2574_v16, %v482_v20  ;;  %v290_v28 = vshrl.u32 %v2582_v21, 16  ;;  %v292_v29 = vshll.u32 %v2582_v21, 16  ;;  %v2633_v47 = vld [vmem:[%s2551_s22 + $0x20] sm:$0xff]   ;;  %v2643_v54 = vld [vmem:[%s2551_s22 + $0x50] sm:$0xff]   ;;  %v2671_v3 = vld [vmem:[%s2551_s22 + $0x58] sm:$0xff]  }
  0x19   : > { %v526_v26 = vsel %vm476_vm0, %v525_v19, %v2574_v16  ;;  %3930 = vst [vmem:[#allocation3_spill] sm:$0xff] %v2600_v27  ;;  %533 = vrot.lane.b32.xlu1 %v2600_v27, %s2506_s25  ;;  %v783_v33 = vrot.slane %v2593_v25, 2  ;;  %v784_v37 = vrot.slane %v2590_v24, 3  ;;  %v676_v38 = vrot.slane %v2578_v18, 2  ;;  %v2684_v11 = vld [vmem:[%s2551_s22 + $0x28] sm:$0xff]   ;;  %v2432_v17 = vld [vmem:[%s3878_s1 + $0x18] sm:$0xff]  }
  0x1a   : > { %531 = vrot.lane.b32.xlu0 %v526_v26, %s2506_s25  ;;  %v299_v30 = vrot.slane %v297_v22, 1  ;;  %v294_v36 = vrot.slane %v292_v29, 1  ;;  %v301_v39 = vshrl.u32 %v2567_v13, 16  ;;  %v787_v40 = vrot.slane %v2611_v32, 2 }
  0x1b   : > { %v788_v41 = vrot.slane %v2608_v31, 3  ;;  %v3880_v42 = vrot.slane %v2615_v34, 2  ;;  %v3882_v43 = vshll.u32 %v2561_v10, 16  ;;  %v2627_v45 = vor.u32 %v784_v37, %v783_v33  ;;  %1546 = vmatpush1.bf16.msra.mxu0 %v2432_v17  ;;  %v2712_v33 = vld [vmem:[%s3878_s1 + $0x90] sm:$0xff]   ;;  %v2435_v37 = vld [vmem:[%s3878_s1 + $0x20] sm:$0xff]  }
  0x1c   : > { %v295_v44 = vor.u32 %v294_v36, %v290_v28  ;;  %v2630_v46 = vshll.u32 %v2618_v35, 16  ;;  %v303_v49 = vor.u32 %v301_v39, %v299_v30  ;;  %v2639_v52 = vshrl.u32 %v2618_v35, 16  ;;  %3936 = vst [vmem:[#allocation9_spill] sm:$0xff] %v2712_v33  ;;  %v2715_v36 = vld [vmem:[%s2551_s22 + $0x60] sm:$0xff]   ;;  %1547 = vmatprep.subr.bf16.mxu0 %v3885_v1  ;;  %2338 = vmatpush1.bf16.msra.mxu1 %v2712_v33 }
  0x1d   : > { %3932 = vst [vmem:[#allocation5_spill] sm:$0xff] %v2627_v45  ;;  %v789_v48 = vor.u32 %v788_v41, %v787_v40  ;;  %v307_v50 = vrot.slane %v3882_v43, 1  ;;  %v2651_v56 = vsel %vm664_vm3, %v3880_v42, %v676_v38  ;;  %v484_v58 = vrot.slane %v2633_v47, 1  ;;  %2323 = vmatprep.subr.bf16.mxu1 %v3885_v1  ;;  %v2733_v41 = vld [vmem:[%s3878_s1 + $0x98] sm:$0xff]   ;;  %v2844_v43 = vld [vmem:[%s2551_s22 + $0x70] sm:$0xff]  }
  0x1e   : > { %v300_v51 = vsel %vm288_vm1, %v295_v44, %v299_v30  ;;  %v792_v53 = vrot.slane %v2630_v46, 3  ;;  %3933 = vst [vmem:[#allocation6_spill] sm:$0xff] %v2651_v56  ;;  %v791_v57 = vrot.slane %v2639_v52, 2  ;;  %v3881_v59 = vshrl.u32 %v2561_v10, 16  ;;  %3937 = vst [vmem:[#allocation10_spill] sm:$0xff] %v2733_v41 }
  0x1f   : > { %437 = vrot.lane.b32.xlu0 %v300_v51, %s2506_s25  ;;  %v790_v55 = vsel %vm758_vm2, %v2627_v45, %v789_v48  ;;  %v2658_v60 = vshll.u32 %v2643_v54, 16  ;;  %v308_v61 = vsel %vm288_vm1, %v303_v49, %v307_v50  ;;  %v2662_v62 = vshll.u32 %v2570_v14, 16  ;;  %1548 = vmatpush1.bf16.msra.mxu0 %v2435_v37 }
  0x20   : > { %859 = vrot.lane.b32.xlu1 %v790_v55, %s2506_s25  ;;  %v2665_v63 = vshrl.u32 %v2643_v54, 16  ;;  %v793_v0 = vor.u32 %v792_v53, %v791_v57  ;;  %v678_v2 = vrot.slane %v2586_v23, 2  ;;  %v2678_v7 = vsel %vm476_vm0, %v482_v20, %v484_v58  ;;  %1549 = vmatprep.subr.bf16.mxu0 %v3885_v1 }
  0x21   : > { %3934 = vst [vmem:[#allocation7_spill] sm:$0xff] %v2662_v62  ;;  %v796_v6 = vrot.slane %v2658_v60, 3  ;;  %3935 = vst [vmem:[#allocation8_spill] sm:$0xff] %v2678_v7  ;;  %v311_v8 = vor.u32 %v3881_v59, %v307_v50  ;;  %v315_v9 = vrot.slane %v2662_v62, 1  ;;  %v2688_v15 = vshll.u32 %v2671_v3, 16  ;;  %v2437_v50 = vld [vmem:[%s3878_s1 + $0x28] sm:$0xff]   ;;  %2339 = vmatpush1.bf16.msra.mxu1 %v2733_v41 }
  0x22   : > { %v794_v4 = vsel %vm758_vm2, %v789_v48, %v793_v0  ;;  %v795_v5 = vrot.slane %v2665_v63, 2  ;;  %v2696_v19 = vsel %vm664_vm3, %v676_v38, %v678_v2  ;;  %v2699_v22 = vshrl.u32 %v2671_v3, 16  ;;  %2324 = vmatprep.subr.bf16.mxu1 %v3885_v1  ;;  %v2972_v41 = vld [vmem:[%s2551_s22 + $0x80] sm:$0xff]  }
  0x23   : > { %712 = vrot.lane.b32.xlu0 %v2651_v56, %s2506_s25  ;;  %v316_v26 = vsel %vm288_vm1, %v311_v8, %v315_v9  ;;  %v486_v28 = vrot.slane %v2684_v11, 1  ;;  %v2704_v29 = vshrl.u32 %v2570_v14, 16  ;;  %v2707_v30 = vshll.u32 %v2633_v47, 16  ;;  %1550 = vmatpush1.bf16.msra.mxu0 %v2437_v50  ;;  %v2785_v8 = vld [vmem:[%s3878_s1 + $0xa8] sm:$0xff]  }
  0x24   : > { %439 = vrot.lane.b32.xlu1 %v308_v61, %s2506_s25  ;;  %v797_v20 = vor.u32 %v796_v6, %v795_v5  ;;  %v680_v14 = vrot.slane %v2618_v35, 2  ;;  %v800_v38 = vrot.slane %v2688_v15, 3  ;;  %v799_v40 = vrot.slane %v2699_v22, 2  ;;  %v2775_v5 = vld [vmem:[%s2551_s22 + $0x68] sm:$0xff]   ;;  %1551 = vmatprep.subr.bf16.mxu0 %v3885_v1  ;;  %3942 = vst [vmem:[#allocation15_spill] sm:$0xff] %v2785_v8 }
  0x25   : > { %v2736_v44 = vsel %vm476_vm0, %v484_v58, %v486_v28  ;;  %v319_v48 = vor.u32 %v2704_v29, %v315_v9  ;;  %v323_v49 = vrot.slane %v2707_v30, 1  ;;  %v3884_v53 = vrot.slane %v2615_v34, 1 }
  0x26   : > { %v798_v39 = vsel %vm758_vm2, %v793_v0, %v797_v20  ;;  %3938 = vst [vmem:[#allocation11_spill] sm:$0xff] %v2736_v44  ;;  %v2746_v51 = vsel %vm664_vm3, %v678_v2, %v680_v14  ;;  %v801_v55 = vor.u32 %v800_v38, %v799_v40  ;;  %v2753_v57 = vshrl.u32 %v2633_v47, 16  ;;  %v2765_v0 = vld [vmem:[%s3878_s1 + $0xa0] sm:$0xff]   ;;  %v2440_v47 = vld [vmem:[%s3878_s1 + $0x30] sm:$0xff]  }
  0x27   : > { %861 = vrot.lane.b32.xlu0 %v794_v4, %s2506_s25  ;;  %3939 = vst [vmem:[#allocation12_spill] sm:$0xff] %v2746_v51  ;;  %v2756_v58 = vshll.u32 %v2715_v36, 16  ;;  %v2759_v61 = vshrl.u32 %v2715_v36, 16  ;;  %3940 = vst [vmem:[#allocation13_spill] sm:$0xff] %v2765_v0  ;;  %v324_v2 = vsel %vm288_vm1, %v319_v48, %v323_v49  ;;  %v2769_v4 = vshll.u32 %v2684_v11, 16  ;;  %2340 = vmatpush1.bf16.msra.mxu1 %v2765_v0 }
  0x28   : > { %535 = vrot.lane.b32.xlu1 %v2678_v7, %s2506_s25  ;;  %v682_v6 = vrot.slane %v2643_v54, 2  ;;  %v802_v9 = vsel %vm758_vm2, %v797_v20, %v801_v55  ;;  %2325 = vmatprep.subr.bf16.mxu1 %v3885_v1  ;;  %v2795_v37 = vsel %vm476_vm0, %v486_v28, %v3884_v53  ;;  %v327_v38 = vor.u32 %v2753_v57, %v323_v49  ;;  %v2442_v20 = vld [vmem:[%s3878_s1 + $0x38] sm:$0xff]   ;;  %v2815_v49 = vld [vmem:[%s3878_s1 + $0xb0] sm:$0xff]  }
  0x29   : > { %3941 = vst [vmem:[#allocation14_spill] sm:$0xff] %v2769_v4  ;;  %v803_v17 = vrot.slane %v2759_v61, 2  ;;  %3943 = vst [vmem:[#allocation16_spill] sm:$0xff] %v2795_v37  ;;  %1552 = vmatpush1.bf16.msra.mxu0 %v2440_v47  ;;  %v3883_v40 = vrot.slane %v2630_v46, 1  ;;  %v2809_v28 = vshll.u32 %v2775_v5, 16  ;;  %v2829_v42 = vshrl.u32 %v2684_v11, 16 }
  0x2a   : > { %1553 = vmatprep.subr.bf16.mxu0 %v3885_v1  ;;  %v2806_v48 = vsel %vm664_vm3, %v680_v14, %v682_v6  ;;  %3945 = vst [vmem:[#allocation18_spill] sm:$0xff] %v2815_v49  ;;  %v2821_v14 = vshrl.u32 %v2775_v5, 16  ;;  %v2832_v59 = vshll.u32 %v2615_v34, 16  ;;  %v379_v56 = vrot.slane %v2688_v15, 1 }
  0x2b   : > { %714 = vrot.lane.b32.xlu0 %v2696_v19, %s2506_s25  ;;  %3944 = vst [vmem:[#allocation17_spill] sm:$0xff] %v2806_v48  ;;  %2341 = vmatpush1.bf16.msra.mxu1 %v2785_v8  ;;  %v367_v47 = vor.u32 %v2639_v52, %v3883_v40  ;;  %3946 = vst [vmem:[#allocation19_spill] sm:$0xff] %v2829_v42  ;;  %v808_v11 = vrot.slane %v2809_v28, 3  ;;  %v3948_v12 = vmov 0   ;;  %v2896_v8 = vshrl.u32 %v2844_v43, 16 }
  0x2c   : > { %441 = vrot.lane.b32.xlu1 %v316_v26, %s2506_s25  ;;  %v804_v26 = vrot.slane %v2756_v58, 3  ;;  %2326 = vmatprep.subr.bf16.mxu1 %v3885_v1  ;;  %v395_v45 = vrot.slane %v2809_v28, 1  ;;  %v3956_v0 = vrot.slane %v2578_v18, 1  ;;  %v355_v33 = vrot.slane %v2608_v31, 1 }
  0x2d   : > { %1554 = vmatpush1.bf16.msra.mxu0 %v2442_v20  ;;  %v2853_v20 = vld [vmem:[%s3878_s1 + $0xb8] sm:$0xff]  }
  0x2e   : > { %v805_v50 = vor.u32 %v804_v26, %v803_v17  ;;  %v371_v17 = vrot.slane %v2658_v60, 1  ;;  %v2445_v26 = vld [vmem:[%s3878_s1 + $0x40] sm:$0xff]   ;;  %1555 = vmatprep.subr.bf16.mxu0 %v3885_v1  ;;  %3947 = vst [vmem:[#allocation20_spill] sm:$0xff] %v2853_v20 }
  0x2f   : > { %863 = vrot.lane.b32.xlu0 %v798_v39, %s2506_s25  ;;  %v331_v39 = vrot.slane %v2769_v4, 1  ;;  %2342 = vmatpush1.bf16.msra.mxu1 %v2815_v49 }
  0x30   : > { %537 = vrot.lane.b32.xlu1 %v2736_v44, %s2506_s25  ;;  %v2847_v40 = vsel %vm288_vm1, %v367_v47, %v371_v17  ;;  %v806_v53 = vsel %vm758_vm2, %v801_v55, %v805_v50  ;;  %v375_v1 = vor.u32 %v2665_v63, %v371_v17  ;;  %2327 = vmatprep.subr.bf16.mxu1 %v3948_v12  ;;  %v3949_v47 = vrot.slane %v2578_v18, 1  ;;  %v2447_v55 = vld [vmem:[%s3878_s1 + $0x48] sm:$0xff]   ;;  %v2949_v18 = vld [vmem:[%s3878_s1 + $0xd0] sm:$0xff]  }
  0x31   : > { %v335_v44 = vor.u32 %v2829_v42, %v331_v39  ;;  %1556 = vmatpush1.bf16.msra.mxu0 %v2445_v26  ;;  %v2885_v26 = vld [vmem:[%s3878_s1 + $0xc0] sm:$0xff]   ;;  %3958 = vst [vmem:[#allocation26_spill] sm:$0xff] %v2949_v18  ;;  %v359_v42 = vor.u32 %v2611_v32, %v355_v33 }
  0x32   : > { %v2874_v17 = vsel %vm288_vm1, %v375_v1, %v379_v56  ;;  %1557 = vmatprep.subr.bf16.mxu0 %v3948_v12  ;;  %3952 = vst [vmem:[#allocation22_spill] sm:$0xff] %v2885_v26 }
  0x33   : > { %716 = vrot.lane.b32.xlu0 %v2746_v51, %s2506_s25  ;;  %2343 = vmatpush1.bf16.msra.mxu1 %v2853_v20  ;;  %v2901_v20 = vshrl.u32 %v2615_v34, 16  ;;  %v496_v51 = vrot.slane %v2643_v54, 1  ;;  %v690_v54 = vrot.slane %v2844_v43, 2 }
  0x34   : > { %443 = vrot.lane.b32.xlu1 %v324_v2, %s2506_s25  ;;  %v807_v2 = vrot.slane %v2821_v14, 2  ;;  %2328 = vmatprep.subr.bf16.mxu1 %v3948_v12 }
  0x35   : > { %1558 = vmatpush1.bf16.msra.mxu0 %v2447_v55  ;;  %v2922_v55 = vld [vmem:[%s3878_s1 + $0xc8] sm:$0xff]  }
  0x36   : > { %1559 = vmatprep.subr.bf16.mxu0 %v3948_v12  ;;  %3954 = vst [vmem:[#allocation24_spill] sm:$0xff] %v2922_v55 }
  0x37   : > { %865 = vrot.lane.b32.xlu0 %v802_v9, %s2506_s25  ;;  %v332_v9 = vsel %vm288_vm1, %v327_v38, %v331_v39  ;;  %v684_v38 = vrot.slane %v2671_v3, 2  ;;  %v387_v39 = vrot.slane %v2756_v58, 1  ;;  %2344 = vmatpush1.bf16.msra.mxu1 %v2885_v26  ;;  %v3955_v26 = vrot.slane %v2586_v23, 1 }
  0x38   : > { %539 = vrot.lane.b32.xlu1 %v2795_v37, %s2506_s25  ;;  %v3950_v37 = vrot.slane %v2615_v34, 1  ;;  %2329 = vmatprep.subr.bf16.mxu1 %v3948_v12 }
  0x39   : > { %v2890_v1 = vsel %vm664_vm3, %v682_v6, %v684_v38  ;;  %v2450_v6 = vld [vmem:[%s3878_s1 + $0x50] sm:$0xff]   ;;  %v2937_v7 = vsel %vm476_vm0, %v3956_v0, %v3955_v26  ;;  %v399_v0 = vor.u32 %v2821_v14, %v395_v45 }
  0x3a   : > { %v2866_v49 = vsel %vm476_vm0, %v3950_v37, %v3949_v47  ;;  %v383_v37 = vor.u32 %v2699_v22, %v379_v56  ;;  %3953 = vst [vmem:[#allocation23_spill] sm:$0xff] %v2890_v1  ;;  %v2893_v47 = vshll.u32 %v2844_v43, 16  ;;  %3957 = vst [vmem:[#allocation25_spill] sm:$0xff] %v2937_v7  ;;  %1560 = vmatpush1.bf16.msra.mxu0 %v2450_v6 }
  0x3b   : > { %718 = vrot.lane.b32.xlu0 %v2806_v48, %s2506_s25  ;;  %3951 = vst [vmem:[#allocation21_spill] sm:$0xff] %v2866_v49  ;;  %v2452_v48 = vld [vmem:[%s3878_s1 + $0x58] sm:$0xff]   ;;  %1561 = vmatprep.subr.bf16.mxu0 %v3948_v12 }
  0x3c   : > { %445 = vrot.lane.b32.xlu1 %v332_v9, %s2506_s25  ;;  %v339_v9 = vrot.slane %v2832_v59, 1  ;;  %v812_v34 = vrot.slane %v2893_v47, 3  ;;  %2345 = vmatpush1.bf16.msra.mxu1 %v2922_v55  ;;  %v3962_v55 = vrot.slane %v2586_v23, 1  ;;  %v3012_v23 = vshll.u32 %v2972_v41, 16 }
  0x3d   : > { %2330 = vmatprep.subr.bf16.mxu1 %v3948_v12 }
  0x3e   : > { %v340_v56 = vsel %vm288_vm1, %v335_v44, %v339_v9  ;;  %v686_v44 = vrot.slane %v2715_v36, 2  ;;  %1562 = vmatpush1.bf16.msra.mxu0 %v2452_v48  ;;  %v2987_v48 = vld [vmem:[%s3878_s1 + $0xd8] sm:$0xff]  }
  0x3f   : > { %867 = vrot.lane.b32.xlu0 %v806_v53, %s2506_s25  ;;  %v809_v53 = vor.u32 %v808_v11, %v807_v2  ;;  %v2910_v2 = vld [vmem:[%s2551_s22 + $0x78] sm:$0xff]   ;;  %v391_v11 = vor.u32 %v2759_v61, %v387_v39  ;;  %1563 = vmatprep.subr.bf16.mxu0 %v3948_v12  ;;  %3960 = vst [vmem:[#allocation28_spill] sm:$0xff] %v2987_v48 }
  0x40   : > { %541 = vrot.lane.b32.xlu1 %v2866_v49, %s2506_s25  ;;  %v2904_v49 = vsel %vm288_vm1, %v383_v37, %v387_v39  ;;  %v811_v39 = vrot.slane %v2896_v8, 2  ;;  %v2960_v6 = vshll.u32 %v2910_v2, 16  ;;  %2346 = vmatpush1.bf16.msra.mxu1 %v2949_v18 }
  0x41   : > { %v810_v37 = vsel %vm758_vm2, %v805_v50, %v809_v53  ;;  %v347_v50 = vrot.slane %v2590_v24, 1  ;;  %2331 = vmatprep.subr.bf16.mxu1 %v3948_v12 }
  0x42   : > { %v813_v26 = vor.u32 %v812_v34, %v811_v39  ;;  %v688_v39 = vrot.slane %v2775_v5, 2 }
  0x43   : > { %720 = vrot.lane.b32.xlu0 %v2890_v1, %s2506_s25  ;;  %v2930_v1 = vsel %vm288_vm1, %v391_v11, %v395_v45  ;;  %v2963_v11 = vshrl.u32 %v2910_v2, 16  ;;  %v2455_v45 = vld [vmem:[%s3878_s1 + $0x60] sm:$0xff]  }
  0x44   : > { %447 = vrot.lane.b32.xlu1 %v340_v56, %s2506_s25  ;;  %v343_v56 = vor.u32 %v2901_v20, %v339_v9  ;;  %v2954_v9 = vsel %vm664_vm3, %v684_v38, %v686_v44  ;;  %v3905_v38 = vrot.slane %v2893_v47, 1  ;;  %1564 = vmatpush1.bf16.msra.mxu0 %v2455_v45  ;;  %v596_v45 = vrot.slane %v2832_v59, 2 }
  0x45   : > { %3959 = vst [vmem:[#allocation27_spill] sm:$0xff] %v2954_v9  ;;  %1565 = vmatprep.subr.bf16.mxu0 %v3948_v12  ;;  %2347 = vmatpush1.bf16.msra.mxu1 %v2987_v48  ;;  %v600_v48 = vrot.slane %v2590_v24, 2  ;;  %v604_v24 = vrot.slane %v2608_v31, 2 }
  0x46   : > { %v2978_v34 = vsel %vm288_vm1, %v399_v0, %v3905_v38  ;;  %v816_v0 = vrot.slane %v2960_v6, 3  ;;  %v3961_v38 = vrot.slane %v2618_v35, 1  ;;  %2332 = vmatprep.subr.bf16.mxu1 %v3948_v12 }
  0x47   : > { %869 = vrot.lane.b32.xlu0 %v810_v37, %s2506_s25  ;;  %v348_v37 = vsel %vm288_vm1, %v343_v56, %v347_v50  ;;  %v814_v56 = vsel %vm758_vm2, %v809_v53, %v813_v26  ;;  %v2458_v53 = vld [vmem:[%s3878_s1 + $0x68] sm:$0xff]  }
  0x48   : > { %543 = vrot.lane.b32.xlu1 %v2937_v7, %s2506_s25  ;;  %v815_v7 = vrot.slane %v2963_v11, 2  ;;  %v2999_v18 = vsel %vm476_vm0, %v3962_v55, %v3961_v38  ;;  %v3018_v55 = vld [vmem:[%s3878_s1 + $0xe0] sm:$0xff]   ;;  %v3027_v38 = vshrl.u32 %v2972_v41, 16  ;;  %1566 = vmatpush1.bf16.msra.mxu0 %v2458_v53  ;;  %v3055_v53 = vld [vmem:[%s3878_s1 + $0xe8] sm:$0xff]  }
  0x49   : > { %3963 = vst [vmem:[#allocation29_spill] sm:$0xff] %v2999_v18  ;;  %3965 = vst [vmem:[#allocation31_spill] sm:$0xff] %v3018_v55  ;;  %1567 = vmatprep.subr.bf16.mxu0 %v3948_v12  ;;  %2348 = vmatpush1.bf16.msra.mxu1 %v3018_v55  ;;  %v3967_v55 = vrot.slane %v2618_v35, 1 }
  0x4a   : > { %3966 = vst [vmem:[#allocation32_spill] sm:$0xff] %v3055_v53  ;;  %2333 = vmatprep.subr.bf16.mxu1 %v3948_v12 }
  0x4b   : > { %722 = vrot.lane.b32.xlu0 %v2954_v9, %s2506_s25  ;;  %v351_v9 = vor.u32 %v2593_v25, %v347_v50  ;;  %v595_v50 = vrot.slane %v2901_v20, 1 }
  0x4c   : > { %449 = vrot.lane.b32.xlu1 %v348_v37, %s2506_s25  ;;  %v3009_v37 = vsel %vm664_vm3, %v686_v44, %v688_v39  ;;  %v3024_v44 = vor.u32 %v816_v0, %v815_v7  ;;  %v3040_v0 = vld [vmem:[%s2551_s22 + $0x88] sm:$0xff]  }
  0x4d   : > { %3964 = vst [vmem:[#allocation30_spill] sm:$0xff] %v3009_v37  ;;  %v356_v27 = vsel %vm288_vm1, %v351_v9, %v355_v33  ;;  %v3037_v7 = vor.u32 %v596_v45, %v595_v50  ;;  %v820_v9 = vrot.slane %v3012_v23, 3  ;;  %v819_v50 = vrot.slane %v3027_v38, 2  ;;  %2349 = vmatpush1.bf16.msra.mxu1 %v3055_v53 }
  0x4e   : > { %v818_v31 = vsel %vm758_vm2, %v813_v26, %v3024_v44  ;;  %v3086_v33 = vshrl.u32 %v3040_v0, 16  ;;  %2334 = vmatprep.subr.bf16.mxu1 %v3948_v12  ;;  %v612_v53 = vrot.slane %v2658_v60, 2 }
  0x4f   : > { %871 = vrot.lane.b32.xlu0 %v814_v56, %s2506_s25  ;;  %v599_v56 = vrot.slane %v2593_v25, 1  ;;  %v603_v25 = vrot.slane %v2611_v32, 1  ;;  %v3083_v32 = vsel %vm664_vm3, %v688_v39, %v690_v54 }
  0x50   : > { %545 = vrot.lane.b32.xlu1 %v2999_v18, %s2506_s25  ;;  %v2460_v18 = vld [vmem:[%s3878_s1 + $0x70] sm:$0xff]   ;;  %3969 = vst [vmem:[#allocation34_spill] sm:$0xff] %v3083_v32 }
  0x51   : > { %v3043_v4 = vor.u32 %v600_v48, %v599_v56  ;;  %v607_v48 = vrot.slane %v2639_v52, 1  ;;  %v605_v45 = vor.u32 %v604_v24, %v603_v25  ;;  %v608_v56 = vrot.slane %v2630_v46, 2  ;;  %1568 = vmatpush1.bf16.msra.mxu0 %v2460_v18  ;;  %v3092_v18 = vld [vmem:[%s3878_s1 + $0xf0] sm:$0xff]  }
  0x52   : > { %v3074_v52 = vshll.u32 %v3040_v0, 16  ;;  %1569 = vmatprep.subr.bf16.mxu0 %v3948_v12  ;;  %3970 = vst [vmem:[#allocation35_spill] sm:$0xff] %v3092_v18  ;;  %v498_v25 = vrot.slane %v2671_v3, 1  ;;  %v611_v24 = vrot.slane %v2665_v63, 1  ;;  %v615_v3 = vrot.slane %v2699_v22, 1  ;;  %2350 = vmatpush1.bf16.msra.mxu1 %v3092_v18 }
  0x53   : > { %724 = vrot.lane.b32.xlu0 %v3009_v37, %s2506_s25  ;;  %v3067_v37 = vsel %vm476_vm0, %v3967_v55, %v496_v51  ;;  %v3079_v35 = vsel %vm570_vm4, %v3043_v4, %v605_v45  ;;  %v609_v26 = vor.u32 %v608_v56, %v607_v48  ;;  %v821_v55 = vor.u32 %v820_v9, %v819_v50  ;;  %v3106_v56 = vld [vmem:[%s2551_s22 + $0x90] sm:$0xff]  }
  0x54   : > { %451 = vrot.lane.b32.xlu1 %v356_v27, %s2506_s25  ;;  %3968 = vst [vmem:[#allocation33_spill] sm:$0xff] %v3067_v37  ;;  %v2462_v27 = vld [vmem:[%s3878_s1 + $0x78] sm:$0xff]   ;;  %v3971_v48 = vrot.slane %v2630_v46, 1  ;;  %v692_v9 = vrot.slane %v2910_v2, 2  ;;  %v823_v63 = vrot.slane %v3086_v33, 2  ;;  %v824_v46 = vrot.slane %v3074_v52, 3  ;;  %2335 = vmatprep.subr.bf16.mxu1 %v3948_v12 }
  0x55   : > { %v3099_v39 = vsel %vm570_vm4, %v605_v45, %v609_v26  ;;  %1570 = vmatpush1.bf16.msra.mxu0 %v2462_v27  ;;  %v613_v60 = vor.u32 %v612_v53, %v611_v24  ;;  %v616_v50 = vrot.slane %v2688_v15, 2  ;;  %v822_v22 = vsel %vm758_vm2, %v3024_v44, %v821_v55  ;;  %v3133_v27 = vld [vmem:[%s3878_s1 + $0x100] sm:$0xff]  }
  0x56   : > { %1716 = vmatprep.subr.bf16.mxu0 %v3948_v12  ;;  %v3127_v45 = vsel %vm476_vm0, %v496_v51, %v498_v25  ;;  %v619_v24 = vrot.slane %v2759_v61, 1  ;;  %v3141_v44 = vsel %vm664_vm3, %v690_v54, %v692_v9  ;;  %v620_v51 = vrot.slane %v2756_v58, 2 }
  0x57   : > { %873 = vrot.lane.b32.xlu0 %v818_v31, %s2506_s25  ;;  %v364_v31 = vsel %vm288_vm1, %v359_v42, %v3971_v48  ;;  %v3120_v42 = vld [vmem:[%s3878_s1 + $0xf8] sm:$0xff]   ;;  %3973 = vst [vmem:[#allocation37_spill] sm:$0xff] %v3127_v45  ;;  %v644_v48 = vshrl.u32 %v3106_v56, 16  ;;  %v3137_v53 = vsel %vm570_vm4, %v609_v26, %v613_v60  ;;  %v617_v15 = vor.u32 %v616_v50, %v615_v3 }
  0x58   : > { %547 = vrot.lane.b32.xlu1 %v3067_v37, %s2506_s25  ;;  %3972 = vst [vmem:[#allocation36_spill] sm:$0xff] %v3120_v42  ;;  %3974 = vst [vmem:[#allocation38_spill] sm:$0xff] %v3141_v44  ;;  %v825_v37 = vor.u32 %v824_v46, %v823_v63  ;;  %v647_v18 = vshll.u32 %v3106_v56, 16  ;;  %2351 = vmatpush1.bf16.msra.mxu1 %v3120_v42  ;;  %v780_v3 = vrot.slane %v2832_v59, 3  ;;  %v500_v61 = vrot.slane %v2715_v36, 1 }
  0x59   : > { %v3149_v26 = vsel %vm570_vm4, %v613_v60, %v617_v15  ;;  %2276 = vmatprep.subr.bf16.mxu1 %v3133_v27  ;;  %v621_v58 = vor.u32 %v620_v51, %v619_v24  ;;  %v624_v54 = vrot.slane %v2809_v28, 2  ;;  %v694_v63 = vrot.slane %v2972_v41, 2 }
  0x5a   : > { %v827_v46 = vrot.slane %v644_v48, 2  ;;  %v627_v59 = vrot.slane %v2896_v8, 1  ;;  %v628_v36 = vrot.slane %v2893_v47, 2  ;;  %v631_v24 = vrot.slane %v2963_v11, 1 }
  0x5b   : > { %726 = vrot.lane.b32.xlu0 %v3083_v32, %s2506_s25  ;;  %v3163_v50 = vsel %vm570_vm4, %v617_v15, %v621_v58  ;;  %v826_v28 = vsel %vm758_vm2, %v821_v55, %v825_v37  ;;  %v632_v51 = vrot.slane %v2960_v6, 2  ;;  %v3175_v15 = vld [vmem:[%s2551_s22 + $0x98] sm:$0xff]   ;;  %v3183_v55 = vsel %vm476_vm0, %v498_v25, %v500_v61 }
  0x5c   : > { %453 = vrot.lane.b32.xlu1 %v364_v31, %s2506_s25  ;;  %v779_v31 = vrot.slane %v2901_v20, 2  ;;  %v623_v20 = vrot.slane %v2821_v14, 1  ;;  %v828_v14 = vrot.slane %v647_v18, 3 }
  0x5d   : > { %v633_v42 = vor.u32 %v632_v51, %v631_v24  ;;  %v832_v24 = vshrl.u32 %v3175_v15, 16 }
  0x5e   : > { %v3159_v60 = vor.u32 %v780_v3, %v779_v31  ;;  %v635_v31 = vrot.slane %v3027_v38, 1  ;;  %v829_v25 = vor.u32 %v828_v14, %v827_v46  ;;  %v696_v14 = vrot.slane %v3040_v0, 2 }
  0x5f   : > { %875 = vrot.lane.b32.xlu0 %v822_v22, %s2506_s25  ;;  %v625_v22 = vor.u32 %v624_v54, %v623_v20  ;;  %v629_v20 = vor.u32 %v628_v36, %v627_v59  ;;  %v636_v54 = vrot.slane %v3012_v23, 2 }
  0x60   : > { %549 = vrot.lane.b32.xlu1 %v3127_v45, %s2506_s25  ;;  %v639_v45 = vrot.slane %v3086_v33, 1  ;;  %v830_v46 = vsel %vm758_vm2, %v825_v37, %v829_v25 }
  0x61   : > { %v3178_v3 = vsel %vm570_vm4, %v621_v58, %v625_v22  ;;  %v3187_v32 = vsel %vm570_vm4, %v625_v22, %v629_v20  ;;  %v3191_v58 = vsel %vm664_vm3, %v692_v9, %v694_v63  ;;  %v3194_v59 = vsel %vm570_vm4, %v629_v20, %v633_v42 }
  0x62   : > { %v835_v22 = vshll.u32 %v3175_v15, 16  ;;  %v502_v9 = vrot.slane %v2775_v5, 1 }
  0x63   : > { %728 = vrot.lane.b32.xlu0 %v3141_v44, %s2506_s25  ;;  %v640_v44 = vrot.slane %v3074_v52, 2 }
  0x64   : > { %455 = vrot.lane.b32.xlu1 %v2847_v40, %s2506_s25  ;;  %v637_v40 = vor.u32 %v636_v54, %v635_v31  ;;  %v646_v31 = vrot.slane %v644_v48, 1  ;;  %v837_v20 = vrot.slane %v835_v22, 3  ;;  %v3214_v54 = vld [vmem:[%s2551_s22 + $0xa0] ss:$0 sps:$4 sm:$0x77]   ;;  %v3217_v5 = vsel %vm476_vm0, %v500_v61, %v502_v9 }
  0x65   : > { %v641_v36 = vor.u32 %v640_v44, %v639_v45  ;;  %v649_v45 = vrot.slane %v647_v18, 2  ;;  %3975 = vst [vmem:[#allocation39_spill] sm:$0xff] %v3214_v54  ;;  %v2456_v48 = vld [vmem:[%s2551_s22 + $0x98] ss:$0 sps:$4 sm:$0x33]   ;;  %v844_v61 = vshll.u32 %v3214_v54, 16 }
  0x66   : > { %v3201_v51 = vsel %vm570_vm4, %v633_v42, %v637_v40  ;;  %v834_v42 = vrot.slane %v832_v24, 2  ;;  %v841_v24 = vshrl.u32 %v3214_v54, 16  ;;  %v504_v22 = vrot.slane %v2844_v43, 1 }
  0x67   : > { %877 = vrot.lane.b32.xlu0 %v826_v28, %s2506_s25  ;;  %v3205_v28 = vsel %vm570_vm4, %v637_v40, %v641_v36  ;;  %v650_v44 = vor.u32 %v649_v45, %v646_v31  ;;  %v653_v40 = vshrl.u32 %v2456_v48, 16  ;;  %v656_v31 = vshll.u32 %v2456_v48, 16 }
  0x68   : > { %551 = vrot.lane.b32.xlu1 %v3183_v55, %s2506_s25  ;;  %v838_v37 = vor.u32 %v837_v20, %v834_v42  ;;  %v843_v42 = vrot.slane %v841_v24, 2  ;;  %v846_v20 = vrot.slane %v844_v61, 3  ;;  %v3241_v54 = vsel %vm476_vm0, %v502_v9, %v504_v22  ;;  %v2476_v24 = vld [vmem:[%s2551_s22 + $0x4] sm:$0xf] }
  0x69   : > { %v3221_v18 = vsel %vm570_vm4, %v641_v36, %v650_v44  ;;  %v655_v45 = vrot.slane %v653_v40, 1  ;;  %v658_v36 = vrot.slane %v656_v31, 2  ;;  %v506_v40 = vrot.slane %v2910_v2, 1  ;;  %v182_v31 = vld [vmem:[%s2551_s22] sm:$0xe] }
  0x6a   : > { %3976 = vst [vmem:[#allocation40_spill] sm:$0xff] %v3221_v18  ;;  %v839_v18 = vsel %vm758_vm2, %v829_v25, %v838_v37  ;;  %v847_v25 = vor.u32 %v846_v20, %v843_v42  ;;  %v2187_v61 = vcombine.low %v182_v31, %v2476_v24  ;;  %v3295_v20 = vld [vmem:[%s2551_s22 + $0x90] ss:$0 sps:$4 sm:$0x11]  }
  0x6b   : > { %730 = vrot.lane.b32.xlu0 %v3191_v58, %s2506_s25 }
  0x6c   : > { %457 = vrot.lane.b32.xlu1 %v2874_v17, %s2506_s25  ;;  %v3227_v17 = vsel %vm664_vm3, %v694_v63, %v696_v14  ;;  %v3238_v63 = vrot.slane %v3106_v56, 2  ;;  %v848_v9 = vsel %vm758_vm2, %v838_v37, %v847_v25  ;;  %v2467_v25 = vld [vmem:[%s2551_s22 + $0x98] ss:$0 sps:$4 sm:$0x11]  }
  0x6f   : > { %879 = vrot.lane.b32.xlu0 %v830_v46, %s2506_s25  ;;  %v659_v46 = vor.u32 %v658_v36, %v655_v45 }
  0x70   : > { %553 = vrot.lane.b32.xlu1 %v3217_v5, %s2506_s25 }
  0x71   : > { %v3244_v43 = vsel %vm570_vm4, %v650_v44, %v659_v46  ;;  %v700_v44 = vrot.slane %v2456_v48, 2  ;;  %v411_v48 = vrot.slane %v2960_v6, 1  ;;  %v477_v46 = vrot.slane %v2187_v61, 1 }
  0x73   : > { %732 = vrot.lane.b32.xlu0 %v3227_v17, %s2506_s25  ;;  %v701_v2 = vsel %vm664_vm3, %v3238_v63, %v700_v44  ;;  %v415_v42 = vor.u32 %v2963_v11, %v411_v48 }
  0x74   : > { %459 = vrot.lane.b32.xlu1 %v2904_v49, %s2506_s25  ;;  %v3251_v49 = vsel %vm664_vm3, %v696_v14, %v3238_v63  ;;  %v508_v14 = vrot.slane %v2972_v41, 1  ;;  %v478_v41 = vrot.slane %v2567_v13, 1 }
  0x76   : > { %v3279_v45 = vsel %vm476_vm0, %v506_v40, %v508_v14 }
  0x77   : > { %881 = vrot.lane.b32.xlu0 %v839_v18, %s2506_s25  ;;  %v3260_v18 = vsel %vm476_vm0, %v504_v22, %v506_v40  ;;  %v189_v22 = vld [vmem:[%s2551_s22 + $0x10] sm:$0xc] }
  0x78   : > { %555 = vrot.lane.b32.xlu1 %v3241_v54, %s2506_s25 }
  0x7b   : > { %734 = vrot.lane.b32.xlu0 %v3251_v49, %s2506_s25 }
  0x7c   : > { %461 = vrot.lane.b32.xlu1 %v2930_v1, %s2506_s25  ;;  %v3977_v1 = vrot.slane %v2893_v47, 1  ;;  %v3283_v47 = vrot.slane %v3040_v0, 1  ;;  %v527_v0 = vrot.slane %v3106_v56, 1  ;;  %v427_v56 = vrot.slane %v3074_v52, 1 }
  0x7e   : > { %v407_v37 = vor.u32 %v2896_v8, %v3977_v1  ;;  %v3286_v8 = vld [vmem:[%s2551_s22 + $0x14] sm:$0xf]  ;;  %v3304_v40 = vsel %vm476_vm0, %v508_v14, %v3283_v47  ;;  %v528_v14 = vsel %vm476_vm0, %v3283_v47, %v527_v0 }
  0x7f   : > { %883 = vrot.lane.b32.xlu0 %v848_v9, %s2506_s25  ;;  %v3289_v6 = vcombine.low %v189_v22, %v3286_v8  ;;  %v768_v22 = vrot.slane %v2662_v62, 3 }
  0x80   : > { %557 = vrot.lane.b32.xlu1 %v3260_v18, %s2506_s25  ;;  %v412_v36 = vsel %vm288_vm1, %v407_v37, %v411_v48  ;;  %v529_v37 = vrot.slane %v2467_v25, 1  ;;  %v767_v48 = vrot.slane %v2704_v29, 2 }
  0x81   : > { %v760_v9 = vshrl.u32 %v3289_v6, 16  ;;  %v763_v11 = vshll.u32 %v3289_v6, 16 }
  0x83   : > { %736 = vrot.lane.b32.xlu0 %v701_v2, %s2506_s25  ;;  %v433_v2 = vshll.u32 %v3295_v20, 16  ;;  %v765_v52 = vrot.slane %v763_v11, 3 }
  0x84   : > { %463 = vrot.lane.b32.xlu1 %v2978_v34, %s2506_s25  ;;  %v419_v34 = vrot.slane %v3012_v23, 1  ;;  %v479_v23 = vsel %vm476_vm0, %v477_v46, %v478_v41 }
  0x85   : > { %v435_v25 = vrot.slane %v433_v2, 1 }
  0x86   : > { %v420_v44 = vsel %vm288_vm1, %v415_v42, %v419_v34  ;;  %v423_v31 = vor.u32 %v3027_v38, %v419_v34  ;;  %v762_v38 = vrot.slane %v760_v9, 2  ;;  %v481_v42 = vsel %vm476_vm0, %v478_v41, %v2574_v16 }
  0x87   : > { %559 = vrot.lane.b32.xlu0 %v3279_v45, %s2506_s25  ;;  %v431_v34 = vor.u32 %v3086_v33, %v427_v56  ;;  %v530_v9 = vsel %vm476_vm0, %v527_v0, %v529_v37  ;;  %v602_v33 = vsel %vm570_vm4, %v3037_v7, %v3043_v4 }
  0x88   : > { %465 = vrot.lane.b32.xlu1 %v412_v36, %s2506_s25  ;;  %v188_v36 = vld [vmem:[%s2551_s22 + $0x8] sm:$0xc]  ;;  %v428_v46 = vsel %vm288_vm1, %v423_v31, %v427_v56  ;;  %v766_v11 = vor.u32 %v765_v52, %v762_v38  ;;  %v666_v56 = vrot.slane %v2561_v10, 2  ;;  %v3354_v38 = vld [vmem:[%s2551_s22 + $0x18] sm:$0xff]  }
  0x89   : > { %v436_v41 = vsel %vm288_vm1, %v431_v34, %v435_v25  ;;  %v3357_v52 = vrot.slane %v3354_v38, 2  ;;  %v3979_v34 = vld [vmem:[#allocation14_spill] sm:$0xff] }
  0x8a   : > { %v776_v25 = vrot.slane %v3979_v34, 3 }
  0x8b   : > { %561 = vrot.lane.b32.xlu0 %v3304_v40, %s2506_s25  ;;  %v534_v61 = vpop.permute.xlu1 %533 }
  0x8c   : > { %v532_v1 = vpop.permute.xlu0 %531  ;;  %467 = vrot.lane.b32.xlu1 %v420_v44, %s2506_s25  ;;  %v769_v44 = vor.u32 %v768_v22, %v767_v48 }
  0x8d   : > { %v983_v24 = vsel %vm926_vm5, %v479_v23, %v532_v1  ;;  %v2478_v23 = vld [vmem:[%s2551_s22 + $0xc] sm:$0xf] }
  0x8e   : > { %1571 = vmatprep.mubr.bf16.mxu0 %v983_v24  ;;  %v2192_v1 = vcombine.low %v188_v36, %v2478_v23  ;;  %v987_v24 = vsel %vm926_vm5, %v481_v42, %v534_v61  ;;  %v770_v4 = vsel %vm758_vm2, %v766_v11, %v769_v44  ;;  %v3980_v11 = vshll.u32 %v2561_v10, 16 }
  0x8f   : > { %563 = vrot.lane.b32.xlu0 %v528_v14, %s2506_s25  ;;  %v771_v14 = vrot.slane %v2753_v57, 2 }
  0x90   : > { %469 = vrot.lane.b32.xlu1 %v428_v46, %s2506_s25  ;;  %v665_v2 = vrot.slane %v2192_v1, 2  ;;  %v3978_v46 = vld [vmem:[#allocation19_spill] sm:$0xff] }
  0x91   : > { %v438_v62 = vpop.permute.xlu0 %437  ;;  %v775_v42 = vrot.slane %v3978_v46, 2  ;;  %v2481_v1 = vld [vmem:[%s3878_s1 + $0x88] sm:$0xff]  }
  0x92   : > { %v928_v31 = vsel %vm926_vm5, %v2582_v21, %v438_v62  ;;  %v860_v16 = vpop.permute.xlu1 %859  ;;  %v772_v21 = vrot.slane %v2707_v30, 3  ;;  %v2479_v62 = vld [vmem:[%s3878_s1 + $0x80] sm:$0xff]   ;;  %v667_v22 = vsel %vm664_vm3, %v665_v2, %v666_v56 }
  0x93   : > { %1572 = vmatmul.mubr.bf16.vlgmr.msra.gmra.mrb[0].mxu0 %v928_v31  ;;  %v1147_v0 = vsel %vm926_vm5, %v2696_v19, %v860_v16  ;;  %565 = vrot.lane.b32.xlu0 %v530_v9, %s2506_s25  ;;  %v2471_v19 = vld [vmem:[%s3878_s1 + $0x108] sm:$0xff]   ;;  %v3981_v31 = vshrl.u32 %v2561_v10, 16 }
  0x94   : > { %1717 = vmatpush1.bf16.msra.mxu0 %v2479_v62  ;;  %1579 = vmatprep.mubr.bf16.mxu0 %v987_v24  ;;  %v773_v36 = vor.u32 %v772_v21, %v771_v14  ;;  %v580_v24 = vrot.slane %v3980_v11, 2  ;;  %v777_v21 = vor.u32 %v776_v25, %v775_v42  ;;  %v3383_v62 = vld [vmem:[%s2551_s22 + $0x20] sm:$0xff]   ;;  %v3401_v25 = vld [vmem:[%s2551_s22 + $0x28] sm:$0xff]  }
  0x95   : > { %v713_v37 = vpop.permute.xlu0 %712  ;;  %1788 = vmatprep.mubr.bf16.mxu1 %v1147_v0  ;;  %1718 = vmatprep.subr.bf16.mxu0 %v3948_v12  ;;  %v579_v16 = vrot.slane %v3981_v31, 1  ;;  %v3983_v0 = vld [vmem:[#allocation3_spill] sm:$0xff]  ;;  %v3986_v31 = vld [vmem:[#allocation17_spill] sm:$0xff] }
  0x96   : > { %v1075_v48 = vsel %vm926_vm5, %v602_v33, %v713_v37  ;;  %v440_v61 = vpop.permute.xlu1 %439  ;;  %471 = vrot.lane.b32.xlu1 %v436_v41, %s2506_s25  ;;  %v3982_v33 = vld [vmem:[#allocation12_spill] sm:$0xff]  ;;  %v669_v41 = vsel %vm664_vm3, %v666_v56, %v3357_v52  ;;  %v774_v14 = vsel %vm758_vm2, %v769_v44, %v773_v36 }
  0x97   : > { %1789 = vmatmul.mubr.bf16.vlgmr.msra.gmra.mrb[0].mxu1 %v1075_v48  ;;  %849 = vrot.lane.b32.xlu0 %v770_v4, %s2506_s25  ;;  %v931_v23 = vsel %vm926_vm5, %v2567_v13, %v440_v61  ;;  %v670_v4 = vrot.slane %v3383_v62, 2  ;;  %v2472_v37 = vld [vmem:[%s3878_s1 + $0x110] sm:$0xff]   ;;  %v3984_v48 = vld [vmem:[#allocation9_spill] sm:$0xff] }
  0x98   : > { %2277 = vmatpush3.bf16.msra.mxu1 %v3133_v27  ;;  %1719 = vmatpush1.bf16.msra.mxu0 %v2481_v1  ;;  %v3985_v1 = vld [vmem:[#allocation10_spill] sm:$0xff] }
  0x99   : > { %v862_v9 = vpop.permute.xlu0 %861  ;;  %1720 = vmatprep.subr.bf16.mxu0 %v3948_v12  ;;  %2278 = vmatprep.subr.bf16.mxu1 %v2471_v19  ;;  %v3398_v42 = vsel %vm664_vm3, %v3357_v52, %v670_v4 }
  0x9a   : > { %v536_v27 = vpop.permute.xlu1 %535  ;;  %v1151_v13 = vsel %vm926_vm5, %v3982_v33, %v862_v9  ;;  %702 = vrot.lane.b32.xlu1 %v667_v22, %s2506_s25  ;;  %v778_v22 = vsel %vm758_vm2, %v773_v36, %v777_v21  ;;  %v2473_v36 = vld [vmem:[%s3878_s1 + $0x118] sm:$0xff]  }
  0x9b   : > { %1580 = vmatmul.mubr.bf16.gmra.mrb[4].mxu0 %v931_v23  ;;  %1796 = vmatprep.mubr.bf16.mxu1 %v1151_v13  ;;  %v991_v2 = vsel %vm926_vm5, %v3983_v0, %v536_v27  ;;  %v672_v23 = vrot.slane %v3401_v25, 2  ;;  %v3988_v13 = vld [vmem:[#allocation13_spill] sm:$0xff] }
  0x9c   : > { %1587 = vmatprep.mubr.bf16.mxu0 %v991_v2  ;;  %1721 = vmatpush1.bf16.msra.mxu0 %v3984_v48 }
  0x9d   : > { %v715_v56 = vpop.permute.xlu0 %714  ;;  %1722 = vmatprep.subr.bf16.mxu0 %v3948_v12  ;;  %2279 = vmatpush3.bf16.msra.mxu1 %v2471_v19  ;;  %v3404_v19 = vor.u32 %v580_v24, %v579_v16  ;;  %v782_v16 = vsel %vm758_vm2, %v777_v21, %v3159_v60  ;;  %v3423_v33 = vsel %vm664_vm3, %v670_v4, %v672_v23  ;;  %v3990_v4 = vld [vmem:[#allocation4_spill] sm:$0xff] }
  0x9e   : > { %v1079_v44 = vsel %vm926_vm5, %v3079_v35, %v715_v56  ;;  %v442_v61 = vpop.permute.xlu1 %441  ;;  %851 = vrot.lane.b32.xlu0 %v774_v14, %s2506_s25  ;;  %704 = vrot.lane.b32.xlu1 %v669_v41, %s2506_s25  ;;  %v3989_v14 = vld [vmem:[#allocation5_spill] sm:$0xff] }
  0x9f   : > { %1797 = vmatmul.mubr.bf16.gmra.mrb[4].mxu1 %v1079_v44  ;;  %2280 = vmatprep.subr.bf16.mxu1 %v2472_v37  ;;  %v934_v35 = vsel %vm926_vm5, %v2561_v10, %v442_v61  ;;  %v3987_v10 = vld [vmem:[#allocation8_spill] sm:$0xff]  ;;  %v786_v21 = vsel %vm758_vm2, %v3159_v60, %v3989_v14  ;;  %v3994_v60 = vld [vmem:[#allocation11_spill] sm:$0xff] }
  0xa0   : > { %1723 = vmatpush1.bf16.msra.mxu0 %v3985_v1  ;;  %v3995_v1 = vld [vmem:[#allocation18_spill] sm:$0xff] }
  0xa1   : > { %v864_v9 = vpop.permute.xlu0 %863  ;;  %1724 = vmatprep.subr.bf16.mxu0 %v3948_v12  ;;  %2281 = vmatpush3.bf16.msra.mxu1 %v2472_v37  ;;  %v3991_v37 = vrot.slane %v3990_v4, 2 }
  0xa2   : > { %v538_v11 = vpop.permute.xlu1 %537  ;;  %v1155_v27 = vsel %vm926_vm5, %v3986_v31, %v864_v9  ;;  %853 = vrot.lane.b32.xlu0 %v778_v22, %s2506_s25  ;;  %706 = vrot.lane.b32.xlu1 %v3398_v42, %s2506_s25  ;;  %v3993_v22 = vld [vmem:[#allocation23_spill] sm:$0xff] }
  0xa3   : > { %1588 = vmatmul.mubr.bf16.gmra.mrb[8].mxu0 %v934_v35  ;;  %1804 = vmatprep.mubr.bf16.mxu1 %v1155_v27  ;;  %v995_v24 = vsel %vm926_vm5, %v3987_v10, %v538_v11  ;;  %v3438_v48 = vsel %vm664_vm3, %v672_v23, %v3991_v37  ;;  %v3996_v27 = vld [vmem:[#allocation20_spill] sm:$0xff] }
  0xa4   : > { %1595 = vmatprep.mubr.bf16.mxu0 %v995_v24  ;;  %1725 = vmatpush1.bf16.msra.mxu0 %v3988_v13  ;;  %v4000_v37 = vld [vmem:[#allocation24_spill] sm:$0xff] }
  0xa5   : > { %v717_v41 = vpop.permute.xlu0 %716  ;;  %1726 = vmatprep.subr.bf16.mxu0 %v3948_v12  ;;  %2282 = vmatprep.subr.bf16.mxu1 %v2473_v36 }
  0xa6   : > { %v1083_v0 = vsel %vm926_vm5, %v3099_v39, %v717_v41  ;;  %v444_v2 = vpop.permute.xlu1 %443  ;;  %855 = vrot.lane.b32.xlu0 %v782_v16, %s2506_s25  ;;  %708 = vrot.lane.b32.xlu1 %v3423_v33, %s2506_s25  ;;  %v3992_v39 = vld [vmem:[#allocation15_spill] sm:$0xff]  ;;  %v3998_v41 = vld [vmem:[#allocation16_spill] sm:$0xff] }
  0xa7   : > { %1805 = vmatmul.mubr.bf16.gmra.mrb[8].mxu1 %v1083_v0  ;;  %v937_v56 = vsel %vm926_vm5, %v3354_v38, %v444_v2  ;;  %v3997_v16 = vld [vmem:[#allocation27_spill] sm:$0xff] }
  0xa8   : > { %1727 = vmatpush1.bf16.msra.mxu0 %v3992_v39  ;;  %2283 = vmatpush3.bf16.msra.mxu1 %v2473_v36 }
  0xa9   : > { %v866_v44 = vpop.permute.xlu0 %865  ;;  %1728 = vmatprep.subr.bf16.mxu0 %v3948_v12 }
  0xaa   : > { %v540_v61 = vpop.permute.xlu1 %539  ;;  %v1159_v35 = vsel %vm926_vm5, %v3993_v22, %v866_v44  ;;  %857 = vrot.lane.b32.xlu0 %v786_v21, %s2506_s25  ;;  %710 = vrot.lane.b32.xlu1 %v3438_v48, %s2506_s25  ;;  %v4001_v44 = vld [vmem:[#allocation30_spill] sm:$0xff]  ;;  %v4002_v22 = vld [vmem:[#allocation21_spill] sm:$0xff] }
  0xab   : > { %1596 = vmatmul.mubr.bf16.gmra.mrb[12].mxu0 %v937_v56  ;;  %1812 = vmatprep.mubr.bf16.mxu1 %v1159_v35  ;;  %v999_v23 = vsel %vm926_vm5, %v3994_v60, %v540_v61  ;;  %v4003_v35 = vld [vmem:[#allocation26_spill] sm:$0xff] }
  0xac   : > { %1603 = vmatprep.mubr.bf16.mxu0 %v999_v23  ;;  %1729 = vmatpush1.bf16.msra.mxu0 %v3995_v1 }
  0xad   : > { %v719_v9 = vpop.permute.xlu0 %718  ;;  %1730 = vmatprep.subr.bf16.mxu0 %v3948_v12 }
  0xae   : > { %v1087_v36 = vsel %vm926_vm5, %v3137_v53, %v719_v9  ;;  %v446_v11 = vpop.permute.xlu1 %445  ;;  %v3999_v53 = vld [vmem:[#allocation22_spill] sm:$0xff]  ;;  %v3480_v9 = vld [vmem:[%s2551_s22 + $0x30] sm:$0xff]  }
  0xaf   : > { %1813 = vmatmul.mubr.bf16.gmra.mrb[12].mxu1 %v1087_v36  ;;  %v940_v31 = vsel %vm926_vm5, %v3383_v62, %v446_v11  ;;  %v4004_v11 = vld [vmem:[#allocation28_spill] sm:$0xff] }
  0xb0   : > { %1731 = vmatpush1.bf16.msra.mxu0 %v3996_v27 }
  0xb1   : > { %v868_v10 = vpop.permute.xlu0 %867  ;;  %1732 = vmatprep.subr.bf16.mxu0 %v3948_v12 }
  0xb2   : > { %v542_v24 = vpop.permute.xlu1 %541  ;;  %v1163_v13 = vsel %vm926_vm5, %v3997_v16, %v868_v10  ;;  %v4005_v10 = vld [vmem:[#allocation34_spill] sm:$0xff] }
  0xb3   : > { %1604 = vmatmul.mubr.bf16.gmra.mrb[16].mxu0 %v940_v31  ;;  %1820 = vmatprep.mubr.bf16.mxu1 %v1163_v13  ;;  %v1003_v0 = vsel %vm926_vm5, %v3998_v41, %v542_v24  ;;  %v4007_v13 = vld [vmem:[#allocation31_spill] sm:$0xff] }
  0xb4   : > { %1611 = vmatprep.mubr.bf16.mxu0 %v1003_v0  ;;  %1733 = vmatpush1.bf16.msra.mxu0 %v3999_v53 }
  0xb5   : > { %v721_v2 = vpop.permute.xlu0 %720  ;;  %1734 = vmatprep.subr.bf16.mxu0 %v3948_v12 }
  0xb6   : > { %v1091_v14 = vsel %vm926_vm5, %v3149_v26, %v721_v2  ;;  %v448_v21 = vpop.permute.xlu1 %447  ;;  %v3495_v2 = vld [vmem:[%s2551_s22 + $0x38] sm:$0xff]  }
  0xb7   : > { %1821 = vmatmul.mubr.bf16.gmra.mrb[16].mxu1 %v1091_v14  ;;  %v943_v4 = vsel %vm926_vm5, %v3401_v25, %v448_v21  ;;  %v4008_v21 = vld [vmem:[#allocation32_spill] sm:$0xff] }
  0xb8   : > { %1735 = vmatpush1.bf16.msra.mxu0 %v4000_v37 }
  0xb9   : > { %v870_v56 = vpop.permute.xlu0 %869  ;;  %1736 = vmatprep.subr.bf16.mxu0 %v3948_v12 }
  0xba   : > { %v544_v39 = vpop.permute.xlu1 %543  ;;  %v1167_v61 = vsel %vm926_vm5, %v4001_v44, %v870_v56  ;;  %v4009_v56 = vld [vmem:[#allocation38_spill] sm:$0xff] }
  0xbb   : > { %1612 = vmatmul.mubr.bf16.gmra.mrb[20].mxu0 %v943_v4  ;;  %1828 = vmatprep.mubr.bf16.mxu1 %v1167_v61  ;;  %v1007_v26 = vsel %vm926_vm5, %v4002_v22, %v544_v39  ;;  %v4011_v61 = vld [vmem:[#allocation35_spill] sm:$0xff] }
  0xbc   : > { %1619 = vmatprep.mubr.bf16.mxu0 %v1007_v26  ;;  %1737 = vmatpush1.bf16.msra.mxu0 %v4003_v35 }
  0xbd   : > { %v723_v60 = vpop.permute.xlu0 %722  ;;  %1738 = vmatprep.subr.bf16.mxu0 %v3948_v12 }
  0xbe   : > { %v1095_v23 = vsel %vm926_vm5, %v3163_v50, %v723_v60  ;;  %v450_v1 = vpop.permute.xlu1 %449  ;;  %v4006_v50 = vld [vmem:[#allocation25_spill] sm:$0xff]  ;;  %v3510_v60 = vld [vmem:[%s2551_s22 + $0x40] sm:$0xff]  }
  0xbf   : > { %1829 = vmatmul.mubr.bf16.gmra.mrb[20].mxu1 %v1095_v23  ;;  %v946_v36 = vsel %vm926_vm5, %v3480_v9, %v450_v1  ;;  %v4012_v1 = vld [vmem:[#allocation36_spill] sm:$0xff] }
  0xc0   : > { %1739 = vmatpush1.bf16.msra.mxu0 %v4004_v11 }
  0xc1   : > { %v872_v31 = vpop.permute.xlu0 %871  ;;  %1740 = vmatprep.subr.bf16.mxu0 %v3948_v12 }
  0xc2   : > { %v546_v27 = vpop.permute.xlu1 %545  ;;  %v1171_v24 = vsel %vm926_vm5, %v4005_v10, %v872_v31 }
  0xc3   : > { %1620 = vmatmul.mubr.bf16.gmra.mrb[24].mxu0 %v946_v36  ;;  %1836 = vmatprep.mubr.bf16.mxu1 %v1171_v24  ;;  %v1011_v16 = vsel %vm926_vm5, %v4006_v50, %v546_v27  ;;  %v3522_v50 = vld [vmem:[%s2551_s22 + $0x48] sm:$0xff]  }
  0xc4   : > { %1627 = vmatprep.mubr.bf16.mxu0 %v1011_v16  ;;  %1741 = vmatpush1.bf16.msra.mxu0 %v4007_v13 }
  0xc5   : > { %v725_v41 = vpop.permute.xlu0 %724  ;;  %1742 = vmatprep.subr.bf16.mxu0 %v3948_v12 }
  0xc6   : > { %v1099_v0 = vsel %vm926_vm5, %v3178_v3, %v725_v41  ;;  %v452_v53 = vpop.permute.xlu1 %451  ;;  %v4010_v3 = vld [vmem:[#allocation29_spill] sm:$0xff] }
  0xc7   : > { %1837 = vmatmul.mubr.bf16.gmra.mrb[24].mxu1 %v1099_v0  ;;  %v949_v14 = vsel %vm926_vm5, %v3495_v2, %v452_v53  ;;  %v4014_v0 = vld [vmem:[#allocation37_spill] sm:$0xff] }
  0xc8   : > { %1743 = vmatpush1.bf16.msra.mxu0 %v4008_v21 }
  0xc9   : > { %v874_v4 = vpop.permute.xlu0 %873  ;;  %1744 = vmatprep.subr.bf16.mxu0 %v3948_v12 }
  0xca   : > { %v548_v37 = vpop.permute.xlu1 %547  ;;  %v1175_v39 = vsel %vm926_vm5, %v4009_v56, %v874_v4  ;;  %v3533_v4 = vld [vmem:[%s2551_s22 + $0x50] sm:$0xff]  }
  0xcb   : > { %1628 = vmatmul.mubr.bf16.gmra.mrb[28].mxu0 %v949_v14  ;;  %1844 = vmatprep.mubr.bf16.mxu1 %v1175_v39  ;;  %v1015_v44 = vsel %vm926_vm5, %v4010_v3, %v548_v37  ;;  %v751_v3 = vrot.slane %v3175_v15, 2 }
  0xcc   : > { %1635 = vmatprep.mubr.bf16.mxu0 %v1015_v44  ;;  %1745 = vmatpush1.bf16.msra.mxu0 %v4011_v61 }
  0xcd   : > { %v727_v22 = vpop.permute.xlu0 %726  ;;  %1746 = vmatprep.subr.bf16.mxu0 %v3948_v12  ;;  %v4013_v12 = vld [vmem:[#allocation33_spill] sm:$0xff] }
  0xce   : > { %v1103_v26 = vsel %vm926_vm5, %v3187_v32, %v727_v22  ;;  %v454_v35 = vpop.permute.xlu1 %453 }
  0xcf   : > { %1845 = vmatmul.mubr.bf16.gmra.mrb[28].mxu1 %v1103_v26  ;;  %v952_v23 = vsel %vm926_vm5, %v3510_v60, %v454_v35  ;;  %v752_v26 = vsel %vm664_vm3, %v3238_v63, %v751_v3  ;;  %v2474_v35 = vld [vmem:[%s2551_s22 + $0xa0] ss:$0 sps:$4 sm:$0x33]  }
  0xd0   : > { %1747 = vmatpush1.bf16.msra.mxu0 %v4012_v1 }
  0xd1   : > { %v876_v36 = vpop.permute.xlu0 %875 }
  0xd2   : > { %v550_v11 = vpop.permute.xlu1 %549  ;;  %v1179_v31 = vsel %vm926_vm5, %v3191_v58, %v876_v36 }
  0xd3   : > { %1636 = vmatmul.mubr.bf16.gmra.mrb[32].mxu0 %v952_v23  ;;  %1852 = vmatprep.mubr.bf16.mxu1 %v1179_v31  ;;  %v1019_v32 = vsel %vm926_vm5, %v4013_v12, %v550_v11  ;;  %v194_v11 = vld [vmem:[%s2551_s22 + $0x10] sm:$0x8]  ;;  %v753_v31 = vrot.slane %v2474_v35, 2 }
  0xd4   : > { %1643 = vmatprep.mubr.bf16.mxu0 %v1019_v32  ;;  %v2197_v12 = vcombine.low %v194_v11, %v3286_v8  ;;  %v4015_v32 = vld [vmem:[#allocation40_spill] sm:$0xff]  ;;  %v902_v11 = vrot.slane %v3522_v50, 3 }
  0xd5   : > { %v729_v27 = vpop.permute.xlu0 %728 }
  0xd6   : > { %v1107_v10 = vsel %vm926_vm5, %v3194_v59, %v729_v27  ;;  %v456_v24 = vpop.permute.xlu1 %455 }
  0xd7   : > { %1853 = vmatmul.mubr.bf16.gmra.mrb[32].mxu1 %v1107_v10  ;;  %v955_v16 = vsel %vm926_vm5, %v3522_v50, %v456_v24  ;;  %v754_v24 = vsel %vm664_vm3, %v751_v3, %v753_v31 }
  0xd9   : > { %v878_v13 = vpop.permute.xlu0 %877 }
  0xda   : > { %v552_v58 = vpop.permute.xlu1 %551  ;;  %v1183_v41 = vsel %vm926_vm5, %v3227_v17, %v878_v13 }
  0xdb   : > { %1644 = vmatmul.mubr.bf16.gmra.mrb[36].mxu0 %v955_v16  ;;  %1860 = vmatprep.mubr.bf16.mxu1 %v1183_v41  ;;  %v1023_v53 = vsel %vm926_vm5, %v4014_v0, %v552_v58  ;;  %v3561_v16 = vld [vmem:[%s2551_s22 + $0x60] sm:$0xff]   ;;  %v890_v41 = vrot.slane %v3354_v38, 3  ;;  %v3573_v38 = vld [vmem:[%s2551_s22 + $0x68] sm:$0xff]  }
  0xdc   : > { %1651 = vmatprep.mubr.bf16.mxu0 %v1023_v53 }
  0xdd   : > { %v731_v59 = vpop.permute.xlu0 %730 }
  0xde   : > { %v1111_v14 = vsel %vm926_vm5, %v3201_v51, %v731_v59  ;;  %v458_v21 = vpop.permute.xlu1 %457 }
  0xdf   : > { %1861 = vmatmul.mubr.bf16.gmra.mrb[36].mxu1 %v1111_v14  ;;  %v958_v37 = vsel %vm926_vm5, %v3533_v4, %v458_v21 }
  0xe1   : > { %v880_v17 = vpop.permute.xlu0 %879 }
  0xe2   : > { %v554_v56 = vpop.permute.xlu1 %553  ;;  %v1187_v39 = vsel %vm926_vm5, %v3251_v49, %v880_v17  ;;  %v3548_v49 = vld [vmem:[%s2551_s22 + $0x58] sm:$0xff]  }
  0xe3   : > { %1652 = vmatmul.mubr.bf16.gmra.mrb[40].mxu0 %v958_v37  ;;  %1868 = vmatprep.mubr.bf16.mxu1 %v1187_v39  ;;  %v1027_v51 = vsel %vm926_vm5, %v3183_v55, %v554_v56  ;;  %v892_v56 = vrot.slane %v3383_v62, 3  ;;  %v894_v39 = vrot.slane %v3401_v25, 3 }
  0xe4   : > { %1659 = vmatprep.mubr.bf16.mxu0 %v1027_v51 }
  0xe5   : > { %v733_v44 = vpop.permute.xlu0 %732 }
  0xe6   : > { %v1115_v61 = vsel %vm926_vm5, %v3205_v28, %v733_v44  ;;  %v460_v22 = vpop.permute.xlu1 %459  ;;  %v895_v44 = vsel %vm888_vm6, %v892_v56, %v894_v39 }
  0xe7   : > { %1869 = vmatmul.mubr.bf16.gmra.mrb[40].mxu1 %v1115_v61  ;;  %v961_v23 = vsel %vm926_vm5, %v3548_v49, %v460_v22  ;;  %v3586_v22 = vld [vmem:[%s2551_s22 + $0x70] sm:$0xff]  }
  0xe9   : > { %v882_v55 = vpop.permute.xlu0 %881 }
  0xea   : > { %v556_v1 = vpop.permute.xlu1 %555  ;;  %v1191_v36 = vsel %vm926_vm5, %v752_v26, %v882_v55  ;;  %v898_v26 = vrot.slane %v3495_v2, 3 }
  0xeb   : > { %1660 = vmatmul.mubr.bf16.gmra.mrb[44].mxu0 %v961_v23  ;;  %1876 = vmatprep.mubr.bf16.mxu1 %v1191_v36  ;;  %v1031_v28 = vsel %vm926_vm5, %v3217_v5, %v556_v1  ;;  %v889_v5 = vrot.slane %v2197_v12, 3  ;;  %v3599_v36 = vld [vmem:[%s2551_s22 + $0x78] sm:$0xff]  }
  0xec   : > { %1667 = vmatprep.mubr.bf16.mxu0 %v1031_v28  ;;  %v512_v28 = vrot.slane %v3295_v20, 1  ;;  %v904_v20 = vrot.slane %v3533_v4, 3 }
  0xed   : > { %v735_v63 = vpop.permute.xlu0 %734  ;;  %v891_v14 = vsel %vm888_vm6, %v889_v5, %v890_v41 }
  0xee   : > { %v1119_v27 = vsel %vm926_vm5, %v4015_v32, %v735_v63  ;;  %v462_v10 = vpop.permute.xlu1 %461  ;;  %v905_v5 = vsel %vm888_vm6, %v902_v11, %v904_v20 }
  0xef   : > { %1877 = vmatmul.mubr.bf16.gmra.mrb[44].mxu1 %v1119_v27  ;;  %v964_v13 = vsel %vm926_vm5, %v3561_v16, %v462_v10  ;;  %v513_v27 = vsel %vm476_vm0, %v3283_v47, %v512_v28  ;;  %v906_v10 = vrot.slane %v3548_v49, 3  ;;  %v2495_v49 = vld [vmem:[%s2551_s22 + $0x88] sm:$0xff]   ;;  %v592_v28 = vrot.slane %v3979_v34, 2 }
  0xf1   : > { %v884_v58 = vpop.permute.xlu0 %883 }
  0xf2   : > { %v558_v0 = vpop.permute.xlu1 %557  ;;  %v1195_v8 = vsel %vm926_vm5, %v754_v24, %v884_v58  ;;  %v4016_v24 = vld [vmem:[#allocation2_spill] sm:$0xff]  ;;  %v749_v58 = vrot.slane %v3289_v6, 2  ;;  %v908_v6 = vrot.slane %v3561_v16, 3 }
  0xf3   : > { %1668 = vmatmul.mubr.bf16.gmra.mrb[48].mxu0 %v964_v13  ;;  %1884 = vmatprep.mubr.bf16.mxu1 %v1195_v8  ;;  %v1035_v53 = vsel %vm926_vm5, %v3241_v54, %v558_v0  ;;  %v572_v13 = vshrl.u32 %v4016_v24, 16  ;;  %v575_v47 = vshll.u32 %v4016_v24, 16  ;;  %v907_v0 = vsel %vm888_vm6, %v904_v20, %v906_v10 }
  0xf4   : > { %1675 = vmatprep.mubr.bf16.mxu0 %v1035_v53 }
  0xf5   : > { %v737_v59 = vpop.permute.xlu0 %736  ;;  %v574_v8 = vrot.slane %v572_v13, 1  ;;  %v577_v4 = vrot.slane %v575_v47, 2  ;;  %v4019_v13 = vld [vmem:[#allocation6_spill] sm:$0xff] }
  0xf6   : > { %v1123_v21 = vsel %vm926_vm5, %v3244_v43, %v737_v59  ;;  %v464_v37 = vpop.permute.xlu1 %463  ;;  %v893_v43 = vsel %vm888_vm6, %v890_v41, %v892_v56  ;;  %v750_v59 = vsel %vm664_vm3, %v749_v58, %v3357_v52  ;;  %v909_v56 = vsel %vm888_vm6, %v906_v10, %v908_v6 }
  0xf7   : > { %1885 = vmatmul.mubr.bf16.gmra.mrb[48].mxu1 %v1123_v21  ;;  %v967_v17 = vsel %vm926_vm5, %v3573_v38, %v464_v37  ;;  %v578_v21 = vor.u32 %v577_v4, %v574_v8 }
  0xf8   : > { %2284 = vmatprep.mubr.msk.bf16.mxu1 %vm926_vm5, %v891_v14 }
  0xf9   : > { %v560_v54 = vpop.permute.xlu0 %559  ;;  %v582_v52 = vsel %vm570_vm4, %v578_v21, %v3404_v19 }
  0xfa   : > { %v1039_v51 = vsel %vm926_vm5, %v3260_v18, %v560_v54  ;;  %v466_v3 = vpop.permute.xlu1 %465  ;;  %v896_v18 = vrot.slane %v3480_v9, 3 }
  0xfb   : > { %1676 = vmatmul.mubr.bf16.gmra.mrb[52].mxu0 %v967_v17  ;;  %v970_v62 = vsel %vm926_vm5, %v3586_v22, %v466_v3  ;;  %v910_v17 = vrot.slane %v3573_v38, 3  ;;  %v912_v38 = vrot.slane %v3586_v22, 3  ;;  %v588_v22 = vrot.slane %v2707_v30, 2 }
  0xfc   : > { %1683 = vmatprep.mubr.bf16.mxu0 %v1039_v51  ;;  %v897_v35 = vsel %vm888_vm6, %v894_v39, %v896_v18  ;;  %v899_v55 = vsel %vm888_vm6, %v896_v18, %v898_v26  ;;  %v583_v51 = vrot.slane %v2704_v29, 1  ;;  %v914_v18 = vrot.slane %v3599_v36, 3 }
  0xfd   : > { %v562_v61 = vpop.permute.xlu0 %561  ;;  %v911_v39 = vsel %vm888_vm6, %v908_v6, %v910_v17  ;;  %v913_v29 = vsel %vm888_vm6, %v910_v17, %v912_v38 }
  0xfe   : > { %v1043_v25 = vsel %vm926_vm5, %v3279_v45, %v562_v61  ;;  %v468_v23 = vpop.permute.xlu1 %467  ;;  %v900_v45 = vrot.slane %v3510_v60, 3  ;;  %v3615_v60 = vld [vmem:[%s2551_s22 + $0x80] sm:$0xff]  }
  0xff   : > { %2285 = vmatmul.mubr.msk.bf16.vlgmr.msra.gmra.mrb[52].mxu1 %vm926_vm5, %v893_v43  ;;  %v973_v9 = vsel %vm926_vm5, %v3599_v36, %v468_v23  ;;  %v4017_v43 = vld [vmem:[#allocation7_spill] sm:$0xff]  ;;  %v587_v23 = vrot.slane %v2753_v57, 1 }
 0x100   : > { %2288 = vmatprep.mubr.msk.bf16.mxu1 %vm926_vm5, %v895_v44  ;;  %v901_v31 = vsel %vm888_vm6, %v898_v26, %v900_v45  ;;  %v903_v12 = vsel %vm888_vm6, %v900_v45, %v902_v11  ;;  %v584_v3 = vrot.slane %v4017_v43, 2  ;;  %v591_v11 = vrot.slane %v3978_v46, 1 }
 0x101   : > { %v564_v1 = vpop.permute.xlu0 %563 }
 0x102   : > { %v1047_v2 = vsel %vm926_vm5, %v3304_v40, %v564_v1  ;;  %v470_v63 = vpop.permute.xlu1 %469  ;;  %v916_v1 = vrot.slane %v3615_v60, 3 }
 0x103   : > { %1684 = vmatmul.mubr.bf16.gmra.mrb[56].mxu0 %v970_v62  ;;  %v976_v40 = vsel %vm926_vm5, %v3615_v60, %v470_v63  ;;  %v585_v62 = vor.u32 %v584_v3, %v583_v51  ;;  %v2496_v63 = vld [vmem:[%s2551_s22 + $0x90] sm:$0xff]   ;;  %v922_v60 = vrot.slane %v3175_v15, 3  ;;  %s2399_s22 = smul.u32 288, %s4021_s10 }
 0x104   : > { %1691 = vmatprep.mubr.bf16.mxu0 %v1043_v25  ;;  %v917_v57 = vsel %vm888_vm6, %v914_v18, %v916_v1 }
 0x105   : > { %v566_v32 = vpop.permute.xlu0 %565  ;;  %v586_v26 = vsel %vm570_vm4, %v3404_v19, %v585_v62  ;;  %v589_v19 = vor.u32 %v588_v22, %v587_v23  ;;  %s3752_s19 = scalar_lea.vmem %s3879_s2, %s2399_s22 }
 0x106   : > { %v1051_v50 = vsel %vm926_vm5, %v513_v27, %v566_v32  ;;  %v593_v27 = vor.u32 %v592_v28, %v591_v11 }
 0x107   : > { %2289 = vmatmul.mubr.msk.bf16.gmra.mrb[56].mxu1 %vm926_vm5, %v897_v35  ;;  %v915_v35 = vsel %vm888_vm6, %v912_v38, %v914_v18  ;;  %v590_v45 = vsel %vm570_vm4, %v585_v62, %v589_v19 }
 0x108   : > { %2292 = vmatprep.mubr.msk.bf16.mxu1 %vm926_vm5, %v899_v55  ;;  %v472_v41 = vpop.permute.xlu1 %471 }
 0x109   : > { %v850_v53 = vpop.permute.xlu0 %849  ;;  %v979_v14 = vsel %vm926_vm5, %v2495_v49, %v472_v41 }
 0x10a   : > { %v1127_v37 = vsel %vm926_vm5, %v750_v59, %v850_v53 }
 0x10b   : > { %1692 = vmatmul.mubr.bf16.gmra.mrb[60].mxu0 %v973_v9  ;;  %v918_v9 = vrot.slane %v2495_v49, 3 }
 0x10c   : > { %1699 = vmatprep.mubr.bf16.mxu0 %v1047_v2  ;;  %v703_v54 = vpop.permute.xlu1 %702 }
 0x10d   : > { %v1055_v44 = vsel %vm926_vm5, %v582_v52, %v703_v54  ;;  %v919_v2 = vsel %vm888_vm6, %v916_v1, %v918_v9 }
 0x10f   : > { %2293 = vmatmul.mubr.msk.bf16.gmra.mrb[60].mxu1 %vm926_vm5, %v901_v31 }
 0x110   : > { %2296 = vmatprep.mubr.msk.bf16.mxu1 %vm926_vm5, %v903_v12  ;;  %v852_v16 = vpop.permute.xlu0 %851  ;;  %v705_v25 = vpop.permute.xlu1 %704  ;;  %v920_v12 = vrot.slane %v2496_v63, 3 }
 0x111   : > { %v1131_v61 = vsel %vm926_vm5, %v3398_v42, %v852_v16  ;;  %v1059_v42 = vsel %vm926_vm5, %v586_v26, %v705_v25 }
 0x112   : > { %v921_v46 = vsel %vm888_vm6, %v918_v9, %v920_v12  ;;  %v923_v20 = vsel %vm888_vm6, %v920_v12, %v922_v60 }
 0x113   : > { %1700 = vmatmul.mubr.bf16.gmra.mrb[64].mxu0 %v976_v40  ;;  %v594_v40 = vsel %vm570_vm4, %v589_v19, %v593_v27 }
 0x114   : > { %1707 = vmatprep.mubr.bf16.mxu0 %v1051_v50  ;;  %v854_v55 = vpop.permute.xlu0 %853  ;;  %v707_v30 = vpop.permute.xlu1 %706 }
 0x115   : > { %v1135_v36 = vsel %vm926_vm5, %v3423_v33, %v854_v55  ;;  %v1063_v33 = vsel %vm926_vm5, %v590_v45, %v707_v30 }
 0x117   : > { %2297 = vmatmul.mubr.msk.bf16.gmra.mrb[64].mxu1 %vm926_vm5, %v905_v5  ;;  %v598_v5 = vsel %vm570_vm4, %v593_v27, %v3037_v7 }
 0x118   : > { %2300 = vmatprep.mubr.msk.bf16.mxu1 %vm926_vm5, %v907_v0  ;;  %v856_v31 = vpop.permute.xlu0 %855  ;;  %v709_v34 = vpop.permute.xlu1 %708 }
 0x119   : > { %v1139_v32 = vsel %vm926_vm5, %v3438_v48, %v856_v31  ;;  %v1067_v10 = vsel %vm926_vm5, %v594_v40, %v709_v34  ;;  %v4018_v48 = vld [vmem:[#allocation39_spill] sm:$0xff] }
 0x11a   : > { %v924_v24 = vrot.slane %v4018_v48, 3 }
 0x11b   : > { %1708 = vmatmul.mubr.bf16.gmra.mrb[68].mxu0 %v979_v14 }
 0x11c   : > { %1748 = vmatprep.mubr.bf16.mxu0 %v1127_v37  ;;  %v858_v50 = vpop.permute.xlu0 %857  ;;  %v925_v47 = vsel %vm888_vm6, %v922_v60, %v924_v24  ;;  %v711_v58 = vpop.permute.xlu1 %710 }
 0x11d   : > { %v1143_v15 = vsel %vm926_vm5, %v4019_v13, %v858_v50  ;;  %v1071_v41 = vsel %vm926_vm5, %v598_v5, %v711_v58 }
 0x11f   : > { %2301 = vmatmul.mubr.msk.bf16.gmra.mrb[68].mxu1 %vm926_vm5, %v909_v56 }
 0x120   : > { %2304 = vmatprep.mubr.msk.bf16.mxu1 %vm926_vm5, %v911_v39 }
 0x123   : > { %1749 = vmatmul.mubr.bf16.vlgmr.msra.gmra.mrb[0].mxu0 %v1055_v44 }
 0x124   : > { %1756 = vmatprep.mubr.bf16.mxu0 %v1131_v61 }
 0x127   : > { %2305 = vmatmul.mubr.msk.bf16.gmra.mrb[72].mxu1 %vm926_vm5, %v913_v29 }
 0x128   : > { %2308 = vmatprep.mubr.msk.bf16.mxu1 %vm926_vm5, %v915_v35 }
 0x12b   : > { %1757 = vmatmul.mubr.bf16.gmra.mrb[4].mxu0 %v1059_v42 }
 0x12c   : > { %1764 = vmatprep.mubr.bf16.mxu0 %v1135_v36 }
 0x12f   : > { %2309 = vmatmul.mubr.msk.bf16.gmra.mrb[76].mxu1 %vm926_vm5, %v917_v57 }
 0x130   : > { %2312 = vmatprep.mubr.msk.bf16.mxu1 %vm926_vm5, %v919_v2 }
 0x133   : > { %1765 = vmatmul.mubr.bf16.gmra.mrb[8].mxu0 %v1063_v33 }
 0x134   : > { %1772 = vmatprep.mubr.bf16.mxu0 %v1139_v32 }
 0x137   : > { %2313 = vmatmul.mubr.msk.bf16.gmra.mrb[80].mxu1 %vm926_vm5, %v921_v46 }
 0x138   : > { %2316 = vmatprep.mubr.msk.bf16.mxu1 %vm926_vm5, %v923_v20 }
 0x13b   : > { %1773 = vmatmul.mubr.bf16.gmra.mrb[12].mxu0 %v1067_v10 }
 0x13c   : > { %1780 = vmatprep.mubr.bf16.mxu0 %v1143_v15 }
 0x13f   : > { %2317 = vmatmul.mubr.msk.bf16.gmra.mrb[84].mxu1 %vm926_vm5, %v925_v47 }
 0x143   : > { %1781 = vmatmul.mubr.bf16.gmra.mrb[16].mxu0 %v1071_v41 }
 0x16a   : > { %v1790_v0 = vpop.f32.mrb[0].mxu1 }
 0x16b   : > { %v1792_v8 = vpop.f32.mrb[1].mxu1 }
 0x16c   : > { %v1793_v4 = vpop.f32.mrb[2].mxu1 }
 0x16d   : > { %v1795_v53 = vpop.f32.mrb[3].mxu1 }
 0x172   : > { %v1798_v59 = vpop.f32.mrb[4].mxu1 }
 0x173   : > { %v1800_v49 = vpop.f32.mrb[5].mxu1 }
 0x174   : > { %v1801_v14 = vpop.f32.mrb[6].mxu1 }
 0x175   : > { %v1803_v6 = vpop.f32.mrb[7].mxu1 }
 0x17a   : > { %v1806_v21 = vpop.f32.mrb[8].mxu1 }
 0x17b   : > { %v1808_v37 = vpop.f32.mrb[9].mxu1 }
 0x17c   : > { %v1809_v17 = vpop.f32.mrb[10].mxu1 }
 0x17d   : > { %v1811_v56 = vpop.f32.mrb[11].mxu1 }
 0x182   : > { %v1814_v52 = vpop.f32.mrb[12].mxu1 }
 0x183   : > { %v1816_v54 = vpop.f32.mrb[13].mxu1 }
 0x184   : > { %v1817_v7 = vpop.f32.mrb[14].mxu1 }
 0x185   : > { %v1819_v39 = vpop.f32.mrb[15].mxu1 }
 0x18a   : > { %v1822_v51 = vpop.f32.mrb[16].mxu1 }
 0x18b   : > { %v1824_v43 = vpop.f32.mrb[17].mxu1 }
 0x18c   : > { %v1825_v3 = vpop.f32.mrb[18].mxu1 }
 0x18d   : > { %v1827_v16 = vpop.f32.mrb[19].mxu1 }
 0x18e   : > { %v1613_v44 = vpop.f32.mrb[20].mxu0 }
 0x18f   : > { %v3688_v38 = vadd.f32 %v1790_v0, %v1613_v44  ;;  %v1615_v61 = vpop.f32.mrb[21].mxu0 }
 0x190   : > { %v1616_v62 = vpop.f32.mrb[22].mxu0 }
 0x191   : > { %v3690_v18 = vadd.f32 %v1793_v4, %v1616_v62  ;;  %v1618_v29 = vpop.f32.mrb[23].mxu0 }
 0x192   : > { %v1830_v25 = vpop.f32.mrb[20].mxu1 }
 0x193   : > { %v1832_v26 = vpop.f32.mrb[21].mxu1 }
 0x194   : > { %v1833_v35 = vpop.f32.mrb[22].mxu1 }
 0x195   : > { %v1835_v23 = vpop.f32.mrb[23].mxu1 }
 0x196   : > { %v1621_v22 = vpop.f32.mrb[24].mxu0 }
 0x197   : > { %v3692_v55 = vadd.f32 %v1798_v59, %v1621_v22  ;;  %v1623_v42 = vpop.f32.mrb[25].mxu0 }
 0x198   : > { %v1624_v1 = vpop.f32.mrb[26].mxu0 }
 0x199   : > { %v3694_v36 = vadd.f32 %v1801_v14, %v1624_v1  ;;  %v1626_v19 = vpop.f32.mrb[27].mxu0 }
 0x19a   : > { %v1838_v9 = vpop.f32.mrb[24].mxu1 }
 0x19b   : > { %v1840_v57 = vpop.f32.mrb[25].mxu1 }
 0x19c   : > { %v1841_v30 = vpop.f32.mrb[26].mxu1 }
 0x19d   : > { %v1843_v45 = vpop.f32.mrb[27].mxu1 }
 0x19e   : > { %v1629_v2 = vpop.f32.mrb[28].mxu0 }
 0x19f   : > { %v3696_v11 = vadd.f32 %v1806_v21, %v1629_v2  ;;  %v1631_v28 = vpop.f32.mrb[29].mxu0 }
 0x1a0   : > { %v1632_v31 = vpop.f32.mrb[30].mxu0 }
 0x1a1   : > { %v3698_v33 = vadd.f32 %v1809_v17, %v1632_v31  ;;  %v1634_v63 = vpop.f32.mrb[31].mxu0 }
 0x1a2   : > { %v1846_v12 = vpop.f32.mrb[28].mxu1 }
 0x1a3   : > { %v1848_v32 = vpop.f32.mrb[29].mxu1 }
 0x1a4   : > { %v1849_v27 = vpop.f32.mrb[30].mxu1 }
 0x1a5   : > { %v1851_v60 = vpop.f32.mrb[31].mxu1 }
 0x1a6   : > { %v1637_v46 = vpop.f32.mrb[32].mxu0 }
 0x1a7   : > { %v3700_v34 = vadd.f32 %v1814_v52, %v1637_v46  ;;  %v1639_v40 = vpop.f32.mrb[33].mxu0 }
 0x1a8   : > { %v1640_v20 = vpop.f32.mrb[34].mxu0 }
 0x1a9   : > { %v3702_v50 = vadd.f32 %v1817_v7, %v1640_v20  ;;  %v1642_v10 = vpop.f32.mrb[35].mxu0 }
 0x1aa   : > { %v1854_v48 = vpop.f32.mrb[32].mxu1 }
 0x1ab   : > { %v1856_v24 = vpop.f32.mrb[33].mxu1 }
 0x1ac   : > { %v1857_v13 = vpop.f32.mrb[34].mxu1 }
 0x1ad   : > { %v1859_v15 = vpop.f32.mrb[35].mxu1 }
 0x1ae   : > { %v1645_v47 = vpop.f32.mrb[36].mxu0 }
 0x1af   : > { %v3704_v58 = vadd.f32 %v1822_v51, %v1645_v47  ;;  %v1647_v5 = vpop.f32.mrb[37].mxu0 }
 0x1b0   : > { %v1648_v41 = vpop.f32.mrb[38].mxu0 }
 0x1b1   : > { %v3706_v0 = vadd.f32 %v1825_v3, %v1648_v41  ;;  %v1650_v8 = vpop.f32.mrb[39].mxu0 }
 0x1b2   : > { %v1862_v4 = vpop.f32.mrb[36].mxu1 }
 0x1b3   : > { %v1864_v53 = vpop.f32.mrb[37].mxu1 }
 0x1b4   : > { %v1865_v59 = vpop.f32.mrb[38].mxu1 }
 0x1b5   : > { %v1867_v49 = vpop.f32.mrb[39].mxu1 }
 0x1b6   : > { %v1653_v14 = vpop.f32.mrb[40].mxu0 }
 0x1b7   : > { %v3708_v6 = vadd.f32 %v1830_v25, %v1653_v14  ;;  %v1655_v21 = vpop.f32.mrb[41].mxu0 }
 0x1b8   : > { %v1656_v37 = vpop.f32.mrb[42].mxu0 }
 0x1b9   : > { %v3710_v17 = vadd.f32 %v1833_v35, %v1656_v37  ;;  %v1658_v56 = vpop.f32.mrb[43].mxu0 }
 0x1ba   : > { %v1870_v52 = vpop.f32.mrb[40].mxu1 }
 0x1bb   : > { %v1872_v54 = vpop.f32.mrb[41].mxu1 }
 0x1bc   : > { %v1873_v7 = vpop.f32.mrb[42].mxu1 }
 0x1bd   : > { %v1875_v39 = vpop.f32.mrb[43].mxu1 }
 0x1be   : > { %v1661_v51 = vpop.f32.mrb[44].mxu0 }
 0x1bf   : > { %v3712_v43 = vadd.f32 %v1838_v9, %v1661_v51  ;;  %v1663_v3 = vpop.f32.mrb[45].mxu0 }
 0x1c0   : > { %v1664_v16 = vpop.f32.mrb[46].mxu0 }
 0x1c1   : > { %v3714_v44 = vadd.f32 %v1841_v30, %v1664_v16  ;;  %v1666_v61 = vpop.f32.mrb[47].mxu0 }
 0x1c2   : > { %v1878_v62 = vpop.f32.mrb[44].mxu1 }
 0x1c3   : > { %v1880_v29 = vpop.f32.mrb[45].mxu1 }
 0x1c4   : > { %v1881_v25 = vpop.f32.mrb[46].mxu1 }
 0x1c5   : > { %v1883_v26 = vpop.f32.mrb[47].mxu1 }
 0x1c6   : > { %v1669_v23 = vpop.f32.mrb[48].mxu0 }
 0x1c7   : > { %v3716_v35 = vadd.f32 %v1846_v12, %v1669_v23  ;;  %v1671_v22 = vpop.f32.mrb[49].mxu0 }
 0x1c8   : > { %v1672_v42 = vpop.f32.mrb[50].mxu0 }
 0x1c9   : > { %v3718_v1 = vadd.f32 %v1849_v27, %v1672_v42  ;;  %v1674_v19 = vpop.f32.mrb[51].mxu0 }
 0x1ca   : > { %v1886_v57 = vpop.f32.mrb[48].mxu1 }
 0x1cb   : > { %v1888_v9 = vpop.f32.mrb[49].mxu1 }
 0x1cc   : > { %v1889_v45 = vpop.f32.mrb[50].mxu1 }
 0x1cd   : > { %v1891_v2 = vpop.f32.mrb[51].mxu1 }
 0x1ce   : > { %v1677_v28 = vpop.f32.mrb[52].mxu0 }
 0x1cf   : > { %v3720_v30 = vadd.f32 %v1854_v48, %v1677_v28  ;;  %v1679_v31 = vpop.f32.mrb[53].mxu0 }
 0x1d0   : > { %v1680_v63 = vpop.f32.mrb[54].mxu0 }
 0x1d1   : > { %v3722_v32 = vadd.f32 %v1857_v13, %v1680_v63  ;;  %v1682_v60 = vpop.f32.mrb[55].mxu0 }
 0x1d2   : > { %v3724_v12 = vpop.f32.mrb[52].mxu1 }
 0x1d3   : > { %v3726_v46 = vpop.f32.mrb[53].mxu1 }
 0x1d4   : > { %v3728_v27 = vpop.f32.mrb[54].mxu1 }
 0x1d5   : > { %v3730_v40 = vpop.f32.mrb[55].mxu1 }
 0x1d6   : > { %v1685_v20 = vpop.f32.mrb[56].mxu0 }
 0x1d7   : > { %v3732_v10 = vadd.f32 %v1862_v4, %v1685_v20  ;;  %v1687_v24 = vpop.f32.mrb[57].mxu0 }
 0x1d8   : > { %v1688_v48 = vpop.f32.mrb[58].mxu0 }
 0x1d9   : > { %v3734_v15 = vadd.f32 %v1865_v59, %v1688_v48  ;;  %v1690_v47 = vpop.f32.mrb[59].mxu0 }
 0x1da   : > { %v3736_v13 = vpop.f32.mrb[56].mxu1 }
 0x1db   : > { %v3738_v5 = vpop.f32.mrb[57].mxu1 }
 0x1dc   : > { %v3740_v41 = vpop.f32.mrb[58].mxu1 }
 0x1dd   : > { %v3742_v8 = vpop.f32.mrb[59].mxu1 }
 0x1de   : > { %v1693_v53 = vpop.f32.mrb[60].mxu0 }
 0x1df   : > { %v3745_v49 = vadd.f32 %v1870_v52, %v1693_v53  ;;  %v1695_v14 = vpop.f32.mrb[61].mxu0 }
 0x1e0   : > { %v1696_v4 = vpop.f32.mrb[62].mxu0 }
 0x1e1   : > { %v3747_v21 = vadd.f32 %v1873_v7, %v1696_v4  ;;  %v1698_v37 = vpop.f32.mrb[63].mxu0 }
 0x1e2   : > { %v2294_v59 = vpop.f32.mrb[60].mxu1 }
 0x1e3   : > { %v1968_v56 = vadd.f32 %v2294_v59, %v3688_v38  ;;  %v3755_v54 = vpop.f32.mrb[61].mxu1 }
 0x1e4   : > { %v2295_v39 = vpop.f32.mrb[62].mxu1 }
 0x1e5   : > { %2080 = vst.msk [vmem:[%s3752_s19 + $0x50] sm:$0xff] %vm926_vm5, %v1968_v56  ;;  %v1971_v52 = vadd.f32 %v2295_v39, %v3690_v18  ;;  %v3760_v7 = vpop.f32.mrb[63].mxu1 }
 0x1e6   : > { %v1701_v51 = vpop.f32.mrb[64].mxu0 }
 0x1e7   : > { %2081 = vst.msk [vmem:[%s3752_s19 + $0x58] sm:$0xff] %vm926_vm5, %v1971_v52  ;;  %v3764_v3 = vadd.f32 %v1878_v62, %v1701_v51  ;;  %v1703_v16 = vpop.f32.mrb[65].mxu0 }
 0x1e8   : > { %v1704_v61 = vpop.f32.mrb[66].mxu0 }
 0x1e9   : > { %v3766_v38 = vadd.f32 %v1881_v25, %v1704_v61  ;;  %v1706_v29 = vpop.f32.mrb[67].mxu0 }
 0x1ea   : > { %v2298_v26 = vpop.f32.mrb[64].mxu1 }
 0x1eb   : > { %v1984_v23 = vadd.f32 %v2298_v26, %v3696_v11  ;;  %v1975_v22 = vpop.f32.mrb[65].mxu1 }
 0x1ec   : > { %v1976_v18 = vadd.f32 %v1975_v22, %v3692_v55  ;;  %v2299_v42 = vpop.f32.mrb[66].mxu1 }
 0x1ed   : > { %2084 = vst.msk [vmem:[%s3752_s19 + $0x70] sm:$0xff] %vm926_vm5, %v1984_v23  ;;  %v1987_v19 = vadd.f32 %v2299_v42, %v3698_v33  ;;  %v1978_v62 = vpop.f32.mrb[67].mxu1 }
 0x1ee   : > { %2082 = vst.msk [vmem:[%s3752_s19 + $0x60] sm:$0xff] %vm926_vm5, %v1976_v18  ;;  %v1979_v25 = vadd.f32 %v1978_v62, %v3694_v36  ;;  %v1709_v9 = vpop.f32.mrb[68].mxu0 }
 0x1ef   : > { %2085 = vst.msk [vmem:[%s3752_s19 + $0x78] sm:$0xff] %vm926_vm5, %v1987_v19  ;;  %v3778_v2 = vadd.f32 %v1886_v57, %v1709_v9  ;;  %v1711_v11 = vpop.f32.mrb[69].mxu0 }
 0x1f0   : > { %2083 = vst.msk [vmem:[%s3752_s19 + $0x68] sm:$0xff] %vm926_vm5, %v1979_v25  ;;  %v1712_v55 = vpop.f32.mrb[70].mxu0 }
 0x1f1   : > { %v3782_v28 = vadd.f32 %v1889_v45, %v1712_v55  ;;  %v1714_v33 = vpop.f32.mrb[71].mxu0 }
 0x1f2   : > { %v2302_v31 = vpop.f32.mrb[68].mxu1 }
 0x1f3   : > { %v2000_v63 = vadd.f32 %v2302_v31, %v3704_v58  ;;  %v1991_v36 = vpop.f32.mrb[69].mxu1 }
 0x1f4   : > { %v1992_v60 = vadd.f32 %v1991_v36, %v3700_v34  ;;  %v2303_v20 = vpop.f32.mrb[70].mxu1 }
 0x1f5   : > { %2088 = vst.msk [vmem:[%s3752_s19 + $0x90] sm:$0xff] %vm926_vm5, %v2000_v63  ;;  %v2003_v57 = vadd.f32 %v2303_v20, %v3706_v0  ;;  %v1994_v24 = vpop.f32.mrb[71].mxu1 }
 0x1f6   : > { %2086 = vst.msk [vmem:[%s3752_s19 + $0x80] sm:$0xff] %vm926_vm5, %v1992_v60  ;;  %v1995_v45 = vadd.f32 %v1994_v24, %v3702_v50  ;;  %v1750_v48 = vpop.f32.mrb[0].mxu0 }
 0x1f7   : > { %2089 = vst.msk [vmem:[%s3752_s19 + $0x98] sm:$0xff] %vm926_vm5, %v2003_v57  ;;  %v1928_v58 = vadd.f32 %v3726_v46, %v1750_v48  ;;  %v1752_v47 = vpop.f32.mrb[1].mxu0 }
 0x1f8   : > { %2087 = vst.msk [vmem:[%s3752_s19 + $0x88] sm:$0xff] %vm926_vm5, %v1995_v45  ;;  %v1753_v34 = vpop.f32.mrb[2].mxu0 }
 0x1f9   : > { %2070 = vst.msk [vmem:[%s3752_s19] sm:$0xff] %vm926_vm5, %v1928_v58  ;;  %v1931_v0 = vadd.f32 %v3730_v40, %v1753_v34  ;;  %v1755_v53 = vpop.f32.mrb[3].mxu0 }
 0x1fa   : > { %v2306_v14 = vpop.f32.mrb[72].mxu1 }
 0x1fb   : > { %2071 = vst.msk [vmem:[%s3752_s19 + $0x8] sm:$0xff] %vm926_vm5, %v1931_v0  ;;  %v2016_v50 = vadd.f32 %v2306_v14, %v3712_v43  ;;  %v2007_v4 = vpop.f32.mrb[73].mxu1 }
 0x1fc   : > { %v2008_v46 = vadd.f32 %v2007_v4, %v3708_v6  ;;  %v2307_v37 = vpop.f32.mrb[74].mxu1 }
 0x1fd   : > { %2092 = vst.msk [vmem:[%s3752_s19 + $0xb0] sm:$0xff] %vm926_vm5, %v2016_v50  ;;  %v2019_v59 = vadd.f32 %v2307_v37, %v3714_v44  ;;  %v2010_v56 = vpop.f32.mrb[75].mxu1 }
 0x1fe   : > { %2090 = vst.msk [vmem:[%s3752_s19 + $0xa0] sm:$0xff] %vm926_vm5, %v2008_v46  ;;  %v2011_v40 = vadd.f32 %v2010_v56, %v3710_v17  ;;  %v1758_v39 = vpop.f32.mrb[4].mxu0 }
 0x1ff   : > { %2093 = vst.msk [vmem:[%s3752_s19 + $0xb8] sm:$0xff] %vm926_vm5, %v2019_v59  ;;  %v1936_v43 = vadd.f32 %v3724_v12, %v1758_v39  ;;  %v1760_v52 = vpop.f32.mrb[5].mxu0 }
 0x200   : > { %2091 = vst.msk [vmem:[%s3752_s19 + $0xa8] sm:$0xff] %vm926_vm5, %v2011_v40  ;;  %v1761_v6 = vpop.f32.mrb[6].mxu0 }
 0x201   : > { %2072 = vst.msk [vmem:[%s3752_s19 + $0x10] sm:$0xff] %vm926_vm5, %v1936_v43  ;;  %v1939_v44 = vadd.f32 %v3728_v27, %v1761_v6  ;;  %v1763_v51 = vpop.f32.mrb[7].mxu0 }
 0x202   : > { %v2310_v16 = vpop.f32.mrb[76].mxu1 }
 0x203   : > { %2073 = vst.msk [vmem:[%s3752_s19 + $0x18] sm:$0xff] %vm926_vm5, %v1939_v44  ;;  %v2032_v17 = vadd.f32 %v2310_v16, %v3720_v30  ;;  %v2023_v61 = vpop.f32.mrb[77].mxu1 }
 0x204   : > { %v2024_v12 = vadd.f32 %v2023_v61, %v3716_v35  ;;  %v2311_v29 = vpop.f32.mrb[78].mxu1 }
 0x205   : > { %2096 = vst.msk [vmem:[%s3752_s19 + $0xd0] sm:$0xff] %vm926_vm5, %v2032_v17  ;;  %v2035_v26 = vadd.f32 %v2311_v29, %v3722_v32  ;;  %v2026_v23 = vpop.f32.mrb[79].mxu1 }
 0x206   : > { %2094 = vst.msk [vmem:[%s3752_s19 + $0xc0] sm:$0xff] %vm926_vm5, %v2024_v12  ;;  %v2027_v27 = vadd.f32 %v2026_v23, %v3718_v1  ;;  %v1766_v22 = vpop.f32.mrb[8].mxu0 }
 0x207   : > { %2097 = vst.msk [vmem:[%s3752_s19 + $0xd8] sm:$0xff] %vm926_vm5, %v2035_v26  ;;  %v1944_v30 = vadd.f32 %v3738_v5, %v1766_v22  ;;  %v1768_v18 = vpop.f32.mrb[9].mxu0 }
 0x208   : > { %2095 = vst.msk [vmem:[%s3752_s19 + $0xc8] sm:$0xff] %vm926_vm5, %v2027_v27  ;;  %v1769_v35 = vpop.f32.mrb[10].mxu0 }
 0x209   : > { %2074 = vst.msk [vmem:[%s3752_s19 + $0x20] sm:$0xff] %vm926_vm5, %v1944_v30  ;;  %v1947_v32 = vadd.f32 %v3742_v8, %v1769_v35  ;;  %v1771_v42 = vpop.f32.mrb[11].mxu0 }
 0x20a   : > { %v2314_v19 = vpop.f32.mrb[80].mxu1 }
 0x20b   : > { %2075 = vst.msk [vmem:[%s3752_s19 + $0x28] sm:$0xff] %vm926_vm5, %v1947_v32  ;;  %v2048_v1 = vadd.f32 %v2314_v19, %v3745_v49  ;;  %v2039_v62 = vpop.f32.mrb[81].mxu1 }
 0x20c   : > { %v2040_v5 = vadd.f32 %v2039_v62, %v3732_v10  ;;  %v2315_v25 = vpop.f32.mrb[82].mxu1 }
 0x20d   : > { %2100 = vst.msk [vmem:[%s3752_s19 + $0xf0] sm:$0xff] %vm926_vm5, %v2048_v1  ;;  %v2051_v9 = vadd.f32 %v2315_v25, %v3747_v21  ;;  %v2042_v11 = vpop.f32.mrb[83].mxu1 }
 0x20e   : > { %2098 = vst.msk [vmem:[%s3752_s19 + $0xe0] sm:$0xff] %vm926_vm5, %v2040_v5  ;;  %v2043_v8 = vadd.f32 %v2042_v11, %v3734_v15  ;;  %v1774_v55 = vpop.f32.mrb[12].mxu0 }
 0x20f   : > { %2101 = vst.msk [vmem:[%s3752_s19 + $0xf8] sm:$0xff] %vm926_vm5, %v2051_v9  ;;  %v1952_v49 = vadd.f32 %v3736_v13, %v1774_v55  ;;  %v1776_v33 = vpop.f32.mrb[13].mxu0 }
 0x210   : > { %2099 = vst.msk [vmem:[%s3752_s19 + $0xe8] sm:$0xff] %vm926_vm5, %v2043_v8  ;;  %v1777_v10 = vpop.f32.mrb[14].mxu0 }
 0x211   : > { %2076 = vst.msk [vmem:[%s3752_s19 + $0x30] sm:$0xff] %vm926_vm5, %v1952_v49  ;;  %v1955_v21 = vadd.f32 %v3740_v41, %v1777_v10  ;;  %v1779_v31 = vpop.f32.mrb[15].mxu0 }
 0x212   : > { %v2318_v63 = vpop.f32.mrb[84].mxu1 }
 0x213   : > { %2077 = vst.msk [vmem:[%s3752_s19 + $0x38] sm:$0xff] %vm926_vm5, %v1955_v21  ;;  %v2064_v15 = vadd.f32 %v2318_v63, %v3778_v2  ;;  %v2055_v36 = vpop.f32.mrb[85].mxu1 }
 0x214   : > { %v2056_v13 = vadd.f32 %v2055_v36, %v3764_v3  ;;  %v2319_v60 = vpop.f32.mrb[86].mxu1 }
 0x215   : > { %2104 = vst.msk [vmem:[%s3752_s19 + $0x110] sm:$0xff] %vm926_vm5, %v2064_v15  ;;  %v2067_v20 = vadd.f32 %v2319_v60, %v3782_v28  ;;  %v2058_v57 = vpop.f32.mrb[87].mxu1 }
 0x216   : > { %2102 = vst.msk [vmem:[%s3752_s19 + $0x100] sm:$0xff] %vm926_vm5, %v2056_v13  ;;  %v2059_v41 = vadd.f32 %v2058_v57, %v3766_v38  ;;  %v1782_v24 = vpop.f32.mrb[16].mxu0 }
 0x217   : > { %2105 = vst.msk [vmem:[%s3752_s19 + $0x118] sm:$0xff] %vm926_vm5, %v2067_v20  ;;  %v1960_v45 = vadd.f32 %v3755_v54, %v1782_v24  ;;  %v1784_v2 = vpop.f32.mrb[17].mxu0 }
 0x218   : > { %2103 = vst.msk [vmem:[%s3752_s19 + $0x108] sm:$0xff] %vm926_vm5, %v2059_v41  ;;  %v1785_v3 = vpop.f32.mrb[18].mxu0 }
 0x219   : > { %2078 = vst.msk [vmem:[%s3752_s19 + $0x40] sm:$0xff] %vm926_vm5, %v1960_v45  ;;  %v1963_v48 = vadd.f32 %v3760_v7, %v1785_v3  ;;  %v1787_v58 = vpop.f32.mrb[19].mxu0 }
 0x21b   : > { %2079 = vst.msk [vmem:[%s3752_s19 + $0x48] sm:$0xff] %vm926_vm5, %v1963_v48 }
 0x21c PF: > { %s12_s9 = sadd.s32 1, %s2503_s9  }
 0x21d   : > { %p9_p4 = scmp.ge.s32.totalorder %s12_s9, 4  }
 0x21f   :  { %11 = sbr.rel (!%p9_p4) target bundleno = 1 (0x1), region = 58 }

// kernel: squeeze.5
= control target key start
LH: loop header
LB: loop body
LE: loop exit
PB: predicated region body
PF: predicated region fallthrough
CT: control target
= control target key end

     0   :  { %vm3_vm0 = vcmask 261120   ;;  %s1408_s0 = inlined_call_operand.vmem [shape: f32[576,32,1,1], index: 0, kind: input, shape index: {}]   ;;  %s1409_s1 = inlined_call_operand.vmem [shape: f32[64,9,32], index: 1, kind: output, shape index: {}]  }
   0x1   :  { %v2_v0 = vld [vmem:[%s1408_s0] sm:$0xff]   ;;  %v472_v1 = vld [vmem:[%s1408_s0 + $0x8] sm:$0xff]   ;;  %v475_v2 = vld [vmem:[%s1408_s0 + $0x10] sm:$0xff]  }
   0x2   :  { %4 = vst.msk [vmem:[%s1409_s1] sm:$0xff] %vm3_vm0, %v2_v0   ;;  %473 = vst.msk [vmem:[%s1409_s1 + $0x8] ss:$8 sm:$0x3] %vm3_vm0, %v472_v1   ;;  %v478_v3 = vld [vmem:[%s1408_s0 + $0x18] sm:$0xff]   ;;  %v481_v4 = vld [vmem:[%s1408_s0 + $0x20] sm:$0xff]  }
   0x3   :  { %474 = vst.msk [vmem:[%s1409_s1 + $0xf] sm:$0xfc] %vm3_vm0, %v472_v1   ;;  %476 = vst.msk [vmem:[%s1409_s1 + $0x17] sm:$0x3] %vm3_vm0, %v475_v2   ;;  %v484_v5 = vld [vmem:[%s1408_s0 + $0x28] sm:$0xff]   ;;  %v487_v6 = vld [vmem:[%s1408_s0 + $0x30] sm:$0xff]  }
   0x4   :  { %477 = vst.msk [vmem:[%s1409_s1 + $0x1e] sm:$0xfc] %vm3_vm0, %v475_v2   ;;  %479 = vst.msk [vmem:[%s1409_s1 + $0x26] sm:$0x7] %vm3_vm0, %v478_v3   ;;  %v490_v7 = vld [vmem:[%s1408_s0 + $0x38] sm:$0xff]   ;;  %v493_v8 = vld [vmem:[%s1408_s0 + $0x40] sm:$0xff]  }
   0x5   :  { %480 = vst.msk [vmem:[%s1409_s1 + $0x2d] sm:$0xf8] %vm3_vm0, %v478_v3   ;;  %482 = vst.msk [vmem:[%s1409_s1 + $0x35] sm:$0xf] %vm3_vm0, %v481_v4   ;;  %v495_v9 = vld [vmem:[%s1408_s0 + $0x48] sm:$0xff]   ;;  %v497_v10 = vld [vmem:[%s1408_s0 + $0x50] sm:$0xff]  }
   0x6   :  { %483 = vst.msk [vmem:[%s1409_s1 + $0x3c] sm:$0xf0] %vm3_vm0, %v481_v4   ;;  %485 = vst.msk [vmem:[%s1409_s1 + $0x44] sm:$0x1f] %vm3_vm0, %v484_v5   ;;  %v500_v11 = vld [vmem:[%s1408_s0 + $0x58] sm:$0xff]   ;;  %v503_v12 = vld [vmem:[%s1408_s0 + $0x60] sm:$0xff]  }
   0x7   :  { %486 = vst.msk [vmem:[%s1409_s1 + $0x4b] sm:$0xe0] %vm3_vm0, %v484_v5   ;;  %488 = vst.msk [vmem:[%s1409_s1 + $0x53] sm:$0x3f] %vm3_vm0, %v487_v6   ;;  %v506_v13 = vld [vmem:[%s1408_s0 + $0x68] sm:$0xff]   ;;  %v509_v14 = vld [vmem:[%s1408_s0 + $0x70] sm:$0xff]  }
   0x8   :  { %489 = vst.msk [vmem:[%s1409_s1 + $0x5a] sm:$0xc0] %vm3_vm0, %v487_v6   ;;  %491 = vst.msk [vmem:[%s1409_s1 + $0x62] sm:$0x7f] %vm3_vm0, %v490_v7   ;;  %v512_v15 = vld [vmem:[%s1408_s0 + $0x78] sm:$0xff]   ;;  %v515_v16 = vld [vmem:[%s1408_s0 + $0x80] sm:$0xff]  }
   0x9   :  { %492 = vst.msk [vmem:[%s1409_s1 + $0x69] sm:$0x80] %vm3_vm0, %v490_v7   ;;  %494 = vst.msk [vmem:[%s1409_s1 + $0x71] sm:$0xff] %vm3_vm0, %v493_v8   ;;  %v518_v17 = vld [vmem:[%s1408_s0 + $0x88] sm:$0xff]   ;;  %v520_v18 = vld [vmem:[%s1408_s0 + $0x90] sm:$0xff]  }
   0xa   :  { %496 = vst.msk [vmem:[%s1409_s1 + $0x80] sm:$0xff] %vm3_vm0, %v495_v9   ;;  %498 = vst.msk [vmem:[%s1409_s1 + $0x88] ss:$8 sm:$0x3] %vm3_vm0, %v497_v10   ;;  %v522_v19 = vld [vmem:[%s1408_s0 + $0x98] sm:$0xff]   ;;  %v525_v20 = vld [vmem:[%s1408_s0 + $0xa0] sm:$0xff]  }
   0xb   :  { %499 = vst.msk [vmem:[%s1409_s1 + $0x8f] sm:$0xfc] %vm3_vm0, %v497_v10   ;;  %501 = vst.msk [vmem:[%s1409_s1 + $0x97] sm:$0x3] %vm3_vm0, %v500_v11   ;;  %v528_v21 = vld [vmem:[%s1408_s0 + $0xa8] sm:$0xff]   ;;  %v531_v22 = vld [vmem:[%s1408_s0 + $0xb0] sm:$0xff]  }
   0xc   :  { %502 = vst.msk [vmem:[%s1409_s1 + $0x9e] sm:$0xfc] %vm3_vm0, %v500_v11   ;;  %504 = vst.msk [vmem:[%s1409_s1 + $0xa6] sm:$0x7] %vm3_vm0, %v503_v12   ;;  %v534_v23 = vld [vmem:[%s1408_s0 + $0xb8] sm:$0xff]   ;;  %v537_v24 = vld [vmem:[%s1408_s0 + $0xc0] sm:$0xff]  }
   0xd   :  { %505 = vst.msk [vmem:[%s1409_s1 + $0xad] sm:$0xf8] %vm3_vm0, %v503_v12   ;;  %507 = vst.msk [vmem:[%s1409_s1 + $0xb5] sm:$0xf] %vm3_vm0, %v506_v13   ;;  %v540_v25 = vld [vmem:[%s1408_s0 + $0xc8] sm:$0xff]   ;;  %v543_v26 = vld [vmem:[%s1408_s0 + $0xd0] sm:$0xff]  }
   0xe   :  { %508 = vst.msk [vmem:[%s1409_s1 + $0xbc] sm:$0xf0] %vm3_vm0, %v506_v13   ;;  %510 = vst.msk [vmem:[%s1409_s1 + $0xc4] sm:$0x1f] %vm3_vm0, %v509_v14   ;;  %v545_v27 = vld [vmem:[%s1408_s0 + $0xd8] sm:$0xff]   ;;  %v547_v28 = vld [vmem:[%s1408_s0 + $0xe0] sm:$0xff]  }
   0xf   :  { %511 = vst.msk [vmem:[%s1409_s1 + $0xcb] sm:$0xe0] %vm3_vm0, %v509_v14   ;;  %513 = vst.msk [vmem:[%s1409_s1 + $0xd3] sm:$0x3f] %vm3_vm0, %v512_v15   ;;  %v550_v29 = vld [vmem:[%s1408_s0 + $0xe8] sm:$0xff]   ;;  %v553_v30 = vld [vmem:[%s1408_s0 + $0xf0] sm:$0xff]  }
  0x10   :  { %514 = vst.msk [vmem:[%s1409_s1 + $0xda] sm:$0xc0] %vm3_vm0, %v512_v15   ;;  %516 = vst.msk [vmem:[%s1409_s1 + $0xe2] sm:$0x7f] %vm3_vm0, %v515_v16   ;;  %v556_v31 = vld [vmem:[%s1408_s0 + $0xf8] sm:$0xff]   ;;  %v559_v32 = vld [vmem:[%s1408_s0 + $0x100] sm:$0xff]  }
  0x11   :  { %517 = vst.msk [vmem:[%s1409_s1 + $0xe9] sm:$0x80] %vm3_vm0, %v515_v16   ;;  %519 = vst.msk [vmem:[%s1409_s1 + $0xf1] sm:$0xff] %vm3_vm0, %v518_v17   ;;  %v562_v33 = vld [vmem:[%s1408_s0 + $0x108] sm:$0xff]   ;;  %v565_v34 = vld [vmem:[%s1408_s0 + $0x110] sm:$0xff]  }
  0x12   :  { %521 = vst.msk [vmem:[%s1409_s1 + $0x100] sm:$0xff] %vm3_vm0, %v520_v18   ;;  %523 = vst.msk [vmem:[%s1409_s1 + $0x108] ss:$8 sm:$0x3] %vm3_vm0, %v522_v19   ;;  %v568_v35 = vld [vmem:[%s1408_s0 + $0x118] sm:$0xff]   ;;  %v570_v36 = vld [vmem:[%s1408_s0 + $0x120] sm:$0xff]  }
  0x13   :  { %524 = vst.msk [vmem:[%s1409_s1 + $0x10f] sm:$0xfc] %vm3_vm0, %v522_v19   ;;  %526 = vst.msk [vmem:[%s1409_s1 + $0x117] sm:$0x3] %vm3_vm0, %v525_v20   ;;  %v572_v37 = vld [vmem:[%s1408_s0 + $0x128] sm:$0xff]   ;;  %v575_v38 = vld [vmem:[%s1408_s0 + $0x130] sm:$0xff]  }
  0x14   :  { %527 = vst.msk [vmem:[%s1409_s1 + $0x11e] sm:$0xfc] %vm3_vm0, %v525_v20   ;;  %529 = vst.msk [vmem:[%s1409_s1 + $0x126] sm:$0x7] %vm3_vm0, %v528_v21   ;;  %v578_v39 = vld [vmem:[%s1408_s0 + $0x138] sm:$0xff]   ;;  %v581_v40 = vld [vmem:[%s1408_s0 + $0x140] sm:$0xff]  }
  0x15   :  { %530 = vst.msk [vmem:[%s1409_s1 + $0x12d] sm:$0xf8] %vm3_vm0, %v528_v21   ;;  %532 = vst.msk [vmem:[%s1409_s1 + $0x135] sm:$0xf] %vm3_vm0, %v531_v22   ;;  %v584_v41 = vld [vmem:[%s1408_s0 + $0x148] sm:$0xff]   ;;  %v587_v42 = vld [vmem:[%s1408_s0 + $0x150] sm:$0xff]  }
  0x16   :  { %533 = vst.msk [vmem:[%s1409_s1 + $0x13c] sm:$0xf0] %vm3_vm0, %v531_v22   ;;  %535 = vst.msk [vmem:[%s1409_s1 + $0x144] sm:$0x1f] %vm3_vm0, %v534_v23   ;;  %v590_v43 = vld [vmem:[%s1408_s0 + $0x158] sm:$0xff]   ;;  %v593_v44 = vld [vmem:[%s1408_s0 + $0x160] sm:$0xff]  }
  0x17   :  { %536 = vst.msk [vmem:[%s1409_s1 + $0x14b] sm:$0xe0] %vm3_vm0, %v534_v23   ;;  %538 = vst.msk [vmem:[%s1409_s1 + $0x153] sm:$0x3f] %vm3_vm0, %v537_v24   ;;  %v595_v45 = vld [vmem:[%s1408_s0 + $0x168] sm:$0xff]   ;;  %v597_v46 = vld [vmem:[%s1408_s0 + $0x170] sm:$0xff]  }
  0x18   :  { %539 = vst.msk [vmem:[%s1409_s1 + $0x15a] sm:$0xc0] %vm3_vm0, %v537_v24   ;;  %541 = vst.msk [vmem:[%s1409_s1 + $0x162] sm:$0x7f] %vm3_vm0, %v540_v25   ;;  %v600_v47 = vld [vmem:[%s1408_s0 + $0x178] sm:$0xff]   ;;  %v603_v48 = vld [vmem:[%s1408_s0 + $0x180] sm:$0xff]  }
  0x19   :  { %542 = vst.msk [vmem:[%s1409_s1 + $0x169] sm:$0x80] %vm3_vm0, %v540_v25   ;;  %544 = vst.msk [vmem:[%s1409_s1 + $0x171] sm:$0xff] %vm3_vm0, %v543_v26   ;;  %v606_v49 = vld [vmem:[%s1408_s0 + $0x188] sm:$0xff]   ;;  %v609_v50 = vld [vmem:[%s1408_s0 + $0x190] sm:$0xff]  }
  0x1a   :  { %546 = vst.msk [vmem:[%s1409_s1 + $0x180] sm:$0xff] %vm3_vm0, %v545_v27   ;;  %548 = vst.msk [vmem:[%s1409_s1 + $0x188] ss:$8 sm:$0x3] %vm3_vm0, %v547_v28   ;;  %v612_v51 = vld [vmem:[%s1408_s0 + $0x198] sm:$0xff]   ;;  %v615_v52 = vld [vmem:[%s1408_s0 + $0x1a0] sm:$0xff]  }
  0x1b   :  { %549 = vst.msk [vmem:[%s1409_s1 + $0x18f] sm:$0xfc] %vm3_vm0, %v547_v28   ;;  %551 = vst.msk [vmem:[%s1409_s1 + $0x197] sm:$0x3] %vm3_vm0, %v550_v29   ;;  %v618_v53 = vld [vmem:[%s1408_s0 + $0x1a8] sm:$0xff]   ;;  %v620_v54 = vld [vmem:[%s1408_s0 + $0x1b0] sm:$0xff]  }
  0x1c   :  { %552 = vst.msk [vmem:[%s1409_s1 + $0x19e] sm:$0xfc] %vm3_vm0, %v550_v29   ;;  %554 = vst.msk [vmem:[%s1409_s1 + $0x1a6] sm:$0x7] %vm3_vm0, %v553_v30   ;;  %v622_v55 = vld [vmem:[%s1408_s0 + $0x1b8] sm:$0xff]   ;;  %v625_v56 = vld [vmem:[%s1408_s0 + $0x1c0] sm:$0xff]  }
  0x1d   :  { %555 = vst.msk [vmem:[%s1409_s1 + $0x1ad] sm:$0xf8] %vm3_vm0, %v553_v30   ;;  %557 = vst.msk [vmem:[%s1409_s1 + $0x1b5] sm:$0xf] %vm3_vm0, %v556_v31   ;;  %v628_v57 = vld [vmem:[%s1408_s0 + $0x1c8] sm:$0xff]   ;;  %v631_v58 = vld [vmem:[%s1408_s0 + $0x1d0] sm:$0xff]  }
  0x1e   :  { %558 = vst.msk [vmem:[%s1409_s1 + $0x1bc] sm:$0xf0] %vm3_vm0, %v556_v31   ;;  %560 = vst.msk [vmem:[%s1409_s1 + $0x1c4] sm:$0x1f] %vm3_vm0, %v559_v32   ;;  %v634_v59 = vld [vmem:[%s1408_s0 + $0x1d8] sm:$0xff]   ;;  %v637_v60 = vld [vmem:[%s1408_s0 + $0x1e0] sm:$0xff]  }
  0x1f   :  { %561 = vst.msk [vmem:[%s1409_s1 + $0x1cb] sm:$0xe0] %vm3_vm0, %v559_v32   ;;  %563 = vst.msk [vmem:[%s1409_s1 + $0x1d3] sm:$0x3f] %vm3_vm0, %v562_v33   ;;  %v640_v61 = vld [vmem:[%s1408_s0 + $0x1e8] sm:$0xff]   ;;  %v643_v62 = vld [vmem:[%s1408_s0 + $0x1f0] sm:$0xff]  }
  0x20   :  { %564 = vst.msk [vmem:[%s1409_s1 + $0x1da] sm:$0xc0] %vm3_vm0, %v562_v33   ;;  %566 = vst.msk [vmem:[%s1409_s1 + $0x1e2] sm:$0x7f] %vm3_vm0, %v565_v34   ;;  %v645_v63 = vld [vmem:[%s1408_s0 + $0x1f8] sm:$0xff]   ;;  %v647_v0 = vld [vmem:[%s1408_s0 + $0x200] sm:$0xff]  }
  0x21   :  { %567 = vst.msk [vmem:[%s1409_s1 + $0x1e9] sm:$0x80] %vm3_vm0, %v565_v34   ;;  %569 = vst.msk [vmem:[%s1409_s1 + $0x1f1] sm:$0xff] %vm3_vm0, %v568_v35   ;;  %v650_v1 = vld [vmem:[%s1408_s0 + $0x208] sm:$0xff]   ;;  %v653_v2 = vld [vmem:[%s1408_s0 + $0x210] sm:$0xff]  }
  0x22   :  { %571 = vst.msk [vmem:[%s1409_s1 + $0x200] sm:$0xff] %vm3_vm0, %v570_v36   ;;  %573 = vst.msk [vmem:[%s1409_s1 + $0x208] ss:$8 sm:$0x3] %vm3_vm0, %v572_v37   ;;  %v656_v3 = vld [vmem:[%s1408_s0 + $0x218] sm:$0xff]   ;;  %v659_v4 = vld [vmem:[%s1408_s0 + $0x220] sm:$0xff]  }
  0x23   :  { %574 = vst.msk [vmem:[%s1409_s1 + $0x20f] sm:$0xfc] %vm3_vm0, %v572_v37   ;;  %576 = vst.msk [vmem:[%s1409_s1 + $0x217] sm:$0x3] %vm3_vm0, %v575_v38   ;;  %v662_v5 = vld [vmem:[%s1408_s0 + $0x228] sm:$0xff]   ;;  %v665_v6 = vld [vmem:[%s1408_s0 + $0x230] sm:$0xff]  }
  0x24   :  { %577 = vst.msk [vmem:[%s1409_s1 + $0x21e] sm:$0xfc] %vm3_vm0, %v575_v38   ;;  %579 = vst.msk [vmem:[%s1409_s1 + $0x226] sm:$0x7] %vm3_vm0, %v578_v39   ;;  %v668_v7 = vld [vmem:[%s1408_s0 + $0x238] sm:$0xff]  }
  0x25   :  { %580 = vst.msk [vmem:[%s1409_s1 + $0x22d] sm:$0xf8] %vm3_vm0, %v578_v39   ;;  %582 = vst.msk [vmem:[%s1409_s1 + $0x235] sm:$0xf] %vm3_vm0, %v581_v40  }
  0x26   :  { %583 = vst.msk [vmem:[%s1409_s1 + $0x23c] sm:$0xf0] %vm3_vm0, %v581_v40   ;;  %585 = vst.msk [vmem:[%s1409_s1 + $0x244] sm:$0x1f] %vm3_vm0, %v584_v41  }
  0x27   :  { %586 = vst.msk [vmem:[%s1409_s1 + $0x24b] sm:$0xe0] %vm3_vm0, %v584_v41   ;;  %588 = vst.msk [vmem:[%s1409_s1 + $0x253] sm:$0x3f] %vm3_vm0, %v587_v42  }
  0x28   :  { %589 = vst.msk [vmem:[%s1409_s1 + $0x25a] sm:$0xc0] %vm3_vm0, %v587_v42   ;;  %591 = vst.msk [vmem:[%s1409_s1 + $0x262] sm:$0x7f] %vm3_vm0, %v590_v43  }
  0x29   :  { %592 = vst.msk [vmem:[%s1409_s1 + $0x269] sm:$0x80] %vm3_vm0, %v590_v43   ;;  %594 = vst.msk [vmem:[%s1409_s1 + $0x271] sm:$0xff] %vm3_vm0, %v593_v44  }
  0x2a   :  { %596 = vst.msk [vmem:[%s1409_s1 + $0x280] sm:$0xff] %vm3_vm0, %v595_v45   ;;  %598 = vst.msk [vmem:[%s1409_s1 + $0x288] ss:$8 sm:$0x3] %vm3_vm0, %v597_v46  }
  0x2b   :  { %599 = vst.msk [vmem:[%s1409_s1 + $0x28f] sm:$0xfc] %vm3_vm0, %v597_v46   ;;  %601 = vst.msk [vmem:[%s1409_s1 + $0x297] sm:$0x3] %vm3_vm0, %v600_v47  }
  0x2c   :  { %602 = vst.msk [vmem:[%s1409_s1 + $0x29e] sm:$0xfc] %vm3_vm0, %v600_v47   ;;  %604 = vst.msk [vmem:[%s1409_s1 + $0x2a6] sm:$0x7] %vm3_vm0, %v603_v48  }
  0x2d   :  { %605 = vst.msk [vmem:[%s1409_s1 + $0x2ad] sm:$0xf8] %vm3_vm0, %v603_v48   ;;  %607 = vst.msk [vmem:[%s1409_s1 + $0x2b5] sm:$0xf] %vm3_vm0, %v606_v49  }
  0x2e   :  { %608 = vst.msk [vmem:[%s1409_s1 + $0x2bc] sm:$0xf0] %vm3_vm0, %v606_v49   ;;  %610 = vst.msk [vmem:[%s1409_s1 + $0x2c4] sm:$0x1f] %vm3_vm0, %v609_v50  }
  0x2f   :  { %611 = vst.msk [vmem:[%s1409_s1 + $0x2cb] sm:$0xe0] %vm3_vm0, %v609_v50   ;;  %613 = vst.msk [vmem:[%s1409_s1 + $0x2d3] sm:$0x3f] %vm3_vm0, %v612_v51  }
  0x30   :  { %614 = vst.msk [vmem:[%s1409_s1 + $0x2da] sm:$0xc0] %vm3_vm0, %v612_v51   ;;  %616 = vst.msk [vmem:[%s1409_s1 + $0x2e2] sm:$0x7f] %vm3_vm0, %v615_v52  }
  0x31   :  { %617 = vst.msk [vmem:[%s1409_s1 + $0x2e9] sm:$0x80] %vm3_vm0, %v615_v52   ;;  %619 = vst.msk [vmem:[%s1409_s1 + $0x2f1] sm:$0xff] %vm3_vm0, %v618_v53  }
  0x32   :  { %621 = vst.msk [vmem:[%s1409_s1 + $0x300] sm:$0xff] %vm3_vm0, %v620_v54   ;;  %623 = vst.msk [vmem:[%s1409_s1 + $0x308] ss:$8 sm:$0x3] %vm3_vm0, %v622_v55  }
  0x33   :  { %624 = vst.msk [vmem:[%s1409_s1 + $0x30f] sm:$0xfc] %vm3_vm0, %v622_v55   ;;  %626 = vst.msk [vmem:[%s1409_s1 + $0x317] sm:$0x3] %vm3_vm0, %v625_v56  }
  0x34   :  { %627 = vst.msk [vmem:[%s1409_s1 + $0x31e] sm:$0xfc] %vm3_vm0, %v625_v56   ;;  %629 = vst.msk [vmem:[%s1409_s1 + $0x326] sm:$0x7] %vm3_vm0, %v628_v57  }
  0x35   :  { %630 = vst.msk [vmem:[%s1409_s1 + $0x32d] sm:$0xf8] %vm3_vm0, %v628_v57   ;;  %632 = vst.msk [vmem:[%s1409_s1 + $0x335] sm:$0xf] %vm3_vm0, %v631_v58  }
  0x36   :  { %633 = vst.msk [vmem:[%s1409_s1 + $0x33c] sm:$0xf0] %vm3_vm0, %v631_v58   ;;  %635 = vst.msk [vmem:[%s1409_s1 + $0x344] sm:$0x1f] %vm3_vm0, %v634_v59  }
  0x37   :  { %636 = vst.msk [vmem:[%s1409_s1 + $0x34b] sm:$0xe0] %vm3_vm0, %v634_v59   ;;  %638 = vst.msk [vmem:[%s1409_s1 + $0x353] sm:$0x3f] %vm3_vm0, %v637_v60  }
  0x38   :  { %639 = vst.msk [vmem:[%s1409_s1 + $0x35a] sm:$0xc0] %vm3_vm0, %v637_v60   ;;  %641 = vst.msk [vmem:[%s1409_s1 + $0x362] sm:$0x7f] %vm3_vm0, %v640_v61  }
  0x39   :  { %642 = vst.msk [vmem:[%s1409_s1 + $0x369] sm:$0x80] %vm3_vm0, %v640_v61   ;;  %644 = vst.msk [vmem:[%s1409_s1 + $0x371] sm:$0xff] %vm3_vm0, %v643_v62  }
  0x3a   :  { %646 = vst.msk [vmem:[%s1409_s1 + $0x380] sm:$0xff] %vm3_vm0, %v645_v63   ;;  %648 = vst.msk [vmem:[%s1409_s1 + $0x388] ss:$8 sm:$0x3] %vm3_vm0, %v647_v0  }
  0x3b   :  { %649 = vst.msk [vmem:[%s1409_s1 + $0x38f] sm:$0xfc] %vm3_vm0, %v647_v0   ;;  %651 = vst.msk [vmem:[%s1409_s1 + $0x397] sm:$0x3] %vm3_vm0, %v650_v1  }
  0x3c   :  { %652 = vst.msk [vmem:[%s1409_s1 + $0x39e] sm:$0xfc] %vm3_vm0, %v650_v1   ;;  %654 = vst.msk [vmem:[%s1409_s1 + $0x3a6] sm:$0x7] %vm3_vm0, %v653_v2  }
  0x3d   :  { %655 = vst.msk [vmem:[%s1409_s1 + $0x3ad] sm:$0xf8] %vm3_vm0, %v653_v2   ;;  %657 = vst.msk [vmem:[%s1409_s1 + $0x3b5] sm:$0xf] %vm3_vm0, %v656_v3  }
  0x3e   :  { %658 = vst.msk [vmem:[%s1409_s1 + $0x3bc] sm:$0xf0] %vm3_vm0, %v656_v3   ;;  %660 = vst.msk [vmem:[%s1409_s1 + $0x3c4] sm:$0x1f] %vm3_vm0, %v659_v4  }
  0x3f   :  { %661 = vst.msk [vmem:[%s1409_s1 + $0x3cb] sm:$0xe0] %vm3_vm0, %v659_v4   ;;  %663 = vst.msk [vmem:[%s1409_s1 + $0x3d3] sm:$0x3f] %vm3_vm0, %v662_v5  }
  0x40   :  { %664 = vst.msk [vmem:[%s1409_s1 + $0x3da] sm:$0xc0] %vm3_vm0, %v662_v5   ;;  %666 = vst.msk [vmem:[%s1409_s1 + $0x3e2] sm:$0x7f] %vm3_vm0, %v665_v6  }
  0x41   :  { %667 = vst.msk [vmem:[%s1409_s1 + $0x3e9] sm:$0x80] %vm3_vm0, %v665_v6   ;;  %669 = vst.msk [vmem:[%s1409_s1 + $0x3f1] sm:$0xff] %vm3_vm0, %v668_v7  }

// kernel: cot_attention_2d.4
= control target key start
LH: loop header
LB: loop body
LE: loop exit
PB: predicated region body
PF: predicated region fallthrough
CT: control target
= control target key end

     0   :  { %s1781_s21 = smov 0   ;;  %s2153_s0 = inlined_call_operand.vmem [shape: f32[512,64], index: 0, kind: input, shape index: {}]   ;;  %s2154_s1 = inlined_call_operand.vmem [shape: bf16[512,64], index: 1, kind: input, shape index: {}]   ;;  %s2155_s2 = inlined_call_operand.vmem [shape: f32[1,64], index: 2, kind: input, shape index: {}]   ;;  %s2156_s3 = inlined_call_operand.vmem [shape: f32[1,64], index: 3, kind: input, shape index: {}]   ;;  %s2157_s4 = inlined_call_operand.vmem [shape: bf16[64,128], index: 4, kind: input, shape index: {}]   ;;  %s2158_s5 = inlined_call_operand.vmem [shape: bf16[64,128], index: 5, kind: input, shape index: {}]   ;;  %s2159_s6 = inlined_call_operand.vmem [shape: f32[512,128], index: 6, kind: output, shape index: {}]  }
   0x1 LB: > { %s1323_s22 = sadd.s32 4294967295, %s1744_s21   ;;  %p1327_p0 = scmp.ge.s32.totalorder %s1744_s21, 1  ;;  %s1744_s21 = sphi %s1781_s21, %s16_s21  }
   0x2   : > { %p224_p1 = scmp.lt.s32.totalorder %s1744_s21, 3 }
   0x4   : > { %p225_p2 = pnand %p1327_p0, %p224_p1 }
   0x5   : > { %v1586_v0 = vld [vmem:[%s2158_s5] sm:$0xff] (!%p225_p2)   ;;  %s1328_s25 = sshll.u32 (!%p225_p2), %s1323_s22, 5  ;;  %v1588_v2 = vld [vmem:[%s2158_s5 + $0x8] sm:$0xff] (!%p225_p2)   ;;  %v1590_v4 = vld [vmem:[%s2158_s5 + $0x10] sm:$0xff] (!%p225_p2)   ;;  %vm780_vm0 = vcmask (!%p225_p2), 523264  }
   0x6   : > { %228 = sbr.rel (%p225_p2) target bundleno = 330 (0x14a), region = 44  ;;  %v1587_v1 = vld [vmem:[%s2157_s4] sm:$0xff] (!%p225_p2)   ;;  %p260_p3 = scmp.lt.s32.totalorder (!%p225_p2), %s1328_s25, 63  ;;  %1466 = vmatprep.subr.bf16.mxu1 (!%p225_p2), %v1586_v0  ;;  %v1589_v3 = vld [vmem:[%s2157_s4 + $0x8] sm:$0xff] (!%p225_p2)   ;;  %v1591_v5 = vld [vmem:[%s2157_s4 + $0x10] sm:$0xff] (!%p225_p2)  }
   0x7   : > { %1467 = vmatpush3.bf16.msra.mxu1 (!%p225_p2), %v1586_v0  ;;  %1506 = vmatprep.subr.bf16.mxu0 (!%p225_p2), %v1587_v1  ;;  %v1592_v6 = vld [vmem:[%s2158_s5 + $0x18] sm:$0xff] (!%p225_p2)   ;;  %v1836_v11 = vld [vmem:[%s2155_s2] ss:$0 sm:$0xff] (!%p225_p2) }
   0x8   : > { %1468 = vmatprep.subr.bf16.mxu1 (!%p225_p2), %v1588_v2  ;;  %1507 = vmatpush3.bf16.msra.mxu0 (!%p225_p2), %v1587_v1  ;;  %v1594_v8 = vld [vmem:[%s2157_s4 + $0x18] sm:$0xff] (!%p225_p2)   ;;  %v1843_v14 = vld [vmem:[%s2156_s3] ss:$0 sm:$0xff] (!%p225_p2) }
   0x9   : > { %1508 = vmatprep.subr.bf16.mxu0 (!%p225_p2), %v1589_v3 }
   0xb   : > { %1469 = vmatpush3.bf16.msra.mxu1 (!%p225_p2), %v1588_v2 }
   0xc   : > { %1470 = vmatprep.subr.bf16.mxu1 (!%p225_p2), %v1590_v4  ;;  %1509 = vmatpush3.bf16.msra.mxu0 (!%p225_p2), %v1589_v3 }
   0xd   : > { %s2161_s25 = smov (!%p260_p3, %s1328_s25), 63  ;;  %1510 = vmatprep.subr.bf16.mxu0 %v1591_v5 }
   0xe   : > { %s1329_s12 = sshll.u32 %s2161_s25, 3  ;;  %s1331_s13 = sshll.u32 %s2161_s25, 2 }
   0xf   : > { %s1819_s18 = scalar_lea.vmem %s2153_s0, %s1329_s12  ;;  %s1824_s22 = scalar_lea.vmem %s2154_s1, %s1331_s13  ;;  %1471 = vmatpush3.bf16.msra.mxu1 %v1590_v4 }
  0x10   : > { %v1593_v7 = vld [vmem:[%s1824_s22] sm:$0xff]   ;;  %v279_v10 = vld [vmem:[%s1819_s18 + $0x8] sm:$0xff]  ;;  %v280_v15 = vld [vmem:[%s1819_s18 + $0x10] sm:$0xff]  ;;  %1472 = vmatprep.subr.bf16.mxu1 %v1592_v6  ;;  %1511 = vmatpush3.bf16.msra.mxu0 %v1591_v5  ;;  %s2116_s8 = scalar_lea.vmem %s2159_s6, %s1329_s12 }
  0x11   : > { %1474 = vmatprep.mubr.msk.bf16.mxu1 %vm780_vm0, %v1593_v7  ;;  %v278_v9 = vld [vmem:[%s1819_s18] sm:$0xff]  ;;  %v318_v13 = vmul.f32 %v1836_v11, %v279_v10  ;;  %v281_v16 = vld [vmem:[%s1819_s18 + $0x18] sm:$0xff]  ;;  %v319_v17 = vmul.f32 %v1836_v11, %v280_v15  ;;  %1512 = vmatprep.subr.bf16.mxu0 %v1594_v8  ;;  %v1595_v19 = vld [vmem:[%s1824_s22 + $0x8] sm:$0xff]  }
  0x12   : > { %v317_v12 = vmul.f32 %v1836_v11, %v278_v9  ;;  %v320_v18 = vmul.f32 %v1836_v11, %v281_v16  ;;  %v282_v24 = vld [vmem:[%s1819_s18 + $0x20] sm:$0xff]  ;;  %v283_v25 = vld [vmem:[%s1819_s18 + $0x28] sm:$0xff]  ;;  %v284_v26 = vld [vmem:[%s1819_s18 + $0x30] sm:$0xff] }
  0x13   : > { %v1854_v21 = vadd.f32 %v1843_v14, %v318_v13  ;;  %v1857_v22 = vadd.f32 %v1843_v14, %v319_v17  ;;  %1473 = vmatpush3.bf16.msra.mxu1 %v1592_v6  ;;  %v1596_v29 = vld [vmem:[%s1824_s22 + $0x10] sm:$0xff]   ;;  %v321_v30 = vmul.f32 %v1836_v11, %v282_v24  ;;  %v322_v31 = vmul.f32 %v1836_v11, %v283_v25  ;;  %v285_v32 = vld [vmem:[%s1819_s18 + $0x38] sm:$0xff]  ;;  %v286_v41 = vld [vmem:[%s1819_s18 + $0x40] sm:$0xff] }
  0x14   : > { %v1851_v20 = vadd.f32 %v1843_v14, %v317_v12  ;;  %v1860_v23 = vadd.f32 %v1843_v14, %v320_v18  ;;  %1513 = vmatpush3.bf16.msra.mxu0 %v1594_v8  ;;  %v323_v35 = vmul.f32 %v1836_v11, %v284_v26  ;;  %v324_v36 = vmul.f32 %v1836_v11, %v285_v32  ;;  %v287_v42 = vld [vmem:[%s1819_s18 + $0x48] sm:$0xff]  ;;  %v288_v46 = vld [vmem:[%s1819_s18 + $0x50] sm:$0xff]  ;;  %v289_v47 = vld [vmem:[%s1819_s18 + $0x58] sm:$0xff] }
  0x15   : > { %v1337_v28 = vmul.f32 -1.442695, %v1854_v21  ;;  %v1338_v33 = vmul.f32 -1.442695, %v1857_v22  ;;  %v1876_v37 = vadd.f32 %v1843_v14, %v321_v30  ;;  %v1879_v38 = vadd.f32 %v1843_v14, %v322_v31  ;;  %v1597_v54 = vld [vmem:[%s1824_s22 + $0x18] sm:$0xff]   ;;  %v290_v56 = vld [vmem:[%s1819_s18 + $0x60] sm:$0xff] }
  0x16   : > { %v1336_v27 = vmul.f32 -1.442695, %v1851_v20  ;;  %v1339_v34 = vmul.f32 -1.442695, %v1860_v23  ;;  %1475 = vmatmul.mubr.msk.bf16.vlgmr.msra.gmra.mrb[0].mxu1 %vm780_vm0, %v1595_v19  ;;  %v1883_v39 = vadd.f32 %v1843_v14, %v323_v35  ;;  %v1886_v40 = vadd.f32 %v1843_v14, %v324_v36  ;;  %v1598_v57 = vld [vmem:[%s1824_s22 + $0x20] sm:$0xff]   ;;  %v291_v61 = vld [vmem:[%s1819_s18 + $0x68] sm:$0xff] }
  0x17   : > { %1478 = vmatprep.mubr.msk.bf16.mxu1 %vm780_vm0, %v1596_v29  ;;  %v1340_v43 = vmul.f32 -1.442695, %v1876_v37  ;;  %v1341_v44 = vmul.f32 -1.442695, %v1879_v38  ;;  %v325_v45 = vmul.f32 %v1836_v11, %v286_v41  ;;  %v326_v50 = vmul.f32 %v1836_v11, %v287_v42  ;;  %v292_v62 = vld [vmem:[%s1819_s18 + $0x70] sm:$0xff]  ;;  %v293_v5 = vld [vmem:[%s1819_s18 + $0x78] sm:$0xff] }
  0x18   : > { %1610 = vpow2.f32 %v1336_v27  ;;  %v1342_v48 = vmul.f32 -1.442695, %v1883_v39  ;;  %v1343_v49 = vmul.f32 -1.442695, %v1886_v40  ;;  %v327_v52 = vmul.f32 %v1836_v11, %v288_v46  ;;  %v294_v10 = vld [vmem:[%s1819_s18 + $0x80] sm:$0xff]  ;;  %v295_v16 = vld [vmem:[%s1819_s18 + $0x88] sm:$0xff] }
  0x19   : > { %1612 = vpow2.f32 %v1337_v28  ;;  %v1900_v51 = vadd.f32 %v1843_v14, %v325_v45  ;;  %v328_v53 = vmul.f32 %v1836_v11, %v289_v47  ;;  %v1906_v55 = vadd.f32 %v1843_v14, %v326_v50  ;;  %v1599_v19 = vld [vmem:[%s1824_s22 + $0x28] sm:$0xff]   ;;  %v1600_v27 = vld [vmem:[%s1824_s22 + $0x30] sm:$0xff]   ;;  %v297_v42 = vld [vmem:[%s1819_s18 + $0x98] sm:$0xff] }
  0x1a   : > { %1614 = vpow2.f32 %v1338_v33  ;;  %v1912_v59 = vadd.f32 %v1843_v14, %v327_v52  ;;  %v329_v0 = vmul.f32 %v1836_v11, %v290_v56  ;;  %v330_v3 = vmul.f32 %v1836_v11, %v291_v61  ;;  %v296_v30 = vld [vmem:[%s1819_s18 + $0x90] sm:$0xff]  ;;  %v298_v47 = vld [vmem:[%s1819_s18 + $0xa0] sm:$0xff] }
  0x1b   : > { %1616 = vpow2.f32 %v1339_v34  ;;  %v1344_v58 = vmul.f32 -1.442695, %v1900_v51  ;;  %v1915_v60 = vadd.f32 %v1843_v14, %v328_v53  ;;  %v1345_v63 = vmul.f32 -1.442695, %v1906_v55  ;;  %v300_v61 = vld [vmem:[%s1819_s18 + $0xb0] sm:$0xff] }
  0x1c   : > { %1618 = vpow2.f32 %v1340_v43  ;;  %v1346_v1 = vmul.f32 -1.442695, %v1912_v59  ;;  %v331_v6 = vmul.f32 %v1836_v11, %v292_v62  ;;  %v1929_v9 = vadd.f32 %v1843_v14, %v329_v0  ;;  %v1601_v0 = vld [vmem:[%s1824_s22 + $0x38] sm:$0xff]  }
  0x1d   : > { %1620 = vpow2.f32 %v1341_v44  ;;  %v1347_v2 = vmul.f32 -1.442695, %v1915_v60  ;;  %v1933_v15 = vadd.f32 %v1843_v14, %v330_v3  ;;  %v332_v24 = vmul.f32 %v1836_v11, %v293_v5 }
  0x1e   : > { %1622 = vpow2.f32 %v1342_v48  ;;  %1479 = vmatmul.mubr.msk.bf16.gmra.mrb[4].mxu1 %vm780_vm0, %v1597_v54  ;;  %v1940_v28 = vadd.f32 %v1843_v14, %v331_v6  ;;  %v333_v29 = vmul.f32 %v1836_v11, %v294_v10  ;;  %v1348_v33 = vmul.f32 -1.442695, %v1929_v9  ;;  %v301_v6 = vld [vmem:[%s1819_s18 + $0xb8] sm:$0xff] }
  0x1f   : > { %1624 = vpow2.f32 %v1343_v49  ;;  %1482 = vmatprep.mubr.msk.bf16.mxu1 %vm780_vm0, %v1598_v57  ;;  %v334_v34 = vmul.f32 %v1836_v11, %v295_v16  ;;  %v1349_v41 = vmul.f32 -1.442695, %v1933_v15  ;;  %v1950_v45 = vadd.f32 %v1843_v14, %v332_v24 }
  0x20   : > { %1626 = vpow2.f32 %v1344_v58  ;;  %v335_v46 = vmul.f32 %v1836_v11, %v296_v30  ;;  %v1350_v50 = vmul.f32 -1.442695, %v1940_v28  ;;  %v1957_v52 = vadd.f32 %v1843_v14, %v333_v29  ;;  %v299_v58 = vld [vmem:[%s1819_s18 + $0xa8] sm:$0xff] }
  0x21   : > { %1628 = vpow2.f32 %v1345_v63  ;;  %v1960_v56 = vadd.f32 %v1843_v14, %v334_v34  ;;  %v336_v57 = vmul.f32 %v1836_v11, %v297_v42  ;;  %v338_v10 = vmul.f32 %v1836_v11, %v299_v58 }
  0x22   : > { %v1611_v4 = vpop.eup %1610  ;;  %1630 = vpow2.f32 %v1346_v1  ;;  %v337_v1 = vmul.f32 %v1836_v11, %v298_v47  ;;  %v1969_v5 = vadd.f32 %v1843_v14, %v335_v46 }
  0x23   : > { %v1613_v7 = vpop.eup %1612  ;;  %v484_v8 = vadd.f32 1.0, %v1611_v4  ;;  %1632 = vpow2.f32 %v1347_v2  ;;  %v1351_v4 = vmul.f32 -1.442695, %v1950_v45 }
  0x24   : > { %v1615_v12 = vpop.eup %1614  ;;  %v485_v13 = vadd.f32 1.0, %v1613_v7 }
  0x25   : > { %v1617_v17 = vpop.eup %1616  ;;  %1634 = vrcp.f32 %v484_v8  ;;  %v486_v18 = vadd.f32 1.0, %v1615_v12  ;;  %v1602_v8 = vld [vmem:[%s1824_s22 + $0x40] sm:$0xff]   ;;  %v339_v12 = vmul.f32 %v1836_v11, %v300_v61 }
  0x26   : > { %v1619_v25 = vpop.eup %1618  ;;  %1636 = vrcp.f32 %v485_v13  ;;  %v487_v26 = vadd.f32 1.0, %v1617_v17  ;;  %1483 = vmatmul.mubr.msk.bf16.gmra.mrb[8].mxu1 %vm780_vm0, %v1599_v19  ;;  %v302_v13 = vld [vmem:[%s1819_s18 + $0xc0] sm:$0xff]  ;;  %v1352_v17 = vmul.f32 -1.442695, %v1957_v52  ;;  %v1979_v19 = vadd.f32 %v1843_v14, %v336_v57 }
  0x27   : > { %v1621_v31 = vpop.eup %1620  ;;  %1638 = vrcp.f32 %v486_v18  ;;  %v488_v32 = vadd.f32 1.0, %v1619_v25  ;;  %1486 = vmatprep.mubr.msk.bf16.mxu1 %vm780_vm0, %v1600_v27  ;;  %v1353_v18 = vmul.f32 -1.442695, %v1960_v56  ;;  %v340_v27 = vmul.f32 %v1836_v11, %v301_v6  ;;  %v303_v6 = vld [vmem:[%s1819_s18 + $0xc8] sm:$0xff] }
  0x28   : > { %v1623_v35 = vpop.eup %1622  ;;  %1640 = vrcp.f32 %v487_v26  ;;  %v489_v36 = vadd.f32 1.0, %v1621_v31  ;;  %v1983_v26 = vadd.f32 %v1843_v14, %v337_v1  ;;  %v1354_v31 = vmul.f32 -1.442695, %v1969_v5 }
  0x29   : > { %v1625_v43 = vpop.eup %1624  ;;  %1642 = vrcp.f32 %v488_v32  ;;  %v490_v44 = vadd.f32 1.0, %v1623_v35  ;;  %v341_v32 = vmul.f32 %v1836_v11, %v302_v13  ;;  %v2003_v46 = vadd.f32 %v1843_v14, %v340_v27  ;;  %v1605_v13 = vld [vmem:[%s1824_s22 + $0x58] sm:$0xff]  }
  0x2a   : > { %v1627_v48 = vpop.eup %1626  ;;  %1644 = vrcp.f32 %v489_v36  ;;  %v491_v49 = vadd.f32 1.0, %v1625_v43  ;;  %v1996_v36 = vadd.f32 %v1843_v14, %v339_v12  ;;  %v1355_v43 = vmul.f32 -1.442695, %v1979_v19  ;;  %v305_v27 = vld [vmem:[%s1819_s18 + $0xd8] sm:$0xff] }
  0x2b   : > { %v1629_v53 = vpop.eup %1628  ;;  %1646 = vrcp.f32 %v490_v44  ;;  %v492_v54 = vadd.f32 1.0, %v1627_v48  ;;  %v1359_v1 = vmul.f32 -1.442695, %v2003_v46 }
  0x2c   : > { %v1631_v62 = vpop.eup %1630  ;;  %1648 = vrcp.f32 %v491_v49  ;;  %v493_v63 = vadd.f32 1.0, %v1629_v53  ;;  %v1358_v57 = vmul.f32 -1.442695, %v1996_v36 }
  0x2d   : > { %v1633_v2 = vpop.eup %1632  ;;  %1650 = vrcp.f32 %v492_v54  ;;  %v494_v3 = vadd.f32 1.0, %v1631_v62 }
  0x2e   : > { %1652 = vrcp.f32 %v493_v63  ;;  %v495_v7 = vadd.f32 1.0, %v1633_v2  ;;  %1487 = vmatmul.mubr.msk.bf16.gmra.mrb[12].mxu1 %vm780_vm0, %v1601_v0 }
  0x2f   : > { %v1635_v16 = vpop.eup %1634  ;;  %1654 = vrcp.f32 %v494_v3  ;;  %1490 = vmatprep.mubr.msk.bf16.mxu1 %vm780_vm0, %v1602_v8 }
  0x30   : > { %v1637_v24 = vpop.eup %1636  ;;  %v580_v25 = vmul.f32 %v1635_v16, %v1851_v20  ;;  %1656 = vrcp.f32 %v495_v7  ;;  %v1993_v20 = vadd.f32 %v1843_v14, %v338_v10  ;;  %v304_v16 = vld [vmem:[%s1819_s18 + $0xd0] sm:$0xff] }
  0x31   : > { %v1639_v29 = vpop.eup %1638  ;;  %v581_v30 = vmul.f32 %v1637_v24, %v1854_v21  ;;  %1658 = vpow2.f32 %v1348_v33  ;;  %v1606_v24 = vld [vmem:[%s1824_s22 + $0x60] sm:$0xff]  }
  0x32   : > { %v1641_v34 = vpop.eup %1640  ;;  %v582_v35 = vmul.f32 %v1639_v29, %v1857_v22  ;;  %1660 = vpow2.f32 %v1349_v41  ;;  %v1356_v41 = vmul.f32 -1.442695, %v1983_v26  ;;  %v1357_v54 = vmul.f32 -1.442695, %v1993_v20 }
  0x33   : > { %v1643_v21 = vpop.eup %1642  ;;  %v612_v42 = vpack.c.bf16 %v581_v30, %v580_v25  ;;  %v583_v33 = vmul.f32 %v1641_v34, %v1860_v23  ;;  %1662 = vpow2.f32 %v1350_v50  ;;  %v1603_v23 = vld [vmem:[%s1824_s22 + $0x48] sm:$0xff]   ;;  %v2009_v50 = vadd.f32 %v1843_v14, %v341_v32  ;;  %v306_v34 = vld [vmem:[%s1819_s18 + $0xe0] sm:$0xff] }
  0x34   : > { %v1645_v44 = vpop.eup %1644  ;;  %v584_v22 = vmul.f32 %v1643_v21, %v1876_v37  ;;  %1664 = vpow2.f32 %v1351_v4  ;;  %v1604_v37 = vld [vmem:[%s1824_s22 + $0x50] sm:$0xff]   ;;  %v342_v25 = vmul.f32 %v1836_v11, %v303_v6 }
  0x35   : > { %v1647_v47 = vpop.eup %1646  ;;  %1514 = vmatprep.mubr.msk.bf16.mxu0 %vm780_vm0, %v612_v42  ;;  %v613_v48 = vpack.c.bf16 %v583_v33, %v582_v35  ;;  %v585_v49 = vmul.f32 %v1645_v44, %v1879_v38  ;;  %1666 = vpow2.f32 %v1352_v17  ;;  %v343_v42 = vmul.f32 %v1836_v11, %v304_v16  ;;  %v307_v33 = vld [vmem:[%s1819_s18 + $0xe8] sm:$0xff] }
  0x36   : > { %v1649_v53 = vpop.eup %1648  ;;  %1668 = vpow2.f32 %v1353_v18  ;;  %v586_v62 = vmul.f32 %v1647_v47, %v1883_v39  ;;  %1491 = vmatmul.mubr.msk.bf16.gmra.mrb[16].mxu1 %vm780_vm0, %v1603_v23  ;;  %v1360_v39 = vmul.f32 -1.442695, %v2009_v50  ;;  %v2042_v47 = vadd.f32 %v1843_v14, %v342_v25 }
  0x37   : > { %v1651_v58 = vpop.eup %1650  ;;  %1515 = vmatmul.mubr.msk.bf16.vlgmr.msra.gmra.mrb[0].mxu0 %vm780_vm0, %v613_v48  ;;  %v614_v61 = vpack.c.bf16 %v585_v49, %v584_v22  ;;  %v587_v38 = vmul.f32 %v1649_v53, %v1886_v40  ;;  %1670 = vpow2.f32 %v1354_v31  ;;  %1494 = vmatprep.mubr.msk.bf16.mxu1 %vm780_vm0, %v1604_v37  ;;  %v345_v48 = vmul.f32 %v1836_v11, %v306_v34  ;;  %v309_v49 = vld [vmem:[%s1819_s18 + $0xf8] sm:$0xff] }
  0x38   : > { %v1653_v63 = vpop.eup %1652  ;;  %v588_v0 = vmul.f32 %v1651_v58, %v1900_v51  ;;  %1672 = vpow2.f32 %v1355_v43 }
  0x39   : > { %v1655_v2 = vpop.eup %1654  ;;  %1518 = vmatprep.mubr.msk.bf16.mxu0 %vm780_vm0, %v614_v61  ;;  %v589_v3 = vmul.f32 %v1653_v63, %v1906_v55  ;;  %1674 = vpow2.f32 %v1356_v41  ;;  %v615_v4 = vpack.c.bf16 %v587_v38, %v586_v62  ;;  %v2048_v61 = vadd.f32 %v1843_v14, %v343_v42 }
  0x3a   : > { %v1657_v40 = vpop.eup %1656  ;;  %1676 = vpow2.f32 %v1357_v54  ;;  %v590_v30 = vmul.f32 %v1655_v2, %v1912_v59  ;;  %v344_v59 = vmul.f32 %v1836_v11, %v305_v27  ;;  %v346_v54 = vmul.f32 %v1836_v11, %v307_v33 }
  0x3b   : > { %v1659_v51 = vpop.eup %1658  ;;  %1678 = vpow2.f32 %v1358_v57  ;;  %v616_v8 = vpack.c.bf16 %v589_v3, %v588_v0  ;;  %v591_v31 = vmul.f32 %v1657_v40, %v1915_v60  ;;  %v308_v60 = vld [vmem:[%s1819_s18 + $0xf0] sm:$0xff]  ;;  %v1607_v0 = vld [vmem:[%s1824_s22 + $0x68] sm:$0xff]   ;;  %v348_v2 = vmul.f32 %v1836_v11, %v309_v49 }
  0x3c   : > { %v1661_v7 = vpop.eup %1660  ;;  %v496_v55 = vadd.f32 1.0, %v1659_v51  ;;  %1680 = vpow2.f32 %v1359_v1  ;;  %v347_v62 = vmul.f32 %v1836_v11, %v308_v60  ;;  %v2053_v1 = vadd.f32 %v1843_v14, %v344_v59  ;;  %v1608_v51 = vld [vmem:[%s1824_s22 + $0x70] sm:$0xff]  }
  0x3d   : > { %v1663_v10 = vpop.eup %1662  ;;  %v497_v12 = vadd.f32 1.0, %v1661_v7  ;;  %1682 = vpow2.f32 %v1360_v39  ;;  %v617_v53 = vpack.c.bf16 %v591_v31, %v590_v30  ;;  %v1361_v40 = vmul.f32 -1.442695, %v2042_v47 }
  0x3e   : > { %v1665_v17 = vpop.eup %1664  ;;  %1684 = vrcp.f32 %v496_v55  ;;  %v498_v18 = vadd.f32 1.0, %v1663_v10  ;;  %1495 = vmatmul.mubr.msk.bf16.gmra.mrb[20].mxu1 %vm780_vm0, %v1605_v13  ;;  %v1362_v11 = vmul.f32 -1.442695, %v2048_v61  ;;  %v2067_v10 = vadd.f32 %v1843_v14, %v347_v62 }
  0x3f   : > { %v1667_v29 = vpop.eup %1666  ;;  %1519 = vmatmul.mubr.msk.bf16.gmra.mrb[4].mxu0 %vm780_vm0, %v615_v4  ;;  %1686 = vrcp.f32 %v497_v12  ;;  %v499_v32 = vadd.f32 1.0, %v1665_v17  ;;  %1498 = vmatprep.mubr.msk.bf16.mxu1 %vm780_vm0, %v1606_v24  ;;  %v2059_v4 = vadd.f32 %v1843_v14, %v345_v48  ;;  %v1363_v16 = vmul.f32 -1.442695, %v2053_v1 }
  0x40   : > { %v1669_v35 = vpop.eup %1668  ;;  %1522 = vmatprep.mubr.msk.bf16.mxu0 %vm780_vm0, %v616_v8  ;;  %1688 = vrcp.f32 %v498_v18  ;;  %v500_v21 = vadd.f32 1.0, %v1667_v29  ;;  %v2063_v8 = vadd.f32 %v1843_v14, %v346_v54  ;;  %v2073_v17 = vadd.f32 %v1843_v14, %v348_v2 }
  0x41   : > { %v1671_v43 = vpop.eup %1670  ;;  %1690 = vrcp.f32 %v499_v32  ;;  %v501_v44 = vadd.f32 1.0, %v1669_v35  ;;  %v1364_v25 = vmul.f32 -1.442695, %v2059_v4  ;;  %v1366_v32 = vmul.f32 -1.442695, %v2067_v10  ;;  %v1609_v35 = vld [vmem:[%s1824_s22 + $0x78] sm:$0xff]  }
  0x42   : > { %v1673_v22 = vpop.eup %1672  ;;  %1692 = vrcp.f32 %v500_v21  ;;  %v502_v41 = vadd.f32 1.0, %v1671_v43  ;;  %v1365_v29 = vmul.f32 -1.442695, %v2063_v8  ;;  %v1367_v21 = vmul.f32 -1.442695, %v2073_v17 }
  0x43   : > { %v1675_v23 = vpop.eup %1674  ;;  %1694 = vrcp.f32 %v501_v44  ;;  %v503_v37 = vadd.f32 1.0, %v1673_v22 }
  0x44   : > { %v1677_v57 = vpop.eup %1676  ;;  %1696 = vrcp.f32 %v502_v41  ;;  %v504_v58 = vadd.f32 1.0, %v1675_v23 }
  0x45   : > { %v1679_v38 = vpop.eup %1678  ;;  %1698 = vrcp.f32 %v503_v37  ;;  %v505_v63 = vadd.f32 1.0, %v1677_v57 }
  0x46   : > { %v1681_v3 = vpop.eup %1680  ;;  %1700 = vrcp.f32 %v504_v58  ;;  %v506_v39 = vadd.f32 1.0, %v1679_v38  ;;  %1499 = vmatmul.mubr.msk.bf16.gmra.mrb[24].mxu1 %vm780_vm0, %v1607_v0 }
  0x47   : > { %v1683_v6 = vpop.eup %1682  ;;  %1523 = vmatmul.mubr.msk.bf16.gmra.mrb[8].mxu0 %vm780_vm0, %v617_v53  ;;  %1702 = vrcp.f32 %v505_v63  ;;  %v507_v7 = vadd.f32 1.0, %v1681_v3  ;;  %1502 = vmatprep.mubr.msk.bf16.mxu1 %vm780_vm0, %v1608_v51 }
  0x48   : > { %v1685_v55 = vpop.eup %1684  ;;  %1704 = vrcp.f32 %v506_v39  ;;  %v508_v44 = vadd.f32 1.0, %v1683_v6 }
  0x49   : > { %v1687_v12 = vpop.eup %1686  ;;  %v592_v13 = vmul.f32 %v1685_v55, %v1929_v9  ;;  %1706 = vpow2.f32 %v1361_v40 }
  0x4a   : > { %v1689_v18 = vpop.eup %1688  ;;  %v593_v24 = vmul.f32 %v1687_v12, %v1933_v15  ;;  %1708 = vrcp.f32 %v507_v7 }
  0x4b   : > { %v1691_v27 = vpop.eup %1690  ;;  %v594_v9 = vmul.f32 %v1689_v18, %v1940_v28  ;;  %1710 = vpow2.f32 %v1362_v11 }
  0x4c   : > { %v1693_v30 = vpop.eup %1692  ;;  %v618_v31 = vpack.c.bf16 %v593_v24, %v592_v13  ;;  %v595_v14 = vmul.f32 %v1691_v27, %v1950_v45  ;;  %1712 = vpow2.f32 %v1363_v16 }
  0x4d   : > { %v1695_v15 = vpop.eup %1694  ;;  %v596_v34 = vmul.f32 %v1693_v30, %v1957_v52  ;;  %1714 = vpow2.f32 %v1364_v25 }
  0x4e   : > { %v1697_v42 = vpop.eup %1696  ;;  %1526 = vmatprep.mubr.msk.bf16.mxu0 %vm780_vm0, %v618_v31  ;;  %v619_v28 = vpack.c.bf16 %v595_v14, %v594_v9  ;;  %v597_v33 = vmul.f32 %v1695_v15, %v1960_v56  ;;  %1716 = vpow2.f32 %v1365_v29  ;;  %1503 = vmatmul.mubr.msk.bf16.gmra.mrb[28].mxu1 %vm780_vm0, %v1609_v35 }
  0x4f   : > { %v1699_v43 = vpop.eup %1698  ;;  %v598_v52 = vmul.f32 %v1697_v42, %v1969_v5  ;;  %1718 = vpow2.f32 %v1366_v32 }
  0x50   : > { %v1701_v45 = vpop.eup %1700  ;;  %1527 = vmatmul.mubr.msk.bf16.gmra.mrb[12].mxu0 %vm780_vm0, %v619_v28  ;;  %v620_v59 = vpack.c.bf16 %v597_v33, %v596_v34  ;;  %v599_v60 = vmul.f32 %v1699_v43, %v1979_v19  ;;  %1720 = vpow2.f32 %v1367_v21 }
  0x51   : > { %v1703_v22 = vpop.eup %1702  ;;  %v600_v41 = vmul.f32 %v1701_v45, %v1983_v26  ;;  %1722 = vrcp.f32 %v508_v44 }
  0x52   : > { %1530 = vmatprep.mubr.msk.bf16.mxu0 %vm780_vm0, %v620_v59  ;;  %v601_v56 = vmul.f32 %v1703_v22, %v1993_v20  ;;  %v1705_v48 = vpop.eup %1704  ;;  %v621_v23 = vpack.c.bf16 %v599_v60, %v598_v52 }
  0x53   : > { %v1707_v49 = vpop.eup %1706  ;;  %v602_v26 = vmul.f32 %v1705_v48, %v1996_v36 }
  0x54   : > { %v1709_v53 = vpop.eup %1708  ;;  %v622_v37 = vpack.c.bf16 %v601_v56, %v600_v41  ;;  %v509_v5 = vadd.f32 1.0, %v1707_v49 }
  0x55   : > { %v1711_v54 = vpop.eup %1710  ;;  %v603_v62 = vmul.f32 %v1709_v53, %v2003_v46 }
  0x56   : > { %v1713_v19 = vpop.eup %1712  ;;  %1724 = vrcp.f32 %v509_v5  ;;  %v510_v57 = vadd.f32 1.0, %v1711_v54 }
  0x57   : > { %v1715_v58 = vpop.eup %1714  ;;  %v511_v38 = vadd.f32 1.0, %v1713_v19  ;;  %v623_v40 = vpack.c.bf16 %v603_v62, %v602_v26 }
  0x58   : > { %1531 = vmatmul.mubr.msk.bf16.gmra.mrb[16].mxu0 %vm780_vm0, %v621_v23  ;;  %v1717_v20 = vpop.eup %1716  ;;  %1726 = vrcp.f32 %v510_v57  ;;  %v512_v63 = vadd.f32 1.0, %v1715_v58 }
  0x59   : > { %1534 = vmatprep.mubr.msk.bf16.mxu0 %vm780_vm0, %v622_v37  ;;  %v1719_v0 = vpop.eup %1718  ;;  %1728 = vrcp.f32 %v511_v38  ;;  %v513_v2 = vadd.f32 1.0, %v1717_v20 }
  0x5a   : > { %v1721_v3 = vpop.eup %1720  ;;  %1730 = vrcp.f32 %v512_v63  ;;  %v514_v39 = vadd.f32 1.0, %v1719_v0 }
  0x5b   : > { %1732 = vrcp.f32 %v513_v2  ;;  %v515_v51 = vadd.f32 1.0, %v1721_v3  ;;  %v1723_v6 = vpop.eup %1722 }
  0x5c   : > { %1734 = vrcp.f32 %v514_v39  ;;  %v604_v36 = vmul.f32 %v1723_v6, %v2009_v50 }
  0x5d   : > { %1736 = vrcp.f32 %v515_v51 }
  0x60   : > { %1535 = vmatmul.mubr.msk.bf16.gmra.mrb[20].mxu0 %vm780_vm0, %v623_v40  ;;  %v1725_v46 = vpop.eup %1724 }
  0x61   : > { %v605_v7 = vmul.f32 %v1725_v46, %v2042_v47 }
  0x62   : > { %v1727_v55 = vpop.eup %1726 }
  0x63   : > { %v1729_v11 = vpop.eup %1728  ;;  %v624_v12 = vpack.c.bf16 %v605_v7, %v604_v36  ;;  %v606_v13 = vmul.f32 %v1727_v55, %v2048_v61 }
  0x64   : > { %v1731_v16 = vpop.eup %1730  ;;  %v607_v18 = vmul.f32 %v1729_v11, %v2053_v1 }
  0x65   : > { %v1733_v24 = vpop.eup %1732  ;;  %1538 = vmatprep.mubr.msk.bf16.mxu0 %vm780_vm0, %v624_v12  ;;  %v608_v25 = vmul.f32 %v1731_v16, %v2059_v4 }
  0x66   : > { %v1735_v27 = vpop.eup %1734  ;;  %v625_v9 = vpack.c.bf16 %v607_v18, %v606_v13  ;;  %v609_v50 = vmul.f32 %v1733_v24, %v2063_v8 }
  0x67   : > { %v1737_v29 = vpop.eup %1736  ;;  %v610_v30 = vmul.f32 %v1735_v27, %v2067_v10 }
  0x68   : > { %1539 = vmatmul.mubr.msk.bf16.gmra.mrb[24].mxu0 %vm780_vm0, %v625_v9  ;;  %v626_v47 = vpack.c.bf16 %v609_v50, %v608_v25  ;;  %v611_v61 = vmul.f32 %v1737_v29, %v2073_v17 }
  0x6a   : > { %1542 = vmatprep.mubr.msk.bf16.mxu0 %vm780_vm0, %v626_v47  ;;  %v627_v1 = vpack.c.bf16 %v611_v61, %v610_v30 }
  0x70   : > { %1543 = vmatmul.mubr.msk.bf16.gmra.mrb[28].mxu0 %vm780_vm0, %v627_v1 }
  0xe9   : > { %v1476_v31 = vpop.f32.mrb[0].mxu1 }
  0xea   : > { %v863_v4 = vpop.f32.mrb[1].mxu1 }
  0xeb   : > { %v1477_v14 = vpop.f32.mrb[2].mxu1 }
  0xec   : > { %v866_v32 = vpop.f32.mrb[3].mxu1 }
  0xf1   : > { %v1480_v15 = vpop.f32.mrb[4].mxu1 }
  0xf2   : > { %v879_v8 = vpop.f32.mrb[5].mxu1 }
  0xf3   : > { %v1481_v34 = vpop.f32.mrb[6].mxu1 }
  0xf4   : > { %v882_v35 = vpop.f32.mrb[7].mxu1 }
  0xf9   : > { %v1484_v21 = vpop.f32.mrb[8].mxu1 }
  0xfa   : > { %v895_v42 = vpop.f32.mrb[9].mxu1 }
  0xfb   : > { %v1485_v28 = vpop.f32.mrb[10].mxu1 }
  0xfc   : > { %v898_v10 = vpop.f32.mrb[11].mxu1 }
 0x101   : > { %v1488_v33 = vpop.f32.mrb[12].mxu1 }
 0x102   : > { %v911_v17 = vpop.f32.mrb[13].mxu1 }
 0x103   : > { %v1489_v43 = vpop.f32.mrb[14].mxu1 }
 0x104   : > { %v914_v44 = vpop.f32.mrb[15].mxu1 }
 0x109   : > { %v1492_v41 = vpop.f32.mrb[16].mxu1 }
 0x10a   : > { %v1516_v45 = vpop.f32.mrb[0].mxu0  ;;  %v927_v49 = vpop.f32.mrb[17].mxu1 }
 0x10b   : > { %v1105_v59 = vadd.f32 %v1516_v45, %v1476_v31  ;;  %v1096_v52 = vpop.f32.mrb[1].mxu0  ;;  %v1493_v53 = vpop.f32.mrb[18].mxu1 }
 0x10c   : > { %v1097_v60 = vadd.f32 %v1096_v52, %v863_v4  ;;  %v1517_v22 = vpop.f32.mrb[2].mxu0  ;;  %v930_v37 = vpop.f32.mrb[19].mxu1 }
 0x10d   : > { %1225 = vst [vmem:[%s2116_s8 + $0x10] sm:$0xff] %v1105_v59  ;;  %v1108_v56 = vadd.f32 %v1517_v22, %v1477_v14  ;;  %v1099_v48 = vpop.f32.mrb[3].mxu0 }
 0x10e   : > { %1223 = vst [vmem:[%s2116_s8] sm:$0xff] %v1097_v60  ;;  %v1100_v23 = vadd.f32 %v1099_v48, %v866_v32 }
 0x10f   : > { %1226 = vst [vmem:[%s2116_s8 + $0x18] sm:$0xff] %v1108_v56 }
 0x110   : > { %1224 = vst [vmem:[%s2116_s8 + $0x8] sm:$0xff] %v1100_v23 }
 0x111   : > { %v1496_v26 = vpop.f32.mrb[20].mxu1 }
 0x112   : > { %v1520_v5 = vpop.f32.mrb[4].mxu0  ;;  %v943_v20 = vpop.f32.mrb[21].mxu1 }
 0x113   : > { %v1121_v54 = vadd.f32 %v1520_v5, %v1480_v15  ;;  %v1112_v19 = vpop.f32.mrb[5].mxu0  ;;  %v1497_v0 = vpop.f32.mrb[22].mxu1 }
 0x114   : > { %v1113_v57 = vadd.f32 %v1112_v19, %v879_v8  ;;  %v1521_v58 = vpop.f32.mrb[6].mxu0  ;;  %v946_v2 = vpop.f32.mrb[23].mxu1 }
 0x115   : > { %1229 = vst [vmem:[%s2116_s8 + $0x30] sm:$0xff] %v1121_v54  ;;  %v1124_v62 = vadd.f32 %v1521_v58, %v1481_v34  ;;  %v1115_v38 = vpop.f32.mrb[7].mxu0 }
 0x116   : > { %1227 = vst [vmem:[%s2116_s8 + $0x20] sm:$0xff] %v1113_v57  ;;  %v1116_v63 = vadd.f32 %v1115_v38, %v882_v35 }
 0x117   : > { %1230 = vst [vmem:[%s2116_s8 + $0x38] sm:$0xff] %v1124_v62 }
 0x118   : > { %1228 = vst [vmem:[%s2116_s8 + $0x28] sm:$0xff] %v1116_v63 }
 0x119   : > { %v1500_v36 = vpop.f32.mrb[24].mxu1 }
 0x11a   : > { %v1524_v3 = vpop.f32.mrb[8].mxu0  ;;  %v959_v55 = vpop.f32.mrb[25].mxu1 }
 0x11b   : > { %v1137_v39 = vadd.f32 %v1524_v3, %v1484_v21  ;;  %v1128_v40 = vpop.f32.mrb[9].mxu0  ;;  %v1501_v12 = vpop.f32.mrb[26].mxu1 }
 0x11c   : > { %v1129_v51 = vadd.f32 %v1128_v40, %v895_v42  ;;  %v1525_v6 = vpop.f32.mrb[10].mxu0  ;;  %v962_v13 = vpop.f32.mrb[27].mxu1 }
 0x11d   : > { %1233 = vst [vmem:[%s2116_s8 + $0x50] sm:$0xff] %v1137_v39  ;;  %v1140_v46 = vadd.f32 %v1525_v6, %v1485_v28  ;;  %v1131_v7 = vpop.f32.mrb[11].mxu0 }
 0x11e   : > { %1231 = vst [vmem:[%s2116_s8 + $0x40] sm:$0xff] %v1129_v51  ;;  %v1132_v11 = vadd.f32 %v1131_v7, %v898_v10 }
 0x11f   : > { %1234 = vst [vmem:[%s2116_s8 + $0x58] sm:$0xff] %v1140_v46 }
 0x120   : > { %1232 = vst [vmem:[%s2116_s8 + $0x48] sm:$0xff] %v1132_v11 }
 0x121   : > { %v1504_v25 = vpop.f32.mrb[28].mxu1 }
 0x122   : > { %v975_v50 = vpop.f32.mrb[29].mxu1 }
 0x123   : > { %v1528_v16 = vpop.f32.mrb[12].mxu0  ;;  %v1505_v30 = vpop.f32.mrb[30].mxu1 }
 0x124   : > { %v1153_v18 = vadd.f32 %v1528_v16, %v1488_v33  ;;  %v1144_v24 = vpop.f32.mrb[13].mxu0  ;;  %v978_v1 = vpop.f32.mrb[31].mxu1 }
 0x125   : > { %v1145_v27 = vadd.f32 %v1144_v24, %v911_v17  ;;  %v1529_v9 = vpop.f32.mrb[14].mxu0 }
 0x126   : > { %1237 = vst [vmem:[%s2116_s8 + $0x70] sm:$0xff] %v1153_v18  ;;  %v1156_v29 = vadd.f32 %v1529_v9, %v1489_v43  ;;  %v1147_v47 = vpop.f32.mrb[15].mxu0 }
 0x127   : > { %1235 = vst [vmem:[%s2116_s8 + $0x60] sm:$0xff] %v1145_v27  ;;  %v1148_v61 = vadd.f32 %v1147_v47, %v914_v44 }
 0x128   : > { %1238 = vst [vmem:[%s2116_s8 + $0x78] sm:$0xff] %v1156_v29 }
 0x129   : > { %1236 = vst [vmem:[%s2116_s8 + $0x68] sm:$0xff] %v1148_v61 }
 0x12b   : > { %v1532_v31 = vpop.f32.mrb[16].mxu0 }
 0x12c   : > { %v1169_v4 = vadd.f32 %v1532_v31, %v1492_v41  ;;  %v1160_v14 = vpop.f32.mrb[17].mxu0 }
 0x12d   : > { %v1161_v32 = vadd.f32 %v1160_v14, %v927_v49  ;;  %v1533_v15 = vpop.f32.mrb[18].mxu0 }
 0x12e   : > { %1241 = vst [vmem:[%s2116_s8 + $0x90] sm:$0xff] %v1169_v4  ;;  %v1172_v8 = vadd.f32 %v1533_v15, %v1493_v53  ;;  %v1163_v34 = vpop.f32.mrb[19].mxu0 }
 0x12f   : > { %1239 = vst [vmem:[%s2116_s8 + $0x80] sm:$0xff] %v1161_v32  ;;  %v1164_v35 = vadd.f32 %v1163_v34, %v930_v37 }
 0x130   : > { %1242 = vst [vmem:[%s2116_s8 + $0x98] sm:$0xff] %v1172_v8 }
 0x131   : > { %1240 = vst [vmem:[%s2116_s8 + $0x88] sm:$0xff] %v1164_v35 }
 0x133   : > { %v1536_v21 = vpop.f32.mrb[20].mxu0 }
 0x134   : > { %v1185_v42 = vadd.f32 %v1536_v21, %v1496_v26  ;;  %v1176_v28 = vpop.f32.mrb[21].mxu0 }
 0x135   : > { %v1177_v10 = vadd.f32 %v1176_v28, %v943_v20  ;;  %v1537_v33 = vpop.f32.mrb[22].mxu0 }
 0x136   : > { %1245 = vst [vmem:[%s2116_s8 + $0xb0] sm:$0xff] %v1185_v42  ;;  %v1188_v17 = vadd.f32 %v1537_v33, %v1497_v0  ;;  %v1179_v43 = vpop.f32.mrb[23].mxu0 }
 0x137   : > { %1243 = vst [vmem:[%s2116_s8 + $0xa0] sm:$0xff] %v1177_v10  ;;  %v1180_v44 = vadd.f32 %v1179_v43, %v946_v2 }
 0x138   : > { %1246 = vst [vmem:[%s2116_s8 + $0xb8] sm:$0xff] %v1188_v17 }
 0x139   : > { %1244 = vst [vmem:[%s2116_s8 + $0xa8] sm:$0xff] %v1180_v44 }
 0x13b   : > { %v1540_v45 = vpop.f32.mrb[24].mxu0 }
 0x13c   : > { %v1201_v59 = vadd.f32 %v1540_v45, %v1500_v36  ;;  %v1192_v52 = vpop.f32.mrb[25].mxu0 }
 0x13d   : > { %v1193_v60 = vadd.f32 %v1192_v52, %v959_v55  ;;  %v1541_v22 = vpop.f32.mrb[26].mxu0 }
 0x13e   : > { %1249 = vst [vmem:[%s2116_s8 + $0xd0] sm:$0xff] %v1201_v59  ;;  %v1204_v41 = vadd.f32 %v1541_v22, %v1501_v12  ;;  %v1195_v56 = vpop.f32.mrb[27].mxu0 }
 0x13f   : > { %1247 = vst [vmem:[%s2116_s8 + $0xc0] sm:$0xff] %v1193_v60  ;;  %v1196_v48 = vadd.f32 %v1195_v56, %v962_v13 }
 0x140   : > { %1250 = vst [vmem:[%s2116_s8 + $0xd8] sm:$0xff] %v1204_v41 }
 0x141   : > { %1248 = vst [vmem:[%s2116_s8 + $0xc8] sm:$0xff] %v1196_v48 }
 0x143   : > { %v1544_v49 = vpop.f32.mrb[28].mxu0 }
 0x144   : > { %v1217_v23 = vadd.f32 %v1544_v49, %v1504_v25  ;;  %v1208_v53 = vpop.f32.mrb[29].mxu0 }
 0x145   : > { %v1209_v37 = vadd.f32 %v1208_v53, %v975_v50  ;;  %v1545_v5 = vpop.f32.mrb[30].mxu0 }
 0x146   : > { %1253 = vst [vmem:[%s2116_s8 + $0xf0] sm:$0xff] %v1217_v23  ;;  %v1220_v54 = vadd.f32 %v1545_v5, %v1505_v30  ;;  %v1211_v19 = vpop.f32.mrb[31].mxu0 }
 0x147   : > { %1251 = vst [vmem:[%s2116_s8 + $0xe0] sm:$0xff] %v1209_v37  ;;  %v1212_v57 = vadd.f32 %v1211_v19, %v978_v1 }
 0x148   : > { %1254 = vst [vmem:[%s2116_s8 + $0xf8] sm:$0xff] %v1220_v54 }
 0x149   : > { %1252 = vst [vmem:[%s2116_s8 + $0xe8] sm:$0xff] %v1212_v57 }
 0x14a PF: > { %s16_s21 = sadd.s32 1, %s1744_s21  }
 0x14b   : > { %p13_p4 = scmp.ge.s32.totalorder %s16_s21, 4  }
 0x14d   :  { %15 = sbr.rel (!%p13_p4) target bundleno = 1 (0x1), region = 77 }

// kernel: cot_attention_2d.5
= control target key start
LH: loop header
LB: loop body
LE: loop exit
PB: predicated region body
PF: predicated region fallthrough
CT: control target
= control target key end

     0   :  { %15 = vsyncpa [#allocation3], 0  ;;  %s4095_s0 = inlined_call_operand.vmem [shape: f32[2,256,128], index: 0, kind: input, shape index: {}]   ;;  %s4096_s1 = inlined_call_operand.vmem [shape: f32[2,256,64], index: 1, kind: input, shape index: {}]   ;;  %s4097_s2 = inlined_call_operand.vmem [shape: bf16[32,64], index: 2, kind: input, shape index: {}]   ;;  %s4098_s3 = inlined_call_operand.vmem [shape: f32[1,64], index: 3, kind: input, shape index: {}]   ;;  %s4099_s4 = inlined_call_operand.vmem [shape: f32[1,32], index: 4, kind: input, shape index: {}]   ;;  %s4100_s5 = inlined_call_operand.vmem [shape: f32[1,32], index: 5, kind: input, shape index: {}]   ;;  %s4101_s6 = inlined_call_operand.vmem [shape: f32[1,64], index: 6, kind: input, shape index: {}]   ;;  %s4102_s7 = inlined_call_operand.vmem [shape: f32[1,64], index: 7, kind: input, shape index: {}]   ;;  %s4103_s8 = inlined_call_operand.vmem [shape: f32[1,64], index: 8, kind: input, shape index: {}]   ;;  %s4104_s9 = inlined_call_operand.vmem [shape: f32[1,64], index: 9, kind: input, shape index: {}]   ;;  %s4105_s10 = inlined_call_operand.hbm [shape: f32[2,256,64], index: 10, kind: output, shape index: {}]  }
   0x1   :  { %17 = vsyncpa [#allocation3 + $0x1], 0  ;;  %s2563_s13 = smov 0   ;;  %s2565_s14 = smov 0  }
   0x2   :  { %s2567_s15 = smov 0   ;;  %s2569_s16 = smov 0  }
   0x3 LB: > { %s2584_s17 = sadd.s32 4294967295, %s2502_s16   ;;  %s1878_s18 = sadd.s32 4294967294, %s2502_s16   ;;  %s2502_s16 = sphi %s2569_s16, %s4382_s16   ;;  %s2498_s15 = sphi %s2567_s15, %s4381_s15   ;;  %s2494_s14 = sphi %s2565_s14, %s4380_s14   ;;  %s2490_s13 = sphi %s2563_s13, %s4379_s13  }
   0x4   : > { %s2588_s19 = sadd.s32 1, %s2502_s16   ;;  %s250_s20 = sadd.s32 1, %s2498_s15 }
   0x5   : > { %s247_s21 = ssub.s32 %s2502_s16, %s2588_s19  ;;  %p260_p0 = scmp.ne.s32.totalorder %s2498_s15, %s2494_s14 }
   0x6   : > { %p248_p1 = scmp.eq.s32.totalorder %s247_s21, 0  ;;  %p261_p2 = scmp.eq.s32.totalorder %s2584_s17, 1 }
   0x7   : > { %p266_p3 = scmp.ne.s32.totalorder %s2494_s14, %s2490_s13  ;;  %p267_p4 = scmp.eq.s32.totalorder %s1878_s18, 1 }
   0x8   : > { %s2599_s22 = scalar_select %p248_p1, %s2498_s15, %s250_s20  }
   0x9   : > { %p2601_p5 = por %p261_p2, %p260_p0  ;;  %p2605_p6 = por %p267_p4, %p266_p3 }
   0xa   : > { %p1881_p7 = scmp.ge.s32.totalorder %s2502_s16, 1  ;;  %p325_p8 = scmp.lt.s32.totalorder %s2502_s16, 3 }
   0xc   : > { %p326_p9 = pnand %p1881_p7, %p325_p8 }
   0xe   : > { %329 = sbr.rel (%p326_p9) target bundleno = 756 (0x2f4), region = 60 }
  0x15   : > { %v1889_v0 = vld [vmem:[%s4099_s4] ss:$0 sm:$0xff]  ;;  %s2504_s27 = smov 64   ;;  %p368_p10 = scmp.lt.s32.totalorder %s2584_s17, 1  ;;  %vm882_vm0 = vcmask 261120   ;;  %vm1092_vm1 = vcmask 523264  }
  0x16   : > { %495 = vrot.lane.b32.xlu0 %v1889_v0, %s2504_s27  ;;  %v1890_v1 = vld [vmem:[%s4100_s5] ss:$0 sm:$0xff]  ;;  %s2505_s29 = smov [#allocation2]  }
  0x17   : > { %v2084_v2 = vld [vmem:[%s4097_s2] sm:$0xff]   ;;  %s2624_s12 = scalar_select %p368_p10, %s2584_s17, 1 }
  0x18   : > { %2002 = vmatprep.subr.bf16.mxu0 %v2084_v2  ;;  %2038 = vmatprep.subr.bf16.mxu1 %v2084_v2  ;;  %s2444_s30 = sshll.u32 %s2505_s29, 4  ;;  %s2445_s30 = int_to_ptr.vmem [resolvable:$false] %s2444_s30 }
  0x19   : > { %2003 = vmatpush3.bf16.msra.mxu0 %v2084_v2  ;;  %2040 = vmatpush3.bf16.msra.mxu1 %v2084_v2  ;;  %s1981_s18 = sshll.u32 %s2624_s12, 8  ;;  %s1983_s12 = sshll.u32 %s2584_s17, 12 }
  0x1a   : > { %536 = vrot.lane.b32.xlu0 %v1890_v1, %s2504_s27  ;;  %s2632_s25 = scalar_lea.vmem %s4095_s0, %s1981_s18  ;;  %s3008_s20 = scalar_lea.vmem %s4096_s1, %s1981_s18 }
  0x1b   : > { %v383_v3 = vld [vmem:[%s2632_s25 + $0x20] sm:$0xff]  ;;  %v384_v5 = vld [vmem:[%s2632_s25 + $0x28] sm:$0xff]  ;;  %v385_v8 = vld [vmem:[%s2632_s25 + $0x30] sm:$0xff]  ;;  %s4020_s26 = scalar_lea.hbm %s4105_s10, %s1983_s12 }
  0x1c   : > { %v379_v6 = vld [vmem:[%s2632_s25] sm:$0xff]  ;;  %v380_v7 = vld [vmem:[%s2632_s25 + $0x8] sm:$0xff]  ;;  %v386_v9 = vld [vmem:[%s2632_s25 + $0x38] sm:$0xff] }
  0x1d   : > { %v381_v10 = vld [vmem:[%s2632_s25 + $0x10] sm:$0xff]  ;;  %v382_v15 = vld [vmem:[%s2632_s25 + $0x18] sm:$0xff]  ;;  %v387_v16 = vld [vmem:[%s2632_s25 + $0x40] sm:$0xff] }
  0x1e   : > { %v388_v25 = vld [vmem:[%s2632_s25 + $0x48] sm:$0xff]  ;;  %v395_v30 = vld [vmem:[%s2632_s25 + $0x80] sm:$0xff]  ;;  %v389_v39 = vld [vmem:[%s2632_s25 + $0x50] sm:$0xff] }
  0x1f   : > { %v396_v31 = vld [vmem:[%s2632_s25 + $0x88] sm:$0xff]  ;;  %v390_v55 = vld [vmem:[%s2632_s25 + $0x58] sm:$0xff]  ;;  %v397_v57 = vld [vmem:[%s2632_s25 + $0x90] sm:$0xff] }
  0x20   : > { %v398_v61 = vld [vmem:[%s2632_s25 + $0x98] sm:$0xff] }
  0x88   : > { %v2635_v4 = vpop.permute.xlu0 %495 }
  0x89   : > { %v502_v11 = vmul.f32 %v2635_v4, %v383_v3  ;;  %v503_v12 = vmul.f32 %v2635_v4, %v384_v5  ;;  %v498_v13 = vmul.f32 %v2635_v4, %v379_v6  ;;  %v499_v14 = vmul.f32 %v2635_v4, %v380_v7 }
  0x8a   : > { %v504_v18 = vmul.f32 %v2635_v4, %v385_v8  ;;  %v505_v19 = vmul.f32 %v2635_v4, %v386_v9  ;;  %v500_v20 = vmul.f32 %v2635_v4, %v381_v10  ;;  %v501_v28 = vmul.f32 %v2635_v4, %v382_v15  ;;  %v391_v9 = vld [vmem:[%s2632_s25 + $0x60] sm:$0xff] }
  0x8b   : > { %v506_v29 = vmul.f32 %v2635_v4, %v387_v16  ;;  %v507_v38 = vmul.f32 %v2635_v4, %v388_v25  ;;  %v514_v42 = vmul.f32 %v2635_v4, %v395_v30  ;;  %v515_v45 = vmul.f32 %v2635_v4, %v396_v31  ;;  %v393_v30 = vld [vmem:[%s2632_s25 + $0x70] sm:$0xff] }
  0x8c   : > { %v2649_v17 = vpop.permute.xlu0 %536  ;;  %v508_v48 = vmul.f32 %v2635_v4, %v389_v39  ;;  %v509_v59 = vmul.f32 %v2635_v4, %v390_v55  ;;  %v516_v62 = vmul.f32 %v2635_v4, %v397_v57  ;;  %v517_v8 = vmul.f32 %v2635_v4, %v398_v61 }
  0x8d   : > { %v2655_v21 = vadd.f32 %v2649_v17, %v502_v11  ;;  %v2658_v22 = vadd.f32 %v2649_v17, %v503_v12  ;;  %v2661_v23 = vadd.f32 %v2649_v17, %v498_v13  ;;  %v2664_v24 = vadd.f32 %v2649_v17, %v499_v14  ;;  %v392_v12 = vld [vmem:[%s2632_s25 + $0x68] sm:$0xff]  ;;  %v399_v13 = vld [vmem:[%s2632_s25 + $0xa0] sm:$0xff] }
  0x8e   : > { %v2668_v26 = vadd.f32 %v2649_v17, %v504_v18  ;;  %v2671_v27 = vadd.f32 %v2649_v17, %v505_v19  ;;  %v2681_v35 = vadd.f32 %v2649_v17, %v500_v20  ;;  %v2685_v37 = vadd.f32 %v2649_v17, %v501_v28  ;;  %v400_v19 = vld [vmem:[%s2632_s25 + $0xa8] sm:$0xff] }
  0x8f   : > { %v1895_v32 = vmul.f32 -1.442695, %v2655_v21  ;;  %v1896_v33 = vmul.f32 -1.442695, %v2658_v22  ;;  %v1891_v34 = vmul.f32 -1.442695, %v2661_v23  ;;  %v2691_v41 = vadd.f32 %v2649_v17, %v506_v29 }
  0x90   : > { %v1892_v36 = vmul.f32 -1.442695, %v2664_v24  ;;  %v1897_v40 = vmul.f32 -1.442695, %v2668_v26  ;;  %v1898_v43 = vmul.f32 -1.442695, %v2671_v27  ;;  %v2696_v44 = vadd.f32 %v2649_v17, %v507_v38 }
  0x91   : > { %2086 = vpow2.f32 %v1895_v32  ;;  %v1893_v46 = vmul.f32 -1.442695, %v2681_v35  ;;  %v2701_v47 = vadd.f32 %v2649_v17, %v514_v42  ;;  %v1894_v49 = vmul.f32 -1.442695, %v2685_v37  ;;  %v2085_v38 = vld [vmem:[%s4097_s2 + $0x8] sm:$0xff]  }
  0x92   : > { %2088 = vpow2.f32 %v1896_v33  ;;  %v2706_v50 = vadd.f32 %v2649_v17, %v515_v45  ;;  %v1899_v51 = vmul.f32 -1.442695, %v2691_v41  ;;  %v2710_v52 = vadd.f32 %v2649_v17, %v508_v48  ;;  %2004 = vmatprep.subr.bf16.mxu0 %v2085_v38  ;;  %2039 = vmatprep.subr.bf16.mxu1 %v2085_v38 }
  0x93   : > { %2090 = vpow2.f32 %v1891_v34  ;;  %v1900_v53 = vmul.f32 -1.442695, %v2696_v44  ;;  %v1907_v54 = vmul.f32 -1.442695, %v2701_v47  ;;  %v2722_v1 = vadd.f32 %v2649_v17, %v509_v59  ;;  %2005 = vmatpush3.bf16.msra.mxu0 %v2085_v38  ;;  %2041 = vmatpush3.bf16.msra.mxu1 %v2085_v38 }
  0x94   : > { %2092 = vpow2.f32 %v1892_v36  ;;  %v1908_v56 = vmul.f32 -1.442695, %v2706_v50  ;;  %v1901_v58 = vmul.f32 -1.442695, %v2710_v52  ;;  %v2725_v5 = vadd.f32 %v2649_v17, %v516_v62  ;;  %v394_v36 = vld [vmem:[%s2632_s25 + $0x78] sm:$0xff] }
  0x95   : > { %2094 = vpow2.f32 %v1897_v40  ;;  %v1902_v16 = vmul.f32 -1.442695, %v2722_v1  ;;  %v2733_v18 = vadd.f32 %v2649_v17, %v517_v8  ;;  %v510_v29 = vmul.f32 %v2635_v4, %v391_v9  ;;  %v402_v8 = vld [vmem:[%s2632_s25 + $0xb8] sm:$0xff] }
  0x96   : > { %2096 = vpow2.f32 %v1898_v43  ;;  %v2737_v28 = vmul.f32 -1.442695, %v2725_v5  ;;  %v511_v33 = vmul.f32 %v2635_v4, %v392_v12  ;;  %v518_v34 = vmul.f32 %v2635_v4, %v399_v13  ;;  %v407_v13 = vld [vmem:[%s2632_s25 + $0xe0] sm:$0xff] }
  0x97   : > { %2098 = vpow2.f32 %v1893_v46  ;;  %v2748_v42 = vadd.f32 %v2649_v17, %v510_v29  ;;  %v519_v43 = vmul.f32 %v2635_v4, %v400_v19  ;;  %v513_v55 = vmul.f32 %v2635_v4, %v394_v36 }
  0x98   : > { %2100 = vpow2.f32 %v1894_v49  ;;  %v2752_v48 = vadd.f32 %v2649_v17, %v511_v33  ;;  %v512_v49 = vmul.f32 %v2635_v4, %v393_v30 }
  0x99   : > { %2102 = vpow2.f32 %v1899_v51 }
  0x9a   : > { %2104 = vpow2.f32 %v1900_v53  ;;  %v2763_v59 = vadd.f32 %v2649_v17, %v512_v49 }
  0x9b   : > { %v2087_v60 = vpop.eup %2086  ;;  %2106 = vpow2.f32 %v1907_v54  ;;  %v2756_v54 = vadd.f32 %v2649_v17, %v518_v34 }
  0x9c   : > { %v2089_v63 = vpop.eup %2088  ;;  %v671_v0 = vadd.f32 1.0, %v2087_v60  ;;  %2108 = vpow2.f32 %v1908_v56  ;;  %v401_v60 = vld [vmem:[%s2632_s25 + $0xb0] sm:$0xff] }
  0x9d   : > { %v2091_v2 = vpop.eup %2090  ;;  %v672_v3 = vadd.f32 1.0, %v2089_v63  ;;  %2110 = vpow2.f32 %v1901_v58  ;;  %v2760_v58 = vadd.f32 %v2649_v17, %v519_v43  ;;  %v1910_v63 = vmul.f32 -1.442695, %v2733_v18 }
  0x9e   : > { %v2093_v6 = vpop.eup %2092  ;;  %2112 = vrcp.f32 %v671_v0  ;;  %v667_v7 = vadd.f32 1.0, %v2091_v2  ;;  %v1903_v0 = vmul.f32 -1.442695, %v2748_v42  ;;  %v520_v12 = vmul.f32 %v2635_v4, %v401_v60 }
  0x9f   : > { %v2095_v10 = vpop.eup %2094  ;;  %2114 = vrcp.f32 %v672_v3  ;;  %v668_v11 = vadd.f32 1.0, %v2093_v6  ;;  %v1904_v6 = vmul.f32 -1.442695, %v2752_v48  ;;  %v1912_v19 = vmul.f32 -1.442695, %v2760_v58 }
  0xa0   : > { %v2097_v14 = vpop.eup %2096  ;;  %2116 = vrcp.f32 %v667_v7  ;;  %v673_v15 = vadd.f32 1.0, %v2095_v10  ;;  %v2770_v7 = vadd.f32 %v2649_v17, %v513_v55 }
  0xa1   : > { %v2099_v20 = vpop.eup %2098  ;;  %2118 = vrcp.f32 %v668_v11  ;;  %v674_v25 = vadd.f32 1.0, %v2097_v14  ;;  %v1911_v11 = vmul.f32 -1.442695, %v2756_v54 }
  0xa2   : > { %v2101_v31 = vpop.eup %2100  ;;  %2120 = vrcp.f32 %v673_v15  ;;  %v669_v32 = vadd.f32 1.0, %v2099_v20  ;;  %v1905_v20 = vmul.f32 -1.442695, %v2763_v59 }
  0xa3   : > { %v2103_v39 = vpop.eup %2102  ;;  %2122 = vrcp.f32 %v674_v25  ;;  %v670_v40 = vadd.f32 1.0, %v2101_v31  ;;  %v408_v25 = vld [vmem:[%s2632_s25 + $0xe8] sm:$0xff]  ;;  %v2784_v31 = vadd.f32 %v2649_v17, %v520_v12 }
  0xa4   : > { %v2105_v45 = vpop.eup %2104  ;;  %2124 = vrcp.f32 %v669_v32  ;;  %v675_v46 = vadd.f32 1.0, %v2103_v39  ;;  %v527_v38 = vmul.f32 %v2635_v4, %v408_v25 }
  0xa5   : > { %v2107_v51 = vpop.eup %2106  ;;  %2126 = vrcp.f32 %v670_v40  ;;  %v676_v53 = vadd.f32 1.0, %v2105_v45 }
  0xa6   : > { %v2109_v56 = vpop.eup %2108  ;;  %2128 = vrcp.f32 %v675_v46  ;;  %v683_v57 = vadd.f32 1.0, %v2107_v51  ;;  %v1913_v46 = vmul.f32 -1.442695, %v2784_v31 }
  0xa7   : > { %v2111_v61 = vpop.eup %2110  ;;  %2130 = vrcp.f32 %v676_v53  ;;  %v684_v62 = vadd.f32 1.0, %v2109_v56 }
  0xa8   : > { %v2113_v2 = vpop.eup %2112  ;;  %2132 = vrcp.f32 %v683_v57  ;;  %v677_v3 = vadd.f32 1.0, %v2111_v61 }
  0xa9   : > { %v2115_v9 = vpop.eup %2114  ;;  %v767_v10 = vmul.f32 %v2113_v2, %v2655_v21  ;;  %2134 = vrcp.f32 %v684_v62  ;;  %v521_v21 = vmul.f32 %v2635_v4, %v402_v8 }
  0xaa   : > { %v2117_v14 = vpop.eup %2116  ;;  %v768_v15 = vmul.f32 %v2115_v9, %v2658_v22  ;;  %2136 = vpow2.f32 %v1902_v16  ;;  %v526_v22 = vmul.f32 %v2635_v4, %v407_v13  ;;  %v404_v13 = vld [vmem:[%s2632_s25 + $0xc8] sm:$0xff] }
  0xab   : > { %v2119_v29 = vpop.eup %2118  ;;  %v763_v30 = vmul.f32 %v2117_v14, %v2661_v23  ;;  %2138 = vrcp.f32 %v677_v3  ;;  %v2791_v23 = vadd.f32 %v2649_v17, %v521_v21  ;;  %v406_v21 = vld [vmem:[%s2632_s25 + $0xd8] sm:$0xff] }
  0xac   : > { %v2121_v32 = vpop.eup %2120  ;;  %v797_v33 = vpack.c.bf16 %v768_v15, %v767_v10  ;;  %v764_v34 = vmul.f32 %v2119_v29, %v2664_v24  ;;  %2140 = vpow2.f32 %v2737_v28  ;;  %v2797_v24 = vadd.f32 %v2649_v17, %v526_v22 }
  0xad   : > { %v2123_v16 = vpop.eup %2122  ;;  %v769_v36 = vmul.f32 %v2121_v32, %v2668_v26  ;;  %2142 = vpow2.f32 %v1910_v63  ;;  %v1906_v26 = vmul.f32 -1.442695, %v2770_v7 }
  0xae   : > { %v2125_v39 = vpop.eup %2124  ;;  %842 = vrot.lane.b32.xlu0 %v797_v33, %s2504_s27  ;;  %v795_v40 = vpack.c.bf16 %v764_v34, %v763_v30  ;;  %v770_v43 = vmul.f32 %v2123_v16, %v2671_v27  ;;  %2144 = vpow2.f32 %v1903_v0  ;;  %v2805_v27 = vadd.f32 %v2649_v17, %v527_v38  ;;  %v409_v38 = vld [vmem:[%s2632_s25 + $0xf0] sm:$0xff] }
  0xaf   : > { %v2127_v28 = vpop.eup %2126  ;;  %v765_v45 = vmul.f32 %v2125_v39, %v2681_v35  ;;  %2146 = vpow2.f32 %v1904_v6  ;;  %v1914_v35 = vmul.f32 -1.442695, %v2791_v23  ;;  %v523_v34 = vmul.f32 %v2635_v4, %v404_v13 }
  0xb0   : > { %v2129_v49 = vpop.eup %2128  ;;  %838 = vrot.lane.b32.xlu1 %v795_v40, %s2504_s27  ;;  %v798_v51 = vpack.c.bf16 %v770_v43, %v769_v36  ;;  %v766_v53 = vmul.f32 %v2127_v28, %v2685_v37  ;;  %2148 = vpow2.f32 %v1911_v11  ;;  %v1919_v37 = vmul.f32 -1.442695, %v2797_v24 }
  0xb1   : > { %v2131_v55 = vpop.eup %2130  ;;  %v771_v56 = vmul.f32 %v2129_v49, %v2691_v41  ;;  %2150 = vpow2.f32 %v1912_v19  ;;  %v1920_v3 = vmul.f32 -1.442695, %v2805_v27  ;;  %v2830_v43 = vadd.f32 %v2649_v17, %v523_v34 }
  0xb2   : > { %v2133_v57 = vpop.eup %2132  ;;  %844 = vrot.lane.b32.xlu0 %v798_v51, %s2504_s27  ;;  %v796_v60 = vpack.c.bf16 %v766_v53, %v765_v45  ;;  %v772_v61 = vmul.f32 %v2131_v55, %v2696_v44  ;;  %2152 = vpow2.f32 %v1905_v20  ;;  %v403_v44 = vld [vmem:[%s2632_s25 + $0xc0] sm:$0xff]  ;;  %v405_v20 = vld [vmem:[%s2632_s25 + $0xd0] sm:$0xff]  ;;  %v525_v28 = vmul.f32 %v2635_v4, %v406_v21  ;;  %v410_v45 = vld [vmem:[%s2632_s25 + $0xf8] sm:$0xff] }
  0xb3   : > { %v2135_v62 = vpop.eup %2134  ;;  %v779_v63 = vmul.f32 %v2133_v57, %v2701_v47  ;;  %2154 = vpow2.f32 %v1906_v26  ;;  %v522_v14 = vmul.f32 %v2635_v4, %v403_v44  ;;  %v524_v36 = vmul.f32 %v2635_v4, %v405_v20 }
  0xb4   : > { %v2137_v0 = vpop.eup %2136  ;;  %840 = vrot.lane.b32.xlu1 %v796_v60, %s2504_s27  ;;  %v799_v41 = vpack.c.bf16 %v772_v61, %v771_v56  ;;  %v780_v2 = vmul.f32 %v2135_v62, %v2706_v50  ;;  %2156 = vpow2.f32 %v1913_v46  ;;  %v2839_v56 = vadd.f32 %v2649_v17, %v525_v28 }
  0xb5   : > { %v2139_v6 = vpop.eup %2138  ;;  %v678_v8 = vadd.f32 1.0, %v2137_v0  ;;  %2158 = vpow2.f32 %v1914_v35  ;;  %v2823_v30 = vadd.f32 %v2649_v17, %v522_v14  ;;  %v2836_v51 = vadd.f32 %v2649_v17, %v524_v36 }
  0xb6   : > { %v2141_v9 = vpop.eup %2140  ;;  %846 = vrot.lane.b32.xlu0 %v799_v41, %s2504_s27  ;;  %v803_v47 = vpack.c.bf16 %v780_v2, %v779_v63  ;;  %2160 = vpow2.f32 %v1919_v37  ;;  %v528_v35 = vmul.f32 %v2635_v4, %v409_v38  ;;  %v773_v60 = vmul.f32 %v2139_v6, %v2710_v52 }
  0xb7   : > { %v2143_v10 = vpop.eup %2142  ;;  %2162 = vrcp.f32 %v678_v8  ;;  %v685_v11 = vadd.f32 1.0, %v2141_v9  ;;  %v1915_v49 = vmul.f32 -1.442695, %v2823_v30  ;;  %v529_v37 = vmul.f32 %v2635_v4, %v410_v45 }
  0xb8   : > { %v2145_v12 = vpop.eup %2144  ;;  %854 = vrot.lane.b32.xlu1 %v803_v47, %s2504_s27  ;;  %v686_v50 = vadd.f32 1.0, %v2143_v10  ;;  %2164 = vpow2.f32 %v1920_v3  ;;  %v2845_v0 = vadd.f32 %v2649_v17, %v528_v35  ;;  %v1916_v3 = vmul.f32 -1.442695, %v2830_v43 }
  0xb9   : > { %v2147_v15 = vpop.eup %2146  ;;  %2166 = vrcp.f32 %v685_v11  ;;  %v679_v19 = vadd.f32 1.0, %v2145_v12  ;;  %v2850_v8 = vadd.f32 %v2649_v17, %v529_v37  ;;  %v1917_v4 = vmul.f32 -1.442695, %v2836_v51 }
  0xba   : > { %v2149_v25 = vpop.eup %2148  ;;  %2168 = vrcp.f32 %v686_v50  ;;  %v680_v29 = vadd.f32 1.0, %v2147_v15  ;;  %v1918_v10 = vmul.f32 -1.442695, %v2839_v56  ;;  %v1921_v12 = vmul.f32 -1.442695, %v2845_v0 }
  0xbb   : > { %v2151_v32 = vpop.eup %2150  ;;  %2170 = vrcp.f32 %v679_v19  ;;  %v687_v33 = vadd.f32 1.0, %v2149_v25  ;;  %v1922_v13 = vmul.f32 -1.442695, %v2850_v8 }
  0xbc   : > { %v2153_v22 = vpop.eup %2152  ;;  %2172 = vrcp.f32 %v680_v29  ;;  %v688_v16 = vadd.f32 1.0, %v2151_v32 }
  0xbd   : > { %v2155_v39 = vpop.eup %2154  ;;  %2174 = vrcp.f32 %v687_v33  ;;  %v681_v40 = vadd.f32 1.0, %v2153_v22 }
  0xbe   : > { %v2157_v26 = vpop.eup %2156  ;;  %2176 = vrcp.f32 %v688_v16  ;;  %v682_v46 = vadd.f32 1.0, %v2155_v39 }
  0xbf   : > { %v2159_v53 = vpop.eup %2158  ;;  %2178 = vrcp.f32 %v681_v40  ;;  %v689_v55 = vadd.f32 1.0, %v2157_v26 }
  0xc0   : > { %v2161_v57 = vpop.eup %2160  ;;  %2180 = vrcp.f32 %v682_v46  ;;  %v690_v61 = vadd.f32 1.0, %v2159_v53 }
  0xc1   : > { %v2163_v62 = vpop.eup %2162  ;;  %2182 = vrcp.f32 %v689_v55  ;;  %v695_v63 = vadd.f32 1.0, %v2161_v57 }
  0xc2   : > { %v2165_v41 = vpop.eup %2164  ;;  %v774_v2 = vmul.f32 %v2163_v62, %v2722_v1  ;;  %2184 = vrcp.f32 %v690_v61 }
  0xc3   : > { %v2167_v52 = vpop.eup %2166  ;;  %v696_v6 = vadd.f32 1.0, %v2165_v41  ;;  %2186 = vrcp.f32 %v695_v63 }
  0xc4   : > { %v2169_v44 = vpop.eup %2168  ;;  %v800_v9 = vpack.c.bf16 %v774_v2, %v773_v60  ;;  %v781_v47 = vmul.f32 %v2167_v52, %v2725_v5  ;;  %2188 = vpow2.f32 %v1915_v49 }
  0xc5   : > { %v2171_v11 = vpop.eup %2170  ;;  %v782_v1 = vmul.f32 %v2169_v44, %v2733_v18  ;;  %2190 = vrcp.f32 %v696_v6 }
  0xc6   : > { %v2173_v17 = vpop.eup %2172  ;;  %848 = vrot.lane.b32.xlu0 %v800_v9, %s2504_s27  ;;  %v775_v50 = vmul.f32 %v2171_v11, %v2748_v42  ;;  %2192 = vpow2.f32 %v1916_v3 }
  0xc7   : > { %v2175_v14 = vpop.eup %2174  ;;  %v804_v15 = vpack.c.bf16 %v782_v1, %v781_v47  ;;  %v776_v5 = vmul.f32 %v2173_v17, %v2752_v48  ;;  %2194 = vpow2.f32 %v1917_v4 }
  0xc8   : > { %v2177_v19 = vpop.eup %2176  ;;  %v783_v20 = vmul.f32 %v2175_v14, %v2756_v54  ;;  %2196 = vpow2.f32 %v1918_v10 }
  0xc9   : > { %v2179_v18 = vpop.eup %2178  ;;  %856 = vrot.lane.b32.xlu1 %v804_v15, %s2504_s27  ;;  %v801_v25 = vpack.c.bf16 %v776_v5, %v775_v50  ;;  %v784_v29 = vmul.f32 %v2177_v19, %v2760_v58  ;;  %2198 = vpow2.f32 %v1921_v12 }
  0xca   : > { %v2181_v42 = vpop.eup %2180  ;;  %v777_v21 = vmul.f32 %v2179_v18, %v2763_v59  ;;  %2200 = vpow2.f32 %v1922_v13 }
  0xcb   : > { %v2183_v32 = vpop.eup %2182  ;;  %850 = vrot.lane.b32.xlu0 %v801_v25, %s2504_s27  ;;  %v805_v48 = vpack.c.bf16 %v784_v29, %v783_v20  ;;  %v778_v33 = vmul.f32 %v2181_v42, %v2770_v7  ;;  %v2903_v29 = vld [vmem:[%s4098_s3] ss:$0 sm:$0xff] }
  0xcc   : > { %v2185_v34 = vpop.eup %2184  ;;  %v785_v54 = vmul.f32 %v2183_v32, %v2784_v31 }
  0xcd   : > { %v2187_v22 = vpop.eup %2186  ;;  %858 = vrot.lane.b32.xlu1 %v805_v48, %s2504_s27  ;;  %v802_v16 = vpack.c.bf16 %v778_v33, %v777_v21  ;;  %v786_v58 = vmul.f32 %v2185_v34, %v2791_v23 }
  0xce   : > { %v2189_v36 = vpop.eup %2188  ;;  %v791_v38 = vmul.f32 %v2187_v22, %v2797_v24 }
  0xcf   : > { %v2191_v59 = vpop.eup %2190  ;;  %852 = vrot.lane.b32.xlu0 %v802_v16, %s2504_s27  ;;  %v806_v39 = vpack.c.bf16 %v786_v58, %v785_v54  ;;  %v691_v40 = vadd.f32 1.0, %v2189_v36 }
  0xd0   : > { %v2193_v28 = vpop.eup %2192  ;;  %v792_v7 = vmul.f32 %v2191_v59, %v2805_v27 }
  0xd1   : > { %v2195_v45 = vpop.eup %2194  ;;  %860 = vrot.lane.b32.xlu1 %v806_v39, %s2504_s27  ;;  %v692_v31 = vadd.f32 1.0, %v2193_v28  ;;  %2202 = vrcp.f32 %v691_v40 }
  0xd2   : > { %v2197_v26 = vpop.eup %2196  ;;  %v809_v46 = vpack.c.bf16 %v792_v7, %v791_v38  ;;  %v693_v49 = vadd.f32 1.0, %v2195_v45 }
  0xd3   : > { %v2199_v23 = vpop.eup %2198  ;;  %2204 = vrcp.f32 %v692_v31  ;;  %v694_v53 = vadd.f32 1.0, %v2197_v26 }
  0xd4   : > { %v2201_v24 = vpop.eup %2200  ;;  %866 = vrot.lane.b32.xlu0 %v809_v46, %s2504_s27  ;;  %2206 = vrcp.f32 %v693_v49  ;;  %v697_v55 = vadd.f32 1.0, %v2199_v23 }
  0xd5   : > { %2208 = vrcp.f32 %v694_v53  ;;  %v698_v35 = vadd.f32 1.0, %v2201_v24 }
  0xd6   : > { %2210 = vrcp.f32 %v697_v55 }
  0xd7   : > { %2212 = vrcp.f32 %v698_v35 }
  0xdb   : > { %v2203_v27 = vpop.eup %2202 }
  0xdc   : > { %v787_v57 = vmul.f32 %v2203_v27, %v2823_v30 }
  0xdd   : > { %v2205_v60 = vpop.eup %2204 }
  0xde   : > { %v2207_v61 = vpop.eup %2206  ;;  %v788_v37 = vmul.f32 %v2205_v60, %v2830_v43 }
  0xdf   : > { %v2209_v62 = vpop.eup %2208  ;;  %v789_v2 = vmul.f32 %v2207_v61, %v2836_v51 }
  0xe0   : > { %v2211_v63 = vpop.eup %2210  ;;  %v807_v41 = vpack.c.bf16 %v788_v37, %v787_v57  ;;  %v790_v3 = vmul.f32 %v2209_v62, %v2839_v56 }
  0xe1   : > { %v2213_v52 = vpop.eup %2212  ;;  %v793_v4 = vmul.f32 %v2211_v63, %v2845_v0 }
  0xe2   : > { %862 = vrot.lane.b32.xlu1 %v807_v41, %s2504_s27  ;;  %v808_v6 = vpack.c.bf16 %v790_v3, %v789_v2  ;;  %v794_v44 = vmul.f32 %v2213_v52, %v2850_v8 }
  0xe4   : > { %v810_v30 = vpack.c.bf16 %v794_v44, %v793_v4 }
  0xe6   : > { %864 = vrot.lane.b32.xlu1 %v808_v6, %s2504_s27 }
  0xea   : > { %868 = vrot.lane.b32.xlu1 %v810_v30, %s2504_s27 }
 0x120   : > { %v843_v9 = vpop.permute.xlu0 %842 }
 0x122   : > { %v839_v43 = vpop.permute.xlu1 %838 }
 0x123   : > { %2006 = vmatprep.mubr.msk.bf16.mxu0 %vm882_vm0, %v839_v43 }
 0x124   : > { %v845_v56 = vpop.permute.xlu0 %844 }
 0x126   : > { %v841_v51 = vpop.permute.xlu1 %840 }
 0x127   : > { %2007 = vmatmul.mubr.msk.bf16.vlgmr.msra.gmra.mrb[0].mxu0 %vm882_vm0, %v841_v51 }
 0x128   : > { %2010 = vmatprep.mubr.msk.bf16.mxu0 %vm882_vm0, %v843_v9  ;;  %v847_v0 = vpop.permute.xlu0 %846 }
 0x12a   : > { %v855_v47 = vpop.permute.xlu1 %854 }
 0x12b   : > { %2022 = vmatprep.mubr.msk.bf16.mxu1 %vm882_vm0, %v855_v47 }
 0x12f   : > { %2011 = vmatmul.mubr.msk.bf16.gmra.mrb[4].mxu0 %vm882_vm0, %v845_v56 }
 0x130   : > { %2014 = vmatprep.mubr.msk.bf16.mxu0 %vm882_vm0, %v847_v0 }
 0x138   : > { %v849_v8 = vpop.permute.xlu0 %848 }
 0x139   : > { %2015 = vmatmul.mubr.msk.bf16.gmra.mrb[8].mxu0 %vm882_vm0, %v849_v8 }
 0x13b   : > { %v857_v10 = vpop.permute.xlu1 %856 }
 0x13c   : > { %2023 = vmatmul.mubr.msk.bf16.vlgmr.msra.gmra.mrb[0].mxu1 %vm882_vm0, %v857_v10 }
 0x13d   : > { %v851_v11 = vpop.permute.xlu0 %850 }
 0x13e   : > { %2018 = vmatprep.mubr.msk.bf16.mxu0 %vm882_vm0, %v851_v11 }
 0x13f   : > { %v859_v1 = vpop.permute.xlu1 %858 }
 0x140   : > { %2026 = vmatprep.mubr.msk.bf16.mxu1 %vm882_vm0, %v859_v1 }
 0x141   : > { %v853_v12 = vpop.permute.xlu0 %852 }
 0x142   : > { %2019 = vmatmul.mubr.msk.bf16.gmra.mrb[12].mxu0 %vm882_vm0, %v853_v12 }
 0x143   : > { %v861_v17 = vpop.permute.xlu1 %860 }
 0x144   : > { %2027 = vmatmul.mubr.msk.bf16.gmra.mrb[4].mxu1 %vm882_vm0, %v861_v17 }
 0x146   : > { %v867_v14 = vpop.permute.xlu0 %866 }
 0x154   : > { %v863_v50 = vpop.permute.xlu1 %862 }
 0x155   : > { %2030 = vmatprep.mubr.msk.bf16.mxu1 %vm882_vm0, %v863_v50 }
 0x158   : > { %v865_v13 = vpop.permute.xlu1 %864 }
 0x159   : > { %2031 = vmatmul.mubr.msk.bf16.gmra.mrb[8].mxu1 %vm882_vm0, %v865_v13 }
 0x15a   : > { %2034 = vmatprep.mubr.msk.bf16.mxu1 %vm882_vm0, %v867_v14 }
 0x15c   : > { %v869_v15 = vpop.permute.xlu1 %868 }
 0x161   : > { %2035 = vmatmul.mubr.msk.bf16.gmra.mrb[12].mxu1 %vm882_vm0, %v869_v15 }
 0x1fa   : > { %v2008_v5 = vpop.f32.mrb[0].mxu0 }
 0x1fb   : > { %v965_v19 = vpop.f32.mrb[1].mxu0  ;;  %v2909_v33 = vadd.f32 %v2008_v5, %v2903_v29 }
 0x1fc   : > { %v2009_v20 = vpop.f32.mrb[2].mxu0  ;;  %v2929_v7 = vadd.f32 %v2903_v29, %v965_v19 }
 0x1fd   : > { %v968_v18 = vpop.f32.mrb[3].mxu0  ;;  %v2912_v34 = vadd.f32 %v2009_v20, %v2903_v29  ;;  %v1095_v16 = vsel %vm1092_vm1, %v2909_v33, -inf }
 0x1fe   : > { %v2915_v54 = vadd.f32 %v2903_v29, %v968_v18  ;;  %v1093_v55 = vsel %vm1092_vm1, %v2929_v7, -inf }
 0x1ff   : > { %v1096_v58 = vsel %vm1092_vm1, %v2912_v34, -inf }
 0x200   : > { %v1094_v36 = vsel %vm1092_vm1, %v2915_v54, -inf }
 0x201   : > { %v1104_v40 = vmax.f32 %v1096_v58, %v1094_v36 }
 0x202   : > { %v2012_v25 = vpop.f32.mrb[4].mxu0 }
 0x203   : > { %v981_v42 = vpop.f32.mrb[5].mxu0  ;;  %v2906_v21 = vadd.f32 %v2012_v25, %v2903_v29 }
 0x204   : > { %v2013_v32 = vpop.f32.mrb[6].mxu0  ;;  %v2926_v59 = vadd.f32 %v2903_v29, %v981_v42 }
 0x205   : > { %v984_v48 = vpop.f32.mrb[7].mxu0  ;;  %v1101_v22 = vsel %vm1092_vm1, %v2906_v21, -inf  ;;  %v2944_v37 = vadd.f32 %v2013_v32, %v2903_v29 }
 0x206   : > { %v1102_v38 = vmax.f32 %v1095_v16, %v1101_v22  ;;  %v1097_v23 = vsel %vm1092_vm1, %v2926_v59, -inf  ;;  %v2954_v30 = vadd.f32 %v2903_v29, %v984_v48 }
 0x207   : > { %v1098_v61 = vmax.f32 %v1093_v55, %v1097_v23  ;;  %v1103_v44 = vsel %vm1092_vm1, %v2944_v37, -inf }
 0x208   : > { %v1100_v31 = vmax.f32 %v1102_v38, %v1104_v40  ;;  %v1099_v11 = vsel %vm1092_vm1, %v2954_v30, -inf }
 0x20c   : > { %v2016_v39 = vpop.f32.mrb[8].mxu0 }
 0x20d   : > { %v997_v28 = vpop.f32.mrb[9].mxu0  ;;  %v2966_v1 = vadd.f32 %v2016_v39, %v2903_v29 }
 0x20e   : > { %v2017_v45 = vpop.f32.mrb[10].mxu0  ;;  %v2976_v15 = vadd.f32 %v2903_v29, %v997_v28 }
 0x20f   : > { %v2024_v26 = vpop.f32.mrb[0].mxu1  ;;  %v1000_v46 = vpop.f32.mrb[11].mxu0  ;;  %v1109_v14 = vsel %vm1092_vm1, %v2966_v1, -inf  ;;  %v2986_v42 = vadd.f32 %v2017_v45, %v2903_v29 }
 0x210   : > { %v2932_v49 = vadd.f32 %v2024_v26, %v2903_v29  ;;  %v1029_v53 = vpop.f32.mrb[1].mxu1  ;;  %v1105_v25 = vsel %vm1092_vm1, %v2976_v15, -inf  ;;  %v2996_v36 = vadd.f32 %v2903_v29, %v1000_v46 }
 0x211   : > { %v2025_v24 = vpop.f32.mrb[2].mxu1  ;;  %v2941_v27 = vadd.f32 %v2903_v29, %v1029_v53  ;;  %v1111_v58 = vsel %vm1092_vm1, %v2986_v42, -inf }
 0x212   : > { %v1125_v35 = vsel %vm1092_vm1, %v2932_v49, -inf  ;;  %v1032_v57 = vpop.f32.mrb[3].mxu1  ;;  %v2949_v2 = vadd.f32 %v2025_v24, %v2903_v29  ;;  %v1107_v45 = vsel %vm1092_vm1, %v2996_v36, -inf }
 0x213   : > { %v1110_v60 = vmax.f32 %v1125_v35, %v1100_v31  ;;  %v1121_v41 = vsel %vm1092_vm1, %v2941_v27, -inf  ;;  %v2961_v0 = vadd.f32 %v2903_v29, %v1032_v57  ;;  %v1330_v35 = vld [vmem:[%s3008_s20 + $0x10] sm:$0xff]  ;;  %v3024_v57 = vld [vmem:[%s4103_s8] ss:$0 sm:$0xff] }
 0x214   : > { %v1127_v47 = vsel %vm1092_vm1, %v2949_v2, -inf }
 0x215   : > { %v1106_v62 = vmax.f32 %v1098_v61, %v1110_v60  ;;  %v2020_v63 = vpop.f32.mrb[12].mxu0  ;;  %v1123_v17 = vsel %vm1092_vm1, %v2961_v0, -inf }
 0x216   : > { %v1013_v3 = vpop.f32.mrb[13].mxu0  ;;  %v3013_v31 = vadd.f32 %v2020_v63, %v2903_v29 }
 0x217   : > { %v1112_v52 = vmax.f32 %v1121_v41, %v1106_v62  ;;  %v2028_v6 = vpop.f32.mrb[4].mxu1  ;;  %v2021_v4 = vpop.f32.mrb[14].mxu0  ;;  %v1328_v62 = vld [vmem:[%s3008_s20] sm:$0xff]  ;;  %v3030_v41 = vadd.f32 %v2903_v29, %v1013_v3 }
 0x218   : > { %v1045_v43 = vpop.f32.mrb[5].mxu1  ;;  %v2956_v9 = vpop.f32.mrb[15].mxu0  ;;  %v2971_v50 = vadd.f32 %v2028_v6, %v2903_v29  ;;  %v1117_v63 = vsel %vm1092_vm1, %v3013_v31, -inf }
 0x219   : > { %v1108_v51 = vmax.f32 %v1103_v44, %v1112_v52  ;;  %v2029_v56 = vpop.f32.mrb[6].mxu1  ;;  %v2981_v20 = vadd.f32 %v2903_v29, %v1045_v43  ;;  %v1331_v52 = vld [vmem:[%s3008_s20 + $0x18] sm:$0xff]  ;;  %v1369_v44 = vmul.f32 %v3024_v57, %v1330_v35 }
 0x21a   : > { %v1048_v8 = vpop.f32.mrb[7].mxu1  ;;  %v1133_v19 = vsel %vm1092_vm1, %v2971_v50, -inf  ;;  %v2991_v22 = vadd.f32 %v2029_v56, %v2903_v29  ;;  %v3042_v56 = vld [vmem:[%s4104_s9] ss:$0 sm:$0xff] }
 0x21b   : > { %v1118_v10 = vmax.f32 %v1127_v47, %v1108_v51  ;;  %v1129_v48 = vsel %vm1092_vm1, %v2981_v20, -inf  ;;  %v3001_v40 = vadd.f32 %v2903_v29, %v1048_v8  ;;  %v1367_v47 = vmul.f32 %v3024_v57, %v1328_v62  ;;  %v1329_v8 = vld [vmem:[%s3008_s20 + $0x8] sm:$0xff] }
 0x21c   : > { %v1135_v39 = vsel %vm1092_vm1, %v2991_v22, -inf }
 0x21d   : > { %v1126_v12 = vmax.f32 %v1118_v10, %v1099_v11  ;;  %v1131_v53 = vsel %vm1092_vm1, %v3001_v40, -inf  ;;  %v1370_v10 = vmul.f32 %v3024_v57, %v1331_v52  ;;  %v1113_v11 = vsel %vm1092_vm1, %v3030_v41, -inf }
 0x21f   : > { %v1134_v13 = vmax.f32 %v1126_v12, %v1123_v17  ;;  %v3050_v12 = vadd.f32 %v2021_v4, %v2903_v29 }
 0x221   : > { %v1142_v5 = vmax.f32 %v1134_v13, %v1109_v14  ;;  %v1334_v13 = vld [vmem:[%s3008_s20 + $0x30] sm:$0xff] }
 0x223   : > { %v1114_v18 = vmax.f32 %v1133_v19, %v1142_v5  ;;  %v3054_v19 = vadd.f32 %v3042_v56, %v1369_v44 }
 0x225   : > { %v1122_v32 = vmax.f32 %v1114_v18, %v1105_v25  ;;  %v1368_v18 = vmul.f32 %v3024_v57, %v1329_v8 }
 0x227   : > { %v1130_v16 = vmax.f32 %v1122_v32, %v1129_v48 }
 0x229   : > { %v1138_v38 = vmax.f32 %v1130_v16, %v1111_v58  ;;  %v3063_v16 = vadd.f32 %v3042_v56, %v1367_v47 }
 0x22b   : > { %v1120_v28 = vmax.f32 %v1135_v39, %v1138_v38  ;;  %v3066_v38 = vadd.f32 %v3042_v56, %v1370_v10  ;;  %v1373_v39 = vmul.f32 %v3024_v57, %v1334_v13  ;;  %v1944_v35 = vmul.f32 -1.442695, %v3063_v16 }
 0x22c   : > { %v2032_v26 = vpop.f32.mrb[8].mxu1 }
 0x22d   : > { %v1128_v46 = vmax.f32 %v1120_v28, %v1107_v45  ;;  %v1061_v23 = vpop.f32.mrb[9].mxu1  ;;  %v3018_v24 = vadd.f32 %v2032_v26, %v2903_v29  ;;  %v1119_v28 = vsel %vm1092_vm1, %v3050_v12, -inf  ;;  %v3073_v45 = vadd.f32 %v2903_v29, %v2956_v9 }
 0x22e   : > { %v2033_v55 = vpop.f32.mrb[10].mxu1  ;;  %v3037_v51 = vadd.f32 %v2903_v29, %v1061_v23  ;;  %v3077_v23 = vadd.f32 %v3042_v56, %v1368_v18  ;;  %v1947_v62 = vmul.f32 -1.442695, %v3066_v38  ;;  %v3087_v9 = vadd.f32 %v3042_v56, %v1373_v39  ;;  %v1346_v18 = vld [vmem:[%s3008_s20 + $0x90] sm:$0xff] }
 0x22f   : > { %v1136_v60 = vmax.f32 %v1128_v46, %v1131_v53  ;;  %v1064_v61 = vpop.f32.mrb[11].mxu1  ;;  %v1141_v43 = vsel %vm1092_vm1, %v3018_v24, -inf  ;;  %v3060_v32 = vadd.f32 %v2033_v55, %v2903_v29  ;;  %v1946_v46 = vmul.f32 -1.442695, %v3054_v19 }
 0x230   : > { %v1137_v25 = vsel %vm1092_vm1, %v3037_v51, -inf  ;;  %v3082_v55 = vadd.f32 %v2903_v29, %v1064_v61  ;;  %v1945_v44 = vmul.f32 -1.442695, %v3077_v23  ;;  %v1950_v8 = vmul.f32 -1.442695, %v3087_v9 }
 0x231   : > { %v1144_v6 = vmax.f32 %v1136_v60, %v1117_v63  ;;  %v1143_v53 = vsel %vm1092_vm1, %v3060_v32, -inf  ;;  %v1115_v63 = vsel %vm1092_vm1, %v3073_v45, -inf  ;;  %2214 = vpow2.f32 %v1946_v46 }
 0x232   : > { %v1139_v61 = vsel %vm1092_vm1, %v3082_v55, -inf  ;;  %2216 = vpow2.f32 %v1944_v35 }
 0x233   : > { %v1116_v3 = vmax.f32 %v1141_v43, %v1144_v6  ;;  %2218 = vpow2.f32 %v1947_v62 }
 0x234   : > { %v2036_v17 = vpop.f32.mrb[12].mxu1  ;;  %2220 = vpow2.f32 %v1945_v44 }
 0x235   : > { %v1124_v14 = vmax.f32 %v1116_v3, %v1113_v11  ;;  %v1077_v5 = vpop.f32.mrb[13].mxu1  ;;  %v3092_v52 = vadd.f32 %v2036_v17, %v2903_v29  ;;  %2222 = vpow2.f32 %v1950_v8 }
 0x236   : > { %v2037_v48 = vpop.f32.mrb[14].mxu1  ;;  %v3098_v43 = vadd.f32 %v2903_v29, %v1077_v5 }
 0x237   : > { %v1132_v4 = vmax.f32 %v1124_v14, %v1137_v25  ;;  %v1080_v58 = vpop.f32.mrb[15].mxu1  ;;  %v1149_v3 = vsel %vm1092_vm1, %v3092_v52, -inf  ;;  %v3104_v10 = vadd.f32 %v2037_v48, %v2903_v29 }
 0x238   : > { %v1145_v17 = vsel %vm1092_vm1, %v3098_v43, -inf  ;;  %v3109_v13 = vadd.f32 %v2903_v29, %v1080_v58 }
 0x239   : > { %v1140_v26 = vmax.f32 %v1132_v4, %v1119_v28  ;;  %v1151_v5 = vsel %vm1092_vm1, %v3104_v10, -inf  ;;  %v1332_v4 = vld [vmem:[%s3008_s20 + $0x20] sm:$0xff] }
 0x23a   : > { %v1147_v48 = vsel %vm1092_vm1, %v3109_v13, -inf  ;;  %v1371_v58 = vmul.f32 %v3024_v57, %v1332_v4 }
 0x23b   : > { %v1150_v60 = vmax.f32 %v1143_v53, %v1140_v26  ;;  %v2215_v28 = vpop.eup %2214  ;;  %v1385_v26 = vmul.f32 %v3024_v57, %v1346_v18 }
 0x23c   : > { %v2217_v46 = vpop.eup %2216  ;;  %v1536_v35 = vadd.f32 1.0, %v2215_v28 }
 0x23d   : > { %v1146_v6 = vmax.f32 %v1115_v63, %v1150_v60  ;;  %v2219_v29 = vpop.eup %2218  ;;  %v1344_v60 = vld [vmem:[%s3008_s20 + $0x80] sm:$0xff]  ;;  %v3121_v44 = vadd.f32 %v3042_v56, %v1385_v26 }
 0x23e   : > { %v2221_v63 = vpop.eup %2220  ;;  %2224 = vrcp.f32 %v1536_v35 }
 0x23f   : > { %v1152_v47 = vmax.f32 %v1139_v61, %v1146_v6  ;;  %v1534_v6 = vadd.f32 1.0, %v2217_v46  ;;  %v1537_v61 = vadd.f32 1.0, %v2219_v29  ;;  %v2223_v8 = vpop.eup %2222  ;;  %v1333_v29 = vld [vmem:[%s3008_s20 + $0x28] sm:$0xff] }
 0x241   : > { %v1154_v11 = vmax.f32 %v1149_v3, %v1152_v47  ;;  %v3124_v3 = vadd.f32 %v3042_v56, %v1371_v58  ;;  %2226 = vrcp.f32 %v1534_v6  ;;  %v1336_v6 = vld [vmem:[%s3008_s20 + $0x40] sm:$0xff] }
 0x242   : > { %2228 = vrcp.f32 %v1537_v61 }
 0x243   : > { %v1148_v14 = vmax.f32 %v1145_v17, %v1154_v11  ;;  %v1383_v11 = vmul.f32 %v3024_v57, %v1344_v60  ;;  %v1535_v17 = vadd.f32 1.0, %v2221_v63 }
 0x245   : > { %v1153_v25 = vmax.f32 %v1151_v5, %v1148_v14  ;;  %v1335_v14 = vld [vmem:[%s3008_s20 + $0x38] sm:$0xff]  ;;  %v3132_v28 = vadd.f32 %v3042_v56, %v1383_v11  ;;  %2230 = vrcp.f32 %v1535_v17 }
 0x246   : > { %v1347_v5 = vld [vmem:[%s3008_s20 + $0x98] sm:$0xff]  ;;  %v1374_v26 = vmul.f32 %v3024_v57, %v1335_v14 }
 0x247   : > { %v1155_v39 = vmax.f32 %v1153_v25, %v1147_v48  ;;  %v1962_v25 = vmul.f32 -1.442695, %v3121_v44  ;;  %v1540_v48 = vadd.f32 1.0, %v2223_v8  ;;  %v1386_v46 = vmul.f32 %v3024_v57, %v1347_v5 }
 0x248   : > { %v1960_v58 = vmul.f32 -1.442695, %v3132_v28  ;;  %v3141_v35 = vadd.f32 %v3042_v56, %v1374_v26  ;;  %v3161_v14 = vpop.eup %2224 }
 0x249   : > { %v1156_v53 = vrot.slane %v1155_v39, 4  ;;  %2232 = vpow2.f32 %v1962_v25  ;;  %v3144_v60 = vadd.f32 %v3042_v56, %v1386_v46 }
 0x24a   : > { %2234 = vrcp.f32 %v1540_v48 }
 0x24b   : > { %v1157_v62 = vmax.f32 %v1155_v39, %v1156_v53  ;;  %v1948_v39 = vmul.f32 -1.442695, %v3124_v3  ;;  %v3171_v48 = vpop.eup %2226 }
 0x24c   : > { %v3182_v46 = vpop.eup %2228 }
 0x24d   : > { %v1158_v47 = vrot.slane %v1157_v62, 2  ;;  %2236 = vpow2.f32 %v1948_v39  ;;  %v1951_v39 = vmul.f32 -1.442695, %v3141_v35 }
 0x24e   : > { %2238 = vpow2.f32 %v1960_v58 }
 0x24f   : > { %v1159_v18 = vmax.f32 %v1157_v62, %v1158_v47  ;;  %v1372_v62 = vmul.f32 %v3024_v57, %v1333_v29  ;;  %v3200_v17 = vpop.eup %2230  ;;  %v1338_v47 = vld [vmem:[%s3008_s20 + $0x50] sm:$0xff] }
 0x251   : > { %v1160_v4 = vrot.slane %v1159_v18, 1 }
 0x253   : > { %v3136_v53 = vmax.f32 %v1159_v18, %v1160_v4  ;;  %v1345_v4 = vld [vmem:[%s3008_s20 + $0x88] sm:$0xff]  ;;  %v2233_v26 = vpop.eup %2232 }
 0x254   : > { %v3206_v61 = vpop.eup %2234 }
 0x255   : > { %v1162_v63 = vsub.f32 %v2929_v7, %v3136_v53  ;;  %v1163_v7 = vsub.f32 %v2915_v54, %v3136_v53  ;;  %v1164_v5 = vsub.f32 %v2909_v33, %v3136_v53  ;;  %v1165_v18 = vsub.f32 %v2912_v34, %v3136_v53 }
 0x256   : > { %v1166_v25 = vsub.f32 %v2926_v59, %v3136_v53  ;;  %v1384_v59 = vmul.f32 %v3024_v57, %v1345_v4  ;;  %v1167_v54 = vsub.f32 %v2954_v30, %v3136_v53  ;;  %v3210_v34 = vadd.f32 %v3042_v56, %v1372_v62 }
 0x257   : > { %v1194_v29 = vmul.f32 1.442695, %v1162_v63  ;;  %v1196_v11 = vmul.f32 1.442695, %v1163_v7  ;;  %v1198_v8 = vmul.f32 1.442695, %v1164_v5  ;;  %v2237_v4 = vpop.eup %2236  ;;  %v1168_v63 = vsub.f32 %v2906_v21, %v3136_v53 }
 0x258   : > { %v1200_v33 = vmul.f32 1.442695, %v1165_v18  ;;  %v1202_v58 = vmul.f32 1.442695, %v1166_v25  ;;  %v1963_v7 = vmul.f32 -1.442695, %v3144_v60  ;;  %v3216_v30 = vadd.f32 %v3042_v56, %v1384_v59 }
 0x259   : > { %2240 = vpow2.f32 %v1194_v29  ;;  %v1377_v5 = vmul.f32 %v3024_v57, %v1338_v47  ;;  %v1169_v62 = vsub.f32 %v2944_v37, %v3136_v53  ;;  %v1204_v18 = vmul.f32 1.442695, %v1167_v54  ;;  %v1350_v21 = vld [vmem:[%s3008_s20 + $0xb0] sm:$0xff]  ;;  %v2239_v54 = vpop.eup %2238 }
 0x25a   : > { %2242 = vpow2.f32 %v1196_v11  ;;  %4159 = vst [vmem:[#allocation5_spill] sm:$0xff] %v3216_v30  ;;  %v1949_v29 = vmul.f32 -1.442695, %v3210_v34  ;;  %v1206_v11 = vmul.f32 1.442695, %v1168_v63  ;;  %v1389_v37 = vmul.f32 %v3024_v57, %v1350_v21 }
 0x25b   : > { %2244 = vpow2.f32 %v1198_v8  ;;  %v1961_v25 = vmul.f32 -1.442695, %v3216_v30  ;;  %v3225_v59 = vadd.f32 %v3042_v56, %v1377_v5  ;;  %v1208_v47 = vmul.f32 1.442695, %v1169_v62 }
 0x25c   : > { %2246 = vpow2.f32 %v1200_v33  ;;  %v1552_v8 = vadd.f32 1.0, %v2233_v26  ;;  %v4161_v33 = vsub.f32 %v2976_v15, %v3136_v53  ;;  %v1375_v5 = vmul.f32 %v3024_v57, %v1336_v6 }
 0x25d   : > { %2248 = vpow2.f32 %v1951_v39  ;;  %4160 = vst [vmem:[#allocation6_spill] sm:$0xff] %v3225_v59  ;;  %v1172_v39 = vsub.f32 %v2966_v1, %v3136_v53  ;;  %v1954_v26 = vmul.f32 -1.442695, %v3225_v59  ;;  %v1173_v15 = vsub.f32 %v2986_v42, %v3136_v53 }
 0x25e   : > { %2250 = vpow2.f32 %v1202_v58  ;;  %v1210_v63 = vmul.f32 1.442695, %v4161_v33  ;;  %v4164_v62 = vsub.f32 %v2996_v36, %v3136_v53  ;;  %v1348_v33 = vld [vmem:[%s3008_s20 + $0xa0] sm:$0xff] }
 0x25f   : > { %2252 = vpow2.f32 %v1963_v7  ;;  %v3239_v7 = vld [vmem:[%s4101_s6] ss:$0 sm:$0xff] }
 0x260   : > { %2254 = vpow2.f32 %v1204_v18  ;;  %v1212_v18 = vmul.f32 1.442695, %v4164_v62  ;;  %v1214_v62 = vmul.f32 1.442695, %v1172_v39  ;;  %v1216_v39 = vmul.f32 1.442695, %v1173_v15 }
 0x261   : > { %2256 = vpow2.f32 %v1949_v29  ;;  %v4172_v15 = vsub.f32 %v3030_v41, %v3136_v53  ;;  %v4174_v41 = vsub.f32 %v3073_v45, %v3136_v53  ;;  %v4177_v45 = vsub.f32 %v3013_v31, %v3136_v53 }
 0x262   : > { %2258 = vpow2.f32 %v1206_v11  ;;  %v1538_v11 = vadd.f32 1.0, %v2237_v4  ;;  %v3267_v4 = vld [vmem:[%s4102_s7] ss:$0 sm:$0xff]  ;;  %v4180_v31 = vsub.f32 %v3050_v12, %v3136_v53 }
 0x263   : > { %v3234_v58 = vpop.eup %2240  ;;  %2260 = vpow2.f32 %v1961_v25  ;;  %v3255_v25 = vadd.f32 %v3042_v56, %v1389_v37  ;;  %v3270_v37 = vadd.f32 %v3042_v56, %v1375_v5 }
 0x264   : > { %4162 = vst [vmem:[#allocation7_spill] sm:$0xff] %v3234_v58  ;;  %v3243_v1 = vpop.eup %2242  ;;  %2262 = vpow2.f32 %v1208_v47  ;;  %v1258_v29 = vsel %vm1092_vm1, %v3234_v58, 0.0  ;;  %v2408_v47 = vld [vmem:[%s2632_s25 + $0x28] sm:$0xff] }
 0x265   : > { %4163 = vst [vmem:[#allocation8_spill] sm:$0xff] %v3243_v1  ;;  %v3252_v21 = vpop.eup %2244  ;;  %2264 = vrcp.f32 %v1552_v8  ;;  %4166 = vst [vmem:[#allocation10_spill] sm:$0xff] %v3255_v25  ;;  %v1259_v6 = vsel %vm1092_vm1, %v3243_v1, 0.0  ;;  %v423_v36 = vmul.f32 %v2408_v47, %v3239_v7  ;;  %v1550_v8 = vadd.f32 1.0, %v2239_v54  ;;  %v1339_v47 = vld [vmem:[%s3008_s20 + $0x58] sm:$0xff] }
 0x266   : > { %4165 = vst [vmem:[#allocation9_spill] sm:$0xff] %v3252_v21  ;;  %v3259_v42 = vpop.eup %2246  ;;  %2266 = vpow2.f32 %v1210_v63  ;;  %v1260_v58 = vadd.f32 %v1259_v6, %v1258_v29  ;;  %4168 = vst [vmem:[#allocation12_spill] sm:$0xff] %v3270_v37  ;;  %v1261_v1 = vsel %vm1092_vm1, %v3252_v21, 0.0  ;;  %v1966_v6 = vmul.f32 -1.442695, %v3255_v25 }
 0x267   : > { %4167 = vst [vmem:[#allocation11_spill] sm:$0xff] %v3259_v42  ;;  %v2249_v59 = vpop.eup %2248  ;;  %2268 = vpow2.f32 %v1954_v26  ;;  %v1387_v54 = vmul.f32 %v3024_v57, %v1348_v33  ;;  %v1263_v26 = vsel %vm1092_vm1, %v3259_v42, 0.0  ;;  %v3284_v21 = vadd.f32 %v3267_v4, %v423_v36  ;;  %v2409_v36 = vld [vmem:[%s2632_s25 + $0x20] sm:$0xff] }
 0x268   : > { %v3274_v30 = vpop.eup %2250  ;;  %2270 = vpow2.f32 %v1212_v18  ;;  %v1262_v63 = vadd.f32 %v1261_v1, %v1260_v58  ;;  %v1218_v58 = vmul.f32 1.442695, %v4172_v15  ;;  %v1378_v33 = vmul.f32 %v3024_v57, %v1339_v47 }
 0x269   : > { %4169 = vst [vmem:[#allocation13_spill] sm:$0xff] %v3274_v30  ;;  %v2253_v29 = vpop.eup %2252  ;;  %2272 = vrcp.f32 %v1538_v11  ;;  %4171 = vst [vmem:[#allocation15_spill] sm:$0xff] %v3284_v21  ;;  %v1952_v11 = vmul.f32 -1.442695, %v3270_v37  ;;  %v1265_v42 = vsel %vm1092_vm1, %v3274_v30, 0.0  ;;  %v1541_v15 = vadd.f32 1.0, %v2249_v59 }
 0x26a   : > { %v3281_v5 = vpop.eup %2254  ;;  %2274 = vpow2.f32 %v1214_v62  ;;  %v1264_v1 = vadd.f32 %v1263_v26, %v1262_v63  ;;  %v3297_v62 = vmul.f32 %v2409_v36, %v3239_v7  ;;  %v1220_v63 = vmul.f32 1.442695, %v4174_v41  ;;  %v1351_v37 = vld [vmem:[%s3008_s20 + $0xb8] sm:$0xff] }
 0x26b   : > { %4170 = vst [vmem:[#allocation14_spill] sm:$0xff] %v3281_v5  ;;  %v2257_v18 = vpop.eup %2256  ;;  %2276 = vrcp.f32 %v1550_v8  ;;  %v3303_v47 = vadd.f32 %v3042_v56, %v1387_v54  ;;  %v1267_v21 = vsel %vm1092_vm1, %v3281_v5, 0.0  ;;  %v3318_v54 = vadd.f32 %v3042_v56, %v1378_v33 }
 0x26c   : > { %v3293_v25 = vpop.eup %2258  ;;  %2278 = vpow2.f32 %v1216_v39  ;;  %v1266_v8 = vadd.f32 %v1265_v42, %v1264_v1  ;;  %v1178_v39 = vsub.f32 %v2941_v27, %v3136_v53  ;;  %v1222_v42 = vmul.f32 1.442695, %v4177_v45 }
 0x26d   : > { %4173 = vst [vmem:[#allocation16_spill] sm:$0xff] %v3293_v25  ;;  %v2261_v26 = vpop.eup %2260  ;;  %2280 = vpow2.f32 %v1966_v6  ;;  %4175 = vst [vmem:[#allocation17_spill] sm:$0xff] %v3303_v47  ;;  %v1553_v6 = vadd.f32 1.0, %v2253_v29  ;;  %v1269_v36 = vsel %vm1092_vm1, %v3293_v25, 0.0  ;;  %v1179_v27 = vsub.f32 %v2961_v0, %v3136_v53  ;;  %v1337_v25 = vld [vmem:[%s3008_s20 + $0x48] sm:$0xff] }
 0x26e   : > { %v3307_v30 = vpop.eup %2262  ;;  %2282 = vpow2.f32 %v1218_v58  ;;  %v1268_v1 = vadd.f32 %v1267_v21, %v1266_v8  ;;  %4178 = vst [vmem:[#allocation19_spill] sm:$0xff] %v3318_v54  ;;  %v1224_v21 = vmul.f32 1.442695, %v4180_v31  ;;  %v1964_v29 = vmul.f32 -1.442695, %v3303_v47 }
 0x26f   : > { %4176 = vst [vmem:[#allocation18_spill] sm:$0xff] %v3307_v30  ;;  %v3315_v59 = vpop.eup %2264  ;;  %2284 = vpow2.f32 %v1952_v11  ;;  %v1390_v11 = vmul.f32 %v3024_v57, %v1351_v37  ;;  %v1271_v33 = vsel %vm1092_vm1, %v3307_v30, 0.0  ;;  %v1180_v0 = vsub.f32 %v2932_v49, %v3136_v53  ;;  %v1349_v30 = vld [vmem:[%s3008_s20 + $0xa8] sm:$0xff] }
 0x270   : > { %v3322_v41 = vpop.eup %2266  ;;  %2286 = vpow2.f32 %v1220_v63  ;;  %v1270_v58 = vadd.f32 %v1269_v36, %v1268_v1  ;;  %v1226_v12 = vmul.f32 1.442695, %v1178_v39  ;;  %v1955_v36 = vmul.f32 -1.442695, %v3318_v54 }
 0x271   : > { %4179 = vst [vmem:[#allocation20_spill] sm:$0xff] %v3322_v41  ;;  %v2269_v8 = vpop.eup %2268  ;;  %2288 = vrcp.f32 %v1541_v15  ;;  %v1539_v15 = vadd.f32 1.0, %v2257_v18  ;;  %v1273_v37 = vsel %vm1092_vm1, %v3322_v41, 0.0  ;;  %v1181_v5 = vsub.f32 %v2949_v2, %v3136_v53  ;;  %v2410_v41 = vld [vmem:[%s2632_s25 + $0x8] sm:$0xff] }
 0x272   : > { %v3333_v45 = vpop.eup %2270  ;;  %2290 = vpow2.f32 %v1222_v42  ;;  %v1272_v63 = vadd.f32 %v1271_v33, %v1270_v58  ;;  %v1228_v49 = vmul.f32 1.442695, %v1179_v27  ;;  %v1376_v18 = vmul.f32 %v3024_v57, %v1337_v25 }
 0x273   : > { %4181 = vst [vmem:[#allocation21_spill] sm:$0xff] %v3333_v45  ;;  %v3338_v1 = vpop.eup %2272  ;;  %2292 = vrcp.f32 %v1553_v6  ;;  %v3351_v6 = vadd.f32 %v3042_v56, %v1390_v11  ;;  %v1275_v58 = vsel %vm1092_vm1, %v3333_v45, 0.0  ;;  %v419_v54 = vmul.f32 %v2410_v41, %v3239_v7 }
 0x274   : > { %v3343_v31 = vpop.eup %2274  ;;  %2294 = vpow2.f32 %v1224_v21  ;;  %v1274_v39 = vadd.f32 %v1273_v37, %v1272_v63  ;;  %v1230_v2 = vmul.f32 1.442695, %v1180_v0  ;;  %v1388_v11 = vmul.f32 %v3024_v57, %v1349_v30 }
 0x275   : > { %4182 = vst [vmem:[#allocation22_spill] sm:$0xff] %v3343_v31  ;;  %v3348_v42 = vpop.eup %2276  ;;  %2296 = vpow2.f32 %v1964_v29  ;;  %4183 = vst [vmem:[#allocation23_spill] sm:$0xff] %v3351_v6  ;;  %v1551_v29 = vadd.f32 1.0, %v2261_v26  ;;  %v1277_v25 = vsel %vm1092_vm1, %v3343_v31, 0.0  ;;  %v3367_v37 = vadd.f32 %v3267_v4, %v3297_v62 }
 0x276   : > { %v3356_v33 = vpop.eup %2278  ;;  %2298 = vpow2.f32 %v1226_v12  ;;  %v1276_v27 = vadd.f32 %v1275_v58, %v1274_v39  ;;  %v1232_v41 = vmul.f32 1.442695, %v1181_v5  ;;  %v3371_v26 = vadd.f32 %v3042_v56, %v1376_v18 }
 0x277   : > { %4184 = vst [vmem:[#allocation24_spill] sm:$0xff] %v3356_v33  ;;  %v2281_v21 = vpop.eup %2280  ;;  %2300 = vrcp.f32 %v1539_v15  ;;  %4186 = vst [vmem:[#allocation26_spill] sm:$0xff] %v3367_v37  ;;  %v1967_v15 = vmul.f32 -1.442695, %v3351_v6  ;;  %v1279_v30 = vsel %vm1092_vm1, %v3356_v33, 0.0  ;;  %v3378_v62 = vadd.f32 %v3267_v4, %v419_v54  ;;  %v1354_v33 = vld [vmem:[%s3008_s20 + $0xd0] sm:$0xff] }
 0x278   : > { %v3363_v63 = vpop.eup %2282  ;;  %2302 = vpow2.f32 %v1228_v49  ;;  %v1278_v12 = vadd.f32 %v1277_v25, %v1276_v27  ;;  %4187 = vst [vmem:[#allocation27_spill] sm:$0xff] %v3371_v26  ;;  %v1342_v49 = vld [vmem:[%s3008_s20 + $0x70] sm:$0xff]  ;;  %v4190_v5 = vsub.f32 %v2981_v20, %v3136_v53  ;;  %v1544_v18 = vadd.f32 1.0, %v2269_v8  ;;  %v1359_v6 = vld [vmem:[%s3008_s20 + $0xf8] sm:$0xff] }
 0x279   : > { %4185 = vst [vmem:[#allocation25_spill] sm:$0xff] %v3363_v63  ;;  %v2285_v0 = vpop.eup %2284  ;;  %2304 = vpow2.f32 %v1955_v36  ;;  %4189 = vst [vmem:[#allocation29_spill] sm:$0xff] %v3378_v62  ;;  %v3387_v25 = vadd.f32 %v3042_v56, %v1388_v11  ;;  %v1281_v37 = vsel %vm1092_vm1, %v3363_v63, 0.0  ;;  %v2411_v62 = vld [vmem:[%s2632_s25] sm:$0xff]  ;;  %v4193_v20 = vsub.f32 %v3001_v40, %v3136_v53 }
 0x27a   : > { %v3375_v39 = vpop.eup %2286  ;;  %2306 = vpow2.f32 %v1230_v2  ;;  %v1234_v36 = vmul.f32 1.442695, %v4190_v5  ;;  %v1280_v58 = vadd.f32 %v1279_v30, %v1278_v12  ;;  %v418_v2 = vmul.f32 %v2411_v62, %v3239_v7 }
 0x27b   : > { %4188 = vst [vmem:[#allocation28_spill] sm:$0xff] %v3375_v39  ;;  %v3384_v27 = vpop.eup %2288  ;;  %2308 = vrcp.f32 %v1551_v29  ;;  %4191 = vst [vmem:[#allocation30_spill] sm:$0xff] %v3387_v25  ;;  %v1236_v12 = vmul.f32 1.442695, %v4193_v20  ;;  %v1953_v11 = vmul.f32 -1.442695, %v3371_v26  ;;  %v1381_v30 = vmul.f32 %v3024_v57, %v1342_v49 }
 0x27c   : > { %v3391_v54 = vpop.eup %2290  ;;  %2310 = vpow2.f32 %v1232_v41  ;;  %v1282_v29 = vadd.f32 %v1281_v37, %v1280_v58  ;;  %v1283_v5 = vsel %vm1092_vm1, %v3375_v39, 0.0  ;;  %v2412_v41 = vld [vmem:[%s2632_s25 + $0x30] sm:$0xff]  ;;  %v4195_v40 = vsub.f32 %v2971_v50, %v3136_v53  ;;  %v1340_v39 = vld [vmem:[%s3008_s20 + $0x60] sm:$0xff] }
 0x27d   : > { %4192 = vst [vmem:[#allocation31_spill] sm:$0xff] %v3391_v54  ;;  %v3399_v8 = vpop.eup %2292  ;;  %2312 = vpow2.f32 %v1967_v15  ;;  %v3409_v63 = vmul.f32 %v2412_v41, %v3239_v7  ;;  %v1965_v49 = vmul.f32 -1.442695, %v3387_v25  ;;  %v1393_v20 = vmul.f32 %v3024_v57, %v1354_v33 }
 0x27e   : > { %v3405_v62 = vpop.eup %2294  ;;  %2314 = vpow2.f32 %v1234_v36  ;;  %v1238_v37 = vmul.f32 1.442695, %v4195_v40  ;;  %v1284_v15 = vadd.f32 %v1283_v5, %v1282_v29  ;;  %v1285_v31 = vsel %vm1092_vm1, %v3391_v54, 0.0  ;;  %v2413_v36 = vld [vmem:[%s2632_s25 + $0x38] sm:$0xff]  ;;  %v1352_v54 = vld [vmem:[%s3008_s20 + $0xc0] sm:$0xff] }
 0x27f   : > { %4194 = vst [vmem:[#allocation32_spill] sm:$0xff] %v3405_v62  ;;  %v3414_v58 = vpop.eup %2296  ;;  %2316 = vrcp.f32 %v1544_v18  ;;  %v3425_v45 = vmul.f32 %v2413_v36, %v3239_v7  ;;  %v4197_v50 = vsub.f32 %v2991_v22, %v3136_v53  ;;  %v1556_v40 = vadd.f32 1.0, %v2281_v21 }
 0x280   : > { %v3421_v41 = vpop.eup %2298  ;;  %2318 = vpow2.f32 %v1236_v12  ;;  %v1286_v18 = vadd.f32 %v1285_v31, %v1284_v15  ;;  %v3433_v33 = vadd.f32 %v3042_v56, %v1381_v30  ;;  %v1287_v25 = vsel %vm1092_vm1, %v3405_v62, 0.0 }
 0x281   : > { %4196 = vst [vmem:[#allocation33_spill] sm:$0xff] %v3421_v41  ;;  %v1240_v29 = vmul.f32 1.442695, %v4197_v50  ;;  %v3430_v5 = vpop.eup %2300  ;;  %2320 = vpow2.f32 %v1953_v11  ;;  %v1379_v12 = vmul.f32 %v3024_v57, %v1340_v39  ;;  %v4200_v22 = vsub.f32 %v3037_v51, %v3136_v53 }
 0x282   : > { %4198 = vst [vmem:[#allocation34_spill] sm:$0xff] %v3433_v33  ;;  %v3438_v26 = vpop.eup %2302  ;;  %2322 = vpow2.f32 %v1238_v37  ;;  %v1288_v15 = vadd.f32 %v1287_v25, %v1286_v18  ;;  %v1542_v21 = vadd.f32 1.0, %v2285_v0  ;;  %v3447_v11 = vadd.f32 %v3042_v56, %v1393_v20 }
 0x283   : > { %4199 = vst [vmem:[#allocation35_spill] sm:$0xff] %v3438_v26  ;;  %v1242_v31 = vmul.f32 1.442695, %v4200_v22  ;;  %v3444_v36 = vpop.eup %2304  ;;  %2324 = vpow2.f32 %v1965_v49  ;;  %v1289_v30 = vsel %vm1092_vm1, %v3421_v41, 0.0  ;;  %v1391_v39 = vmul.f32 %v3024_v57, %v1352_v54  ;;  %v1355_v22 = vld [vmem:[%s3008_s20 + $0xd8] sm:$0xff] }
 0x284   : > { %4201 = vst [vmem:[#allocation36_spill] sm:$0xff] %v3447_v11  ;;  %v3451_v50 = vpop.eup %2306  ;;  %2326 = vpow2.f32 %v1240_v29  ;;  %v4203_v51 = vsub.f32 %v3082_v55, %v3136_v53  ;;  %v1290_v0 = vadd.f32 %v1289_v30, %v1288_v15  ;;  %v3460_v49 = vadd.f32 %v3267_v4, %v418_v2  ;;  %v1343_v29 = vld [vmem:[%s3008_s20 + $0x78] sm:$0xff] }
 0x285   : > { %4202 = vst [vmem:[#allocation37_spill] sm:$0xff] %v3451_v50  ;;  %v3457_v37 = vpop.eup %2308  ;;  %2328 = vrcp.f32 %v1556_v40  ;;  %v1958_v20 = vmul.f32 -1.442695, %v3433_v33  ;;  %v1291_v18 = vsel %vm1092_vm1, %v3438_v26, 0.0  ;;  %v3468_v55 = vadd.f32 %v3042_v56, %v1379_v12  ;;  %v1358_v33 = vld [vmem:[%s3008_s20 + $0xf0] sm:$0xff] }
 0x286   : > { %v1244_v25 = vmul.f32 1.442695, %v4203_v51  ;;  %4204 = vst [vmem:[#allocation38_spill] sm:$0xff] %v3460_v49  ;;  %v3465_v54 = vpop.eup %2310  ;;  %2330 = vpow2.f32 %v1242_v31  ;;  %v4207_v2 = vsub.f32 %v3018_v24, %v3136_v53  ;;  %v1292_v40 = vadd.f32 %v1291_v18, %v1290_v0  ;;  %v2414_v51 = vld [vmem:[%s2632_s25 + $0x10] sm:$0xff]  ;;  %v1341_v24 = vld [vmem:[%s3008_s20 + $0x68] sm:$0xff] }
 0x287   : > { %4205 = vst [vmem:[#allocation39_spill] sm:$0xff] %v3465_v54  ;;  %4206 = vst [vmem:[#allocation40_spill] sm:$0xff] %v3468_v55  ;;  %v3475_v30 = vpop.eup %2312  ;;  %v3479_v49 = vmul.f32 %v2414_v51, %v3239_v7  ;;  %2332 = vrcp.f32 %v1542_v21  ;;  %v1970_v26 = vmul.f32 -1.442695, %v3447_v11  ;;  %v1293_v12 = vsel %vm1092_vm1, %v3451_v50, 0.0  ;;  %v1353_v0 = vld [vmem:[%s3008_s20 + $0xc8] sm:$0xff] }
 0x288   : > { %v1246_v15 = vmul.f32 1.442695, %v4207_v2  ;;  %v3484_v41 = vpop.eup %2314  ;;  %v3487_v31 = vadd.f32 %v3042_v56, %v1391_v39  ;;  %2334 = vpow2.f32 %v1244_v25  ;;  %v4210_v18 = vsub.f32 %v3060_v32, %v3136_v53 }
 0x289   : > { %4208 = vst [vmem:[#allocation41_spill] sm:$0xff] %v3484_v41  ;;  %v1294_v51 = vadd.f32 %v1293_v12, %v1292_v40  ;;  %v3494_v21 = vpop.eup %2316  ;;  %2336 = vpow2.f32 %v1958_v20  ;;  %v1382_v62 = vmul.f32 %v3024_v57, %v1343_v29  ;;  %v1394_v50 = vmul.f32 %v3024_v57, %v1355_v22 }
 0x28a   : > { %4209 = vst [vmem:[#allocation42_spill] sm:$0xff] %v3487_v31  ;;  %v1248_v2 = vmul.f32 1.442695, %v4210_v18  ;;  %v1295_v39 = vsel %vm1092_vm1, %v3465_v54, 0.0  ;;  %v3500_v11 = vpop.eup %2318  ;;  %v1956_v25 = vmul.f32 -1.442695, %v3468_v55  ;;  %2338 = vpow2.f32 %v1246_v15 }
 0x28b   : > { %4211 = vst [vmem:[#allocation43_spill] sm:$0xff] %v3500_v11  ;;  %v4212_v32 = vsub.f32 %v3098_v43, %v3136_v53  ;;  %v1296_v12 = vadd.f32 %v1295_v39, %v1294_v51  ;;  %v3507_v20 = vpop.eup %2320  ;;  %2340 = vpow2.f32 %v1970_v26  ;;  %v1380_v29 = vmul.f32 %v3024_v57, %v1341_v24  ;;  %v1356_v18 = vld [vmem:[%s3008_s20 + $0xe0] sm:$0xff] }
 0x28c   : > { %v1392_v22 = vmul.f32 %v3024_v57, %v1353_v0  ;;  %v1297_v54 = vsel %vm1092_vm1, %v3484_v41, 0.0  ;;  %v3514_v55 = vpop.eup %2322  ;;  %v1968_v15 = vmul.f32 -1.442695, %v3487_v31  ;;  %2342 = vpow2.f32 %v1248_v2  ;;  %v1357_v31 = vld [vmem:[%s3008_s20 + $0xe8] sm:$0xff] }
 0x28d   : > { %v1250_v40 = vmul.f32 1.442695, %v4212_v32  ;;  %4213 = vst [vmem:[#allocation44_spill] sm:$0xff] %v3514_v55  ;;  %v4214_v43 = vsub.f32 %v3109_v13, %v3136_v53  ;;  %v1298_v26 = vadd.f32 %v1297_v54, %v1296_v12  ;;  %v3521_v39 = vpop.eup %2324  ;;  %v3524_v24 = vadd.f32 %v3042_v56, %v1382_v62 }
 0x28e   : > { %v3527_v0 = vadd.f32 %v3042_v56, %v1394_v50  ;;  %v1397_v32 = vmul.f32 %v3024_v57, %v1358_v33  ;;  %v1299_v41 = vsel %vm1092_vm1, %v3500_v11, 0.0  ;;  %v3533_v2 = vpop.eup %2326  ;;  %v1395_v13 = vmul.f32 %v3024_v57, %v1356_v18 }
 0x28f   : > { %v1252_v51 = vmul.f32 1.442695, %v4214_v43  ;;  %4215 = vst [vmem:[#allocation45_spill] sm:$0xff] %v3533_v2  ;;  %2344 = vpow2.f32 %v1250_v40  ;;  %v4216_v54 = vsub.f32 %v3092_v52, %v3136_v53  ;;  %v1300_v62 = vadd.f32 %v1299_v41, %v1298_v26  ;;  %v3539_v43 = vpop.eup %2328 }
 0x290   : > { %v3542_v50 = vadd.f32 %v3042_v56, %v1380_v29  ;;  %v3545_v33 = vadd.f32 %v3042_v56, %v1392_v22  ;;  %v1398_v11 = vmul.f32 %v3024_v57, %v1359_v6  ;;  %v1301_v47 = vsel %vm1092_vm1, %v3514_v55, 0.0  ;;  %v3550_v18 = vpop.eup %2330 }
 0x291   : > { %v1254_v12 = vmul.f32 1.442695, %v4216_v54  ;;  %4219 = vst [vmem:[#allocation48_spill] sm:$0xff] %v3550_v18  ;;  %2346 = vpow2.f32 %v1252_v51  ;;  %v4220_v52 = vsub.f32 %v3104_v10, %v3136_v53  ;;  %v1302_v40 = vadd.f32 %v1301_v47, %v1300_v62  ;;  %v3556_v29 = vpop.eup %2332 }
 0x292   : > { %4217 = vst [vmem:[#allocation46_spill] sm:$0xff] %v3542_v50  ;;  %4218 = vst [vmem:[#allocation47_spill] sm:$0xff] %v3545_v33  ;;  %v1396_v26 = vmul.f32 %v3024_v57, %v1357_v31  ;;  %2348 = vpow2.f32 %v1956_v25  ;;  %v1959_v22 = vmul.f32 -1.442695, %v3524_v24  ;;  %v3560_v6 = vadd.f32 %v3042_v56, %v1397_v32  ;;  %v3564_v55 = vpop.eup %2334 }
 0x293   : > { %v1256_v41 = vmul.f32 1.442695, %v4220_v52  ;;  %v1303_v54 = vsel %vm1092_vm1, %v3533_v2, 0.0  ;;  %4222 = vst [vmem:[#allocation50_spill] sm:$0xff] %v3564_v55  ;;  %v1971_v51 = vmul.f32 -1.442695, %v3527_v0  ;;  %v3568_v10 = vadd.f32 %v3042_v56, %v1395_v13  ;;  %v2337_v53 = vpop.eup %2336 }
 0x294   : > { %4221 = vst [vmem:[#allocation49_spill] sm:$0xff] %v3560_v6  ;;  %2350 = vpow2.f32 %v1254_v12  ;;  %v1304_v57 = vadd.f32 %v1303_v54, %v1302_v40  ;;  %v1957_v47 = vmul.f32 -1.442695, %v3542_v50  ;;  %v3572_v31 = vadd.f32 %v3042_v56, %v1398_v11  ;;  %v3576_v32 = vpop.eup %2338  ;;  %v2436_v2 = vld [vmem:[%s2632_s25 + $0xd0] sm:$0xff] }
 0x295   : > { %4223 = vst [vmem:[#allocation51_spill] sm:$0xff] %v3568_v10  ;;  %2352 = vpow2.f32 %v1968_v15  ;;  %v1305_v25 = vsel %vm1092_vm1, %v3550_v18, 0.0  ;;  %4225 = vst [vmem:[#allocation53_spill] sm:$0xff] %v3576_v32  ;;  %v1969_v62 = vmul.f32 -1.442695, %v3545_v33  ;;  %v3580_v12 = vadd.f32 %v3042_v56, %v1396_v26  ;;  %v2341_v52 = vpop.eup %2340  ;;  %v2415_v18 = vld [vmem:[%s2632_s25 + $0x18] sm:$0xff] }
 0x296   : > { %4224 = vst [vmem:[#allocation52_spill] sm:$0xff] %v3572_v31  ;;  %2354 = vpow2.f32 %v1256_v41  ;;  %v1306_v13 = vadd.f32 %v1305_v25, %v1304_v57  ;;  %v3584_v15 = vadd.f32 %v3267_v4, %v3409_v63  ;;  %v1974_v11 = vmul.f32 -1.442695, %v3560_v6  ;;  %v3589_v54 = vpop.eup %2342 }
 0x297   : > { %4226 = vst [vmem:[#allocation54_spill] sm:$0xff] %v3580_v12  ;;  %2356 = vpow2.f32 %v1959_v22  ;;  %v1307_v40 = vsel %vm1092_vm1, %v3564_v55, 0.0  ;;  %4228 = vst [vmem:[#allocation56_spill] sm:$0xff] %v3589_v54  ;;  %v421_v41 = vmul.f32 %v2415_v18, %v3239_v7  ;;  %v1972_v56 = vmul.f32 -1.442695, %v3568_v10  ;;  %v2439_v10 = vld [vmem:[%s2632_s25 + $0xf8] sm:$0xff] }
 0x298   : > { %4227 = vst [vmem:[#allocation55_spill] sm:$0xff] %v3584_v15  ;;  %2358 = vpow2.f32 %v1971_v51  ;;  %v1308_v26 = vadd.f32 %v1307_v40, %v1306_v13  ;;  %v3596_v63 = vadd.f32 %v3267_v4, %v3425_v45  ;;  %v1975_v22 = vmul.f32 -1.442695, %v3572_v31  ;;  %v2416_v40 = vld [vmem:[%s2632_s25 + $0x40] sm:$0xff] }
 0x299   : > { %2360 = vpow2.f32 %v1957_v47  ;;  %v1309_v57 = vsel %vm1092_vm1, %v3576_v32, 0.0  ;;  %v3601_v25 = vpop.eup %2344  ;;  %v3605_v18 = vadd.f32 %v3267_v4, %v3479_v49  ;;  %v1973_v13 = vmul.f32 -1.442695, %v3580_v12  ;;  %v2417_v32 = vld [vmem:[%s2632_s25 + $0x48] sm:$0xff]  ;;  %v2437_v12 = vld [vmem:[%s2632_s25 + $0xd8] sm:$0xff] }
 0x29a   : > { %4229 = vst [vmem:[#allocation57_spill] sm:$0xff] %v3596_v63  ;;  %4230 = vst [vmem:[#allocation58_spill] sm:$0xff] %v3601_v25  ;;  %2362 = vpow2.f32 %v1969_v62  ;;  %v1310_v51 = vadd.f32 %v1309_v57, %v1308_v26  ;;  %v426_v45 = vmul.f32 %v2416_v40, %v3239_v7  ;;  %v1554_v47 = vadd.f32 1.0, %v3414_v58 }
 0x29b   : > { %4231 = vst [vmem:[#allocation59_spill] sm:$0xff] %v3605_v18  ;;  %2364 = vpow2.f32 %v1974_v11  ;;  %v1311_v63 = vsel %vm1092_vm1, %v3589_v54, 0.0  ;;  %v3613_v15 = vpop.eup %2346  ;;  %v427_v49 = vmul.f32 %v2417_v32, %v3239_v7  ;;  %v1545_v62 = vadd.f32 1.0, %v3444_v36  ;;  %v2418_v54 = vld [vmem:[%s2632_s25 + $0x80] sm:$0xff] }
 0x29c   : > { %4232 = vst [vmem:[#allocation60_spill] sm:$0xff] %v3613_v15  ;;  %2366 = vpow2.f32 %v1972_v56  ;;  %v1312_v26 = vadd.f32 %v1311_v63, %v1310_v51  ;;  %v2349_v57 = vpop.eup %2348  ;;  %v3619_v18 = vadd.f32 %v3267_v4, %v421_v41  ;;  %v1557_v40 = vadd.f32 1.0, %v3475_v30 }
 0x29d   : > { %2368 = vpow2.f32 %v1975_v22  ;;  %v1313_v58 = vsel %vm1092_vm1, %v3601_v25, 0.0  ;;  %v434_v32 = vmul.f32 %v2418_v54, %v3239_v7  ;;  %v1543_v36 = vadd.f32 1.0, %v3507_v20 }
 0x29e   : > { %4233 = vst [vmem:[#allocation61_spill] sm:$0xff] %v3619_v18  ;;  %v3624_v11 = vpop.eup %2350  ;;  %v1314_v56 = vadd.f32 %v1313_v58, %v1312_v26  ;;  %2370 = vpow2.f32 %v1973_v13  ;;  %v3630_v41 = vadd.f32 %v3267_v4, %v426_v45  ;;  %v1555_v30 = vadd.f32 1.0, %v3521_v39  ;;  %v2419_v26 = vld [vmem:[%s2632_s25 + $0x88] sm:$0xff] }
 0x29f   : > { %4234 = vst [vmem:[#allocation62_spill] sm:$0xff] %v3624_v11  ;;  %v2353_v63 = vpop.eup %2352  ;;  %2372 = vrcp.f32 %v1554_v47  ;;  %v1315_v22 = vsel %vm1092_vm1, %v3613_v15, 0.0  ;;  %v3638_v18 = vadd.f32 %v3267_v4, %v427_v49  ;;  %v1548_v20 = vadd.f32 1.0, %v2337_v53 }
 0x2a0   : > { %4235 = vst [vmem:[#allocation63_spill] sm:$0xff] %v3630_v41  ;;  %v3635_v51 = vpop.eup %2354  ;;  %2374 = vrcp.f32 %v1545_v62  ;;  %v1316_v54 = vadd.f32 %v1315_v22, %v1314_v56  ;;  %v435_v45 = vmul.f32 %v2419_v26, %v3239_v7  ;;  %v1560_v47 = vadd.f32 1.0, %v2341_v52  ;;  %v2420_v56 = vld [vmem:[%s2632_s25 + $0x50] sm:$0xff] }
 0x2a1   : > { %4236 = vst [vmem:[#allocation64_spill] sm:$0xff] %v3635_v51  ;;  %4237 = vst [vmem:[#allocation65_spill] sm:$0xff] %v3638_v18  ;;  %v2357_v13 = vpop.eup %2356  ;;  %2376 = vrcp.f32 %v1557_v40  ;;  %v1317_v39 = vsel %vm1092_vm1, %v3624_v11, 0.0  ;;  %v3645_v41 = vadd.f32 %v3267_v4, %v434_v32  ;;  %v1546_v49 = vadd.f32 1.0, %v2349_v57  ;;  %v2421_v18 = vld [vmem:[%s2632_s25 + $0x58] sm:$0xff] }
 0x2a2   : > { %v2359_v58 = vpop.eup %2358  ;;  %2378 = vrcp.f32 %v1543_v36  ;;  %v1318_v62 = vadd.f32 %v1317_v39, %v1316_v54  ;;  %v428_v22 = vmul.f32 %v2420_v56, %v3239_v7  ;;  %v1558_v26 = vadd.f32 1.0, %v2353_v63  ;;  %v2422_v54 = vld [vmem:[%s2632_s25 + $0x90] sm:$0xff] }
 0x2a3   : > { %4238 = vst [vmem:[#allocation66_spill] sm:$0xff] %v3645_v41  ;;  %v2361_v53 = vpop.eup %2360  ;;  %2380 = vrcp.f32 %v1555_v30  ;;  %v1319_v52 = vsel %vm1092_vm1, %v3635_v51, 0.0  ;;  %v429_v11 = vmul.f32 %v2421_v18, %v3239_v7  ;;  %v1549_v32 = vadd.f32 1.0, %v2357_v13  ;;  %v2423_v41 = vld [vmem:[%s2632_s25 + $0x98] sm:$0xff] }
 0x2a4   : > { %v2363_v40 = vpop.eup %2362  ;;  %2382 = vrcp.f32 %v1548_v20  ;;  %v1320_v36 = vadd.f32 %v1319_v52, %v1318_v62  ;;  %v436_v39 = vmul.f32 %v2422_v54, %v3239_v7  ;;  %v437_v56 = vmul.f32 %v2423_v41, %v3239_v7  ;;  %v2424_v62 = vld [vmem:[%s2632_s25 + $0x60] sm:$0xff] }
 0x2a5   : > { %v2365_v57 = vpop.eup %2364  ;;  %2384 = vrcp.f32 %v1560_v47  ;;  %v1561_v63 = vadd.f32 1.0, %v2359_v58  ;;  %v3658_v51 = vadd.f32 %v3267_v4, %v435_v45  ;;  %v1547_v25 = vadd.f32 1.0, %v2361_v53 }
 0x2a6   : > { %v2367_v30 = vpop.eup %2366  ;;  %2386 = vrcp.f32 %v1546_v49  ;;  %v1321_v18 = vrot.slane %v1320_v36, 4  ;;  %v3661_v13 = vadd.f32 %v3267_v4, %v428_v22  ;;  %v430_v52 = vmul.f32 %v2424_v62, %v3239_v7 }
 0x2a7   : > { %4239 = vst [vmem:[#allocation67_spill] sm:$0xff] %v3658_v51  ;;  %v2369_v20 = vpop.eup %2368  ;;  %2388 = vrcp.f32 %v1558_v26  ;;  %v1559_v54 = vadd.f32 1.0, %v2363_v40  ;;  %v3666_v47 = vadd.f32 %v3267_v4, %v429_v11  ;;  %v1564_v45 = vadd.f32 1.0, %v2365_v57  ;;  %v2425_v11 = vld [vmem:[%s2632_s25 + $0x68] sm:$0xff]  ;;  %v2429_v51 = vld [vmem:[%s2632_s25 + $0x78] sm:$0xff] }
 0x2a8   : > { %4240 = vst [vmem:[#allocation68_spill] sm:$0xff] %v3661_v13  ;;  %v2371_v41 = vpop.eup %2370  ;;  %2390 = vrcp.f32 %v1549_v32  ;;  %v1322_v58 = vadd.f32 %v1321_v18, %v1320_v36  ;;  %v3671_v53 = vadd.f32 %v3267_v4, %v436_v39  ;;  %v3674_v22 = vadd.f32 %v3267_v4, %v437_v56  ;;  %v2426_v56 = vld [vmem:[%s2632_s25 + $0xa0] sm:$0xff] }
 0x2a9   : > { %4241 = vst [vmem:[#allocation69_spill] sm:$0xff] %v3666_v47  ;;  %v3668_v49 = vpop.eup %2372  ;;  %2392 = vrcp.f32 %v1561_v63  ;;  %v1562_v26 = vadd.f32 1.0, %v2367_v30  ;;  %v431_v32 = vmul.f32 %v2425_v11, %v3239_v7  ;;  %v1565_v57 = vadd.f32 1.0, %v2369_v20  ;;  %v2427_v11 = vld [vmem:[%s2632_s25 + $0xa8] sm:$0xff]  ;;  %v2428_v20 = vld [vmem:[%s2632_s25 + $0x70] sm:$0xff] }
 0x2aa   : > { %4242 = vst [vmem:[#allocation70_spill] sm:$0xff] %v3671_v53  ;;  %4243 = vst [vmem:[#allocation71_spill] sm:$0xff] %v3674_v22  ;;  %v3676_v40 = vpop.eup %2374  ;;  %2394 = vrcp.f32 %v1547_v25  ;;  %v1323_v36 = vrot.slane %v1322_v58, 2  ;;  %v3683_v39 = vadd.f32 %v3267_v4, %v430_v52  ;;  %v438_v63 = vmul.f32 %v2426_v56, %v3239_v7 }
 0x2ab   : > { %v3680_v18 = vpop.eup %2376  ;;  %2396 = vrcp.f32 %v1559_v54  ;;  %v1563_v30 = vadd.f32 1.0, %v2371_v41  ;;  %v439_v25 = vmul.f32 %v2427_v11, %v3239_v7  ;;  %v432_v22 = vmul.f32 %v2428_v20, %v3239_v7  ;;  %v2430_v54 = vld [vmem:[%s2632_s25 + $0xb0] sm:$0xff] }
 0x2ac   : > { %4244 = vst [vmem:[#allocation72_spill] sm:$0xff] %v3683_v39  ;;  %v3687_v62 = vpop.eup %2378  ;;  %2398 = vrcp.f32 %v1564_v45  ;;  %v1324_v53 = vadd.f32 %v1323_v36, %v1322_v58  ;;  %v433_v56 = vmul.f32 %v2429_v51, %v3239_v7  ;;  %v440_v41 = vmul.f32 %v2430_v54, %v3239_v7  ;;  %v2431_v39 = vld [vmem:[%s2632_s25 + $0xb8] sm:$0xff]  ;;  %v2432_v45 = vld [vmem:[%s2632_s25 + $0xe0] sm:$0xff]  ;;  %v2433_v36 = vld [vmem:[%s2632_s25 + $0xe8] sm:$0xff] }
 0x2ad   : > { %v3693_v52 = vpop.eup %2380  ;;  %v441_v11 = vmul.f32 %v2431_v39, %v3239_v7  ;;  %2400 = vrcp.f32 %v1562_v26  ;;  %v446_v58 = vmul.f32 %v2432_v45, %v3239_v7  ;;  %v447_v20 = vmul.f32 %v2433_v36, %v3239_v7  ;;  %v2434_v54 = vld [vmem:[%s2632_s25 + $0xc0] sm:$0xff]  ;;  %v2435_v39 = vld [vmem:[%s2632_s25 + $0xc8] sm:$0xff]  ;;  %v2438_v36 = vld [vmem:[%s2632_s25 + $0xf0] sm:$0xff]  ;;  %s365_s25 = sand.u32 1, %s2494_s14  }
 0x2ae   : > { %v3701_v47 = vpop.eup %2382  ;;  %2402 = vrcp.f32 %v1565_v57  ;;  %v1325_v51 = vrot.slane %v1324_v53, 1  ;;  %v442_v55 = vmul.f32 %v2434_v54, %v3239_v7  ;;  %v443_v26 = vmul.f32 %v2435_v39, %v3239_v7  ;;  %s1882_s11 = sshll.u32 %s365_s25, 8  ;;  %s4054_s28 = scalar_lea.sflag [#allocation3], %s365_s25 }
 0x2af   : > { %v3707_v13 = vpop.eup %2384  ;;  %v444_v15 = vmul.f32 %v2436_v2, %v3239_v7  ;;  %2404 = vrcp.f32 %v1563_v30  ;;  %v445_v31 = vmul.f32 %v2437_v12, %v3239_v7  ;;  %v448_v57 = vmul.f32 %v2438_v36, %v3239_v7  ;;  %s3905_s20 = scalar_lea.vmem [#allocation2], %s1882_s11  ;;  %s2446_s11 = scalar_lea.vmem %s2445_s30, 8192 }
 0x2b0   : > { %v2387_v45 = vpop.eup %2386  ;;  %v449_v6 = vmul.f32 %v2439_v10, %v3239_v7  ;;  %v1326_v33 = vadd.f32 %v1325_v51, %v1324_v53  ;;  %v3722_v54 = vadd.f32 %v3267_v4, %v431_v32  ;;  %v3725_v39 = vadd.f32 %v3267_v4, %v438_v63  ;;  %s1804_s18 = sshll.u32 %s3905_s20, 4  ;;  %s4022_s18 = int_to_ptr.vmem [resolvable:$true] %s1804_s18 }
 0x2b1   : > { %v2389_v50 = vpop.eup %2388  ;;  %v3728_v2 = vadd.f32 %v3267_v4, %v439_v25  ;;  %v3731_v30 = vadd.f32 %v3267_v4, %v432_v22  ;;  %v3734_v36 = vadd.f32 %v3267_v4, %v433_v56  ;;  %v3737_v7 = vadd.f32 %v3267_v4, %v440_v41  ;;  %s2440_s27 = scalar_lea.vmem %s4022_s18, 4096  ;;  %p2447_p0 = scmp.lt.s32.totalorder %s4022_s18, %s2445_s30 }
 0x2b2   : > { %v2391_v12 = vpop.eup %2390  ;;  %v3740_v10 = vadd.f32 %v3267_v4, %v441_v11  ;;  %2406 = vrcp.f32 %v1326_v33  ;;  %v3743_v32 = vadd.f32 %v3267_v4, %v446_v58  ;;  %v486_v63 = vadd.f32 %v3267_v4, %v447_v20  ;;  %p2441_p11 = scmp.ne.s32.totalorder %s4022_s18, %s2440_s27  ;;  %p2448_p1 = scmp.lt.s32.totalorder %s2446_s11, %s2440_s27 }
 0x2b3   : > { %v2393_v53 = vpop.eup %2392  ;;  %v3747_v22 = vadd.f32 %v3267_v4, %v442_v55  ;;  %v3750_v25 = vadd.f32 %v3267_v4, %v443_v26  ;;  %v3753_v41 = vadd.f32 %v3267_v4, %v444_v15  ;;  %v3756_v11 = vadd.f32 %v3267_v4, %v445_v31 }
 0x2b4   : > { %v2395_v56 = vpop.eup %2394  ;;  %v3759_v33 = vadd.f32 %v3267_v4, %v448_v57  ;;  %v3762_v58 = vadd.f32 %v3267_v4, %v449_v6  ;;  %v3766_v55 = vmul.f32 %v3161_v14, %v3054_v19  ;;  %v3770_v51 = vmul.f32 %v3171_v48, %v3063_v16  ;;  %v4260_v14 = vld [vmem:[#allocation6_spill] sm:$0xff]  ;;  %p2442_p12 = pnand %p2441_p11, %p2601_p5  ;;  %p2449_p2 = por %p2448_p1, %p2447_p0 }
 0x2b5   : > { %v2397_v20 = vpop.eup %2396  ;;  %v3774_v15 = vmul.f32 %v3182_v46, %v3066_v38  ;;  %v3778_v31 = vmul.f32 %v3200_v17, %v3077_v23  ;;  %v3782_v4 = vmul.f32 %v3206_v61, %v3087_v9  ;;  %v3786_v19 = vmul.f32 %v3315_v59, %v3121_v44  ;;  %v4262_v46 = vld [vmem:[#allocation10_spill] sm:$0xff]  ;;  %v4264_v59 = vld [vmem:[#allocation12_spill] sm:$0xff] }
 0x2b6   : > { %4245 = vst [vmem:[#allocation73_spill] sm:$0xff] %v3759_v33  ;;  %4246 = vst [vmem:[#allocation74_spill] sm:$0xff] %v3762_v58  ;;  %v2399_v26 = vpop.eup %2398  ;;  %v3790_v16 = vmul.f32 %v3338_v1, %v3124_v3  ;;  %v3794_v38 = vmul.f32 %v3348_v42, %v3132_v28  ;;  %v3798_v17 = vmul.f32 %v3384_v27, %v3141_v35  ;;  %v4258_v3 = vld [vmem:[#allocation5_spill] sm:$0xff]  ;;  %v4268_v27 = vld [vmem:[#allocation19_spill] sm:$0xff]  ;;  %p2443_p13 = pneg %p2442_p12 }
 0x2b7   : > { %4247 = vst [vmem:[#allocation75_spill] sm:$0xff] %v3766_v55  ;;  %4248 = vst [vmem:[#allocation76_spill] sm:$0xff] %v3770_v51  ;;  %v2401_v23 = vpop.eup %2400  ;;  %v3802_v9 = vmul.f32 %v3399_v8, %v3144_v60  ;;  %v3806_v44 = vmul.f32 %v3430_v5, %v3210_v34  ;;  %v3810_v61 = vmul.f32 %v3457_v37, %v4258_v3  ;;  %v4266_v1 = vld [vmem:[#allocation17_spill] sm:$0xff]  ;;  %v4270_v5 = vld [vmem:[#allocation23_spill] sm:$0xff] }
 0x2b8   : > { %4249 = vst [vmem:[#allocation77_spill] sm:$0xff] %v3774_v15  ;;  %4250 = vst [vmem:[#allocation78_spill] sm:$0xff] %v3778_v31  ;;  %v2403_v28 = vpop.eup %2402  ;;  %v3814_v48 = vmul.f32 %v3494_v21, %v4260_v14  ;;  %v3818_v35 = vmul.f32 %v3539_v43, %v4262_v46  ;;  %v3822_v60 = vmul.f32 %v3556_v29, %v4264_v59  ;;  %v4272_v21 = vld [vmem:[#allocation27_spill] sm:$0xff]  ;;  %v4274_v6 = vld [vmem:[#allocation30_spill] sm:$0xff]  ;;  %p2450_p3 = pnand %p2449_p2, %p2443_p13 }
 0x2b9   : > { %4251 = vst [vmem:[#allocation79_spill] sm:$0xff] %v3782_v4  ;;  %4252 = vst [vmem:[#allocation80_spill] sm:$0xff] %v3786_v19  ;;  %v3826_v34 = vmul.f32 %v3668_v49, %v4266_v1  ;;  %v2405_v42 = vpop.eup %2404  ;;  %v3830_v8 = vmul.f32 %v3676_v40, %v4268_v27  ;;  %v3834_v37 = vmul.f32 %v3680_v18, %v4270_v5  ;;  %v4276_v49 = vld [vmem:[#allocation34_spill] sm:$0xff]  ;;  %v4278_v40 = vld [vmem:[#allocation36_spill] sm:$0xff] }
 0x2ba   : > { %4253 = vst [vmem:[#allocation81_spill] sm:$0xff] %v3790_v16  ;;  %4254 = vst [vmem:[#allocation82_spill] sm:$0xff] %v3794_v38  ;;  %v3838_v43 = vmul.f32 %v3687_v62, %v4272_v21  ;;  %v3842_v29 = vmul.f32 %v3693_v52, %v4274_v6  ;;  %v3847_v57 = vmul.f32 %v3701_v47, %v4276_v49  ;;  %v4280_v18 = vld [vmem:[#allocation40_spill] sm:$0xff]  ;;  %v4282_v46 = vld [vmem:[#allocation42_spill] sm:$0xff] }
 0x2bb   : > { %4255 = vst [vmem:[#allocation83_spill] sm:$0xff] %v3798_v17  ;;  %4256 = vst [vmem:[#allocation84_spill] sm:$0xff] %v3802_v9  ;;  %v3851_v3 = vmul.f32 %v3707_v13, %v4278_v40  ;;  %v3854_v14 = vmul.f32 %v2387_v45, %v4280_v18  ;;  %v3857_v62 = vmul.f32 %v2389_v50, %v4282_v46  ;;  %v4286_v1 = vld [vmem:[#allocation46_spill] sm:$0xff]  ;;  %v4288_v47 = vld [vmem:[#allocation47_spill] sm:$0xff] }
 0x2bc   : > { %4257 = vst [vmem:[#allocation85_spill] sm:$0xff] %v3806_v44  ;;  %4259 = vst [vmem:[#allocation5_spill] sm:$0xff] %v3810_v61  ;;  %v3860_v59 = vmul.f32 %v2391_v12, %v3524_v24  ;;  %v3863_v52 = vmul.f32 %v2393_v53, %v3527_v0  ;;  %v3866_v27 = vmul.f32 %v2395_v56, %v4286_v1  ;;  %v2407_v13 = vpop.eup %2406  ;;  %v4290_v21 = vld [vmem:[#allocation49_spill] sm:$0xff]  ;;  %v4292_v45 = vld [vmem:[#allocation51_spill] sm:$0xff] }
 0x2bd   : > { %4261 = vst [vmem:[#allocation6_spill] sm:$0xff] %v3814_v48  ;;  %4263 = vst [vmem:[#allocation10_spill] sm:$0xff] %v3818_v35  ;;  %v3869_v5 = vmul.f32 %v2397_v20, %v4288_v47  ;;  %v3872_v6 = vmul.f32 %v2399_v26, %v4290_v21  ;;  %v3875_v49 = vmul.f32 %v2401_v23, %v4292_v45  ;;  %v4294_v50 = vld [vmem:[#allocation52_spill] sm:$0xff]  ;;  %v4296_v24 = vld [vmem:[#allocation54_spill] sm:$0xff] }
 0x2be   : > { %4265 = vst [vmem:[#allocation12_spill] sm:$0xff] %v3822_v60  ;;  %4267 = vst [vmem:[#allocation17_spill] sm:$0xff] %v3826_v34  ;;  %v3878_v40 = vmul.f32 %v2403_v28, %v4294_v50  ;;  %v1659_v12 = vmul.f32 %v2405_v42, %v4296_v24  ;;  %v4297_v0 = vld [vmem:[#allocation60_spill] sm:$0xff]  ;;  %v4298_v56 = vld [vmem:[#allocation7_spill] sm:$0xff] }
 0x2bf   : > { %4269 = vst [vmem:[#allocation19_spill] sm:$0xff] %v3830_v8  ;;  %4271 = vst [vmem:[#allocation23_spill] sm:$0xff] %v3834_v37  ;;  %v1691_v53 = vmul.f32 %v2407_v13, %v4297_v0  ;;  %v1662_v18 = vmul.f32 %v2407_v13, %v4298_v56  ;;  %v4299_v20 = vld [vmem:[#allocation8_spill] sm:$0xff]  ;;  %v4300_v1 = vld [vmem:[#allocation9_spill] sm:$0xff] }
 0x2c0   : > { %4273 = vst [vmem:[#allocation27_spill] sm:$0xff] %v3838_v43  ;;  %4275 = vst [vmem:[#allocation30_spill] sm:$0xff] %v3842_v29  ;;  %v1663_v46 = vmul.f32 %v2407_v13, %v4299_v20  ;;  %v1664_v47 = vmul.f32 %v2407_v13, %v4300_v1  ;;  %v4301_v26 = vld [vmem:[#allocation11_spill] sm:$0xff]  ;;  %v4303_v45 = vld [vmem:[#allocation14_spill] sm:$0xff] }
 0x2c1   : > { %4277 = vst [vmem:[#allocation34_spill] sm:$0xff] %v3847_v57  ;;  %4279 = vst [vmem:[#allocation36_spill] sm:$0xff] %v3851_v3  ;;  %v1665_v21 = vmul.f32 %v2407_v13, %v4301_v26  ;;  %v4304_v28 = vld [vmem:[#allocation16_spill] sm:$0xff]  ;;  %v4305_v42 = vld [vmem:[#allocation18_spill] sm:$0xff] }
 0x2c2   : > { %4281 = vst [vmem:[#allocation40_spill] sm:$0xff] %v3854_v14  ;;  %4283 = vst [vmem:[#allocation42_spill] sm:$0xff] %v3857_v62  ;;  %v1668_v50 = vmul.f32 %v2407_v13, %v4304_v28  ;;  %v1669_v24 = vmul.f32 %v2407_v13, %v4305_v42  ;;  %v4307_v0 = vld [vmem:[#allocation21_spill] sm:$0xff]  ;;  %v4308_v56 = vld [vmem:[#allocation22_spill] sm:$0xff] }
 0x2c3   : > { %4284 = vst [vmem:[#allocation86_spill] sm:$0xff] %v3860_v59  ;;  %4285 = vst [vmem:[#allocation87_spill] sm:$0xff] %v3863_v52  ;;  %v4306_v52 = vld [vmem:[#allocation20_spill] sm:$0xff]  ;;  %v1672_v62 = vmul.f32 %v2407_v13, %v4308_v56  ;;  %v4310_v1 = vld [vmem:[#allocation25_spill] sm:$0xff] }
 0x2c4   : > { %4287 = vst [vmem:[#allocation46_spill] sm:$0xff] %v3866_v27  ;;  %4289 = vst [vmem:[#allocation47_spill] sm:$0xff] %v3869_v5  ;;  %v1670_v3 = vmul.f32 %v2407_v13, %v4306_v52  ;;  %v1671_v5 = vmul.f32 %v2407_v13, %v4307_v0  ;;  %v4309_v20 = vld [vmem:[#allocation24_spill] sm:$0xff]  ;;  %v1674_v35 = vmul.f32 %v2407_v13, %v4310_v1  ;;  %v4312_v34 = vld [vmem:[#allocation31_spill] sm:$0xff] }
 0x2c5   : > { %4291 = vst [vmem:[#allocation49_spill] sm:$0xff] %v3872_v6  ;;  %4293 = vst [vmem:[#allocation51_spill] sm:$0xff] %v3875_v49  ;;  %v4302_v6 = vld [vmem:[#allocation13_spill] sm:$0xff]  ;;  %v1667_v49 = vmul.f32 %v2407_v13, %v4303_v45  ;;  %v1673_v37 = vmul.f32 %v2407_v13, %v4309_v20  ;;  %v4311_v26 = vld [vmem:[#allocation28_spill] sm:$0xff]  ;;  %v1676_v45 = vmul.f32 %v2407_v13, %v4312_v34 }
 0x2c6   : > { %4295 = vst [vmem:[#allocation52_spill] sm:$0xff] %v3878_v40  ;;  %v1666_v23 = vmul.f32 %v2407_v13, %v4302_v6  ;;  %v1723_v40 = vmul.f32 %v1691_v53, %v486_v63  ;;  %v1675_v29 = vmul.f32 %v2407_v13, %v4311_v26  ;;  %v4313_v9 = vld [vmem:[#allocation32_spill] sm:$0xff]  ;;  %v4314_v63 = vld [vmem:[#allocation33_spill] sm:$0xff]  ;;  %v4315_v42 = vld [vmem:[#allocation35_spill] sm:$0xff] }
 0x2c7   : > { %v1677_v28 = vmul.f32 %v2407_v13, %v4313_v9  ;;  %v1678_v53 = vmul.f32 %v2407_v13, %v4314_v63  ;;  %v1679_v19 = vmul.f32 %v2407_v13, %v4315_v42  ;;  %v4316_v52 = vld [vmem:[#allocation37_spill] sm:$0xff]  ;;  %v4317_v0 = vld [vmem:[#allocation39_spill] sm:$0xff]  ;;  %v4320_v34 = vld [vmem:[#allocation44_spill] sm:$0xff] }
 0x2c8   : > { %v1755_v6 = vadd.f32 %v1723_v40, %v1659_v12  ;;  %v1680_v61 = vmul.f32 %v2407_v13, %v4316_v52  ;;  %v1681_v38 = vmul.f32 %v2407_v13, %v4317_v0  ;;  %v4318_v56 = vld [vmem:[#allocation41_spill] sm:$0xff]  ;;  %v4319_v40 = vld [vmem:[#allocation43_spill] sm:$0xff]  ;;  %v1684_v20 = vmul.f32 %v2407_v13, %v4320_v34  ;;  %v4322_v26 = vld [vmem:[#allocation48_spill] sm:$0xff] }
 0x2c9   : > { %v1682_v59 = vmul.f32 %v2407_v13, %v4318_v56  ;;  %v1683_v12 = vmul.f32 %v2407_v13, %v4319_v40  ;;  %v4321_v9 = vld [vmem:[#allocation45_spill] sm:$0xff]  ;;  %v1686_v63 = vmul.f32 %v2407_v13, %v4322_v26  ;;  %v4323_v42 = vld [vmem:[#allocation50_spill] sm:$0xff]  ;;  %v4325_v0 = vld [vmem:[#allocation56_spill] sm:$0xff] }
 0x2ca   : > { %1787 = vst.msk [vmem:[%s3905_s20 + $0xe8] sm:$0xff] %vm1092_vm1, %v1755_v6  ;;  %v1685_v1 = vmul.f32 %v2407_v13, %v4321_v9  ;;  %v1687_v57 = vmul.f32 %v2407_v13, %v4323_v42  ;;  %v4324_v52 = vld [vmem:[#allocation53_spill] sm:$0xff]  ;;  %v1689_v14 = vmul.f32 %v2407_v13, %v4325_v0  ;;  %v4326_v56 = vld [vmem:[#allocation58_spill] sm:$0xff]  ;;  %v4328_v60 = vld [vmem:[#allocation64_spill] sm:$0xff] }
 0x2cb   : > { %v1688_v27 = vmul.f32 %v2407_v13, %v4324_v52  ;;  %v1690_v8 = vmul.f32 %v2407_v13, %v4326_v56  ;;  %v4327_v48 = vld [vmem:[#allocation62_spill] sm:$0xff]  ;;  %v1693_v6 = vmul.f32 %v2407_v13, %v4328_v60  ;;  %v4330_v4 = vld [vmem:[#allocation29_spill] sm:$0xff]  ;;  %v4331_v44 = vld [vmem:[#allocation59_spill] sm:$0xff] }
 0x2cc   : > { %v1692_v43 = vmul.f32 %v2407_v13, %v4327_v48  ;;  %v4329_v17 = vld [vmem:[#allocation38_spill] sm:$0xff]  ;;  %v1695_v34 = vmul.f32 %v1663_v46, %v4330_v4  ;;  %v1696_v9 = vmul.f32 %v1664_v47, %v4331_v44  ;;  %v4332_v16 = vld [vmem:[#allocation61_spill] sm:$0xff]  ;;  %v4334_v55 = vld [vmem:[#allocation15_spill] sm:$0xff] }
 0x2cd   : > { %v1694_v40 = vmul.f32 %v1662_v18, %v4329_v17  ;;  %v1697_v26 = vmul.f32 %v1665_v21, %v4332_v16  ;;  %v4333_v15 = vld [vmem:[#allocation26_spill] sm:$0xff]  ;;  %v1699_v52 = vmul.f32 %v1667_v49, %v4334_v55  ;;  %v4335_v31 = vld [vmem:[#allocation55_spill] sm:$0xff]  ;;  %v4336_v51 = vld [vmem:[#allocation57_spill] sm:$0xff]  ;;  %v1707_v16 = vmul.f32 %v1675_v29, %v3722_v54 }
 0x2ce   : > { %v1698_v42 = vmul.f32 %v1666_v23, %v4333_v15  ;;  %v1700_v0 = vmul.f32 %v1668_v50, %v4335_v31  ;;  %v1701_v56 = vmul.f32 %v1669_v24, %v4336_v51  ;;  %v4337_v58 = vld [vmem:[#allocation63_spill] sm:$0xff]  ;;  %v4338_v33 = vld [vmem:[#allocation65_spill] sm:$0xff]  ;;  %v4339_v13 = vld [vmem:[#allocation68_spill] sm:$0xff]  ;;  %v1708_v15 = vmul.f32 %v1676_v45, %v3731_v30 }
 0x2cf   : > { %v1702_v48 = vmul.f32 %v1670_v3, %v4337_v58  ;;  %v1703_v60 = vmul.f32 %v1671_v5, %v4338_v33  ;;  %v1704_v17 = vmul.f32 %v1672_v62, %v4339_v13  ;;  %v4340_v18 = vld [vmem:[#allocation69_spill] sm:$0xff]  ;;  %v4341_v46 = vld [vmem:[#allocation72_spill] sm:$0xff]  ;;  %v1709_v55 = vmul.f32 %v1677_v28, %v3734_v36  ;;  %v4342_v49 = vld [vmem:[#allocation66_spill] sm:$0xff] }
 0x2d0   : > { %v1705_v4 = vmul.f32 %v1673_v37, %v4340_v18  ;;  %v1706_v44 = vmul.f32 %v1674_v35, %v4341_v46  ;;  %v1710_v31 = vmul.f32 %v1678_v53, %v4342_v49  ;;  %v4343_v47 = vld [vmem:[#allocation67_spill] sm:$0xff]  ;;  %v4344_v21 = vld [vmem:[#allocation70_spill] sm:$0xff]  ;;  %v1714_v62 = vmul.f32 %v1682_v59, %v3725_v39  ;;  %v4356_v45 = vld [vmem:[#allocation12_spill] sm:$0xff] }
 0x2d1   : > { %v1711_v51 = vmul.f32 %v1679_v19, %v4343_v47  ;;  %v1712_v58 = vmul.f32 %v1680_v61, %v4344_v21  ;;  %v4345_v3 = vld [vmem:[#allocation71_spill] sm:$0xff]  ;;  %v1715_v37 = vmul.f32 %v1683_v12, %v3728_v2  ;;  %v1716_v35 = vmul.f32 %v1684_v20, %v3737_v7  ;;  %v4346_v61 = vld [vmem:[#allocation73_spill] sm:$0xff]  ;;  %v4347_v2 = vld [vmem:[#allocation74_spill] sm:$0xff] }
 0x2d2   : > { %v1713_v33 = vmul.f32 %v1681_v38, %v4345_v3  ;;  %v1717_v54 = vmul.f32 %v1685_v1, %v3740_v10  ;;  %v1718_v30 = vmul.f32 %v1686_v63, %v3747_v22  ;;  %v1719_v36 = vmul.f32 %v1687_v57, %v3750_v25  ;;  %v4348_v7 = vld [vmem:[#allocation76_spill] sm:$0xff]  ;;  %v4349_v10 = vld [vmem:[#allocation78_spill] sm:$0xff]  ;;  %v4350_v22 = vld [vmem:[#allocation75_spill] sm:$0xff] }
 0x2d3   : > { %v1720_v29 = vmul.f32 %v1688_v27, %v3753_v41  ;;  %v1721_v19 = vmul.f32 %v1689_v14, %v3756_v11  ;;  %v1722_v38 = vmul.f32 %v1690_v8, %v3743_v32  ;;  %v1724_v39 = vmul.f32 %v1692_v43, %v4346_v61  ;;  %v4351_v25 = vld [vmem:[#allocation77_spill] sm:$0xff]  ;;  %v4354_v8 = vld [vmem:[#allocation79_spill] sm:$0xff]  ;;  %v4358_v20 = vld [vmem:[#allocation6_spill] sm:$0xff] }
 0x2d4   : > { %v1725_v59 = vmul.f32 %v1693_v6, %v4347_v2  ;;  %v1726_v5 = vadd.f32 %v1694_v40, %v4348_v7  ;;  %v1727_v23 = vadd.f32 %v1695_v34, %v4349_v10  ;;  %v1728_v50 = vadd.f32 %v1696_v9, %v4350_v22  ;;  %v4352_v57 = vld [vmem:[#allocation81_spill] sm:$0xff]  ;;  %v4355_v27 = vld [vmem:[#allocation83_spill] sm:$0xff]  ;;  %v4360_v40 = vld [vmem:[#allocation40_spill] sm:$0xff] }
 0x2d5   : > { %v1729_v41 = vadd.f32 %v1697_v26, %v4351_v25  ;;  %v1730_v11 = vadd.f32 %v1698_v42, %v4352_v57  ;;  %v4353_v14 = vld [vmem:[#allocation85_spill] sm:$0xff]  ;;  %v1732_v43 = vadd.f32 %v1700_v0, %v4354_v8  ;;  %v1733_v24 = vadd.f32 %v1701_v56, %v4355_v27  ;;  %v4357_v53 = vld [vmem:[#allocation27_spill] sm:$0xff]  ;;  %v4361_v9 = vld [vmem:[#allocation46_spill] sm:$0xff] }
 0x2d6   : > { %v1731_v32 = vadd.f32 %v1699_v52, %v4353_v14  ;;  %v1734_v28 = vadd.f32 %v1702_v48, %v4356_v45  ;;  %v1735_v12 = vadd.f32 %v1703_v60, %v4357_v53  ;;  %v1736_v1 = vadd.f32 %v1704_v17, %v4358_v20  ;;  %1758 = vst.msk [vmem:[%s3905_s20] sm:$0xff] %vm1092_vm1, %v1726_v5  ;;  %v4359_v63 = vld [vmem:[#allocation19_spill] sm:$0xff]  ;;  %v4362_v42 = vld [vmem:[#allocation34_spill] sm:$0xff]  ;;  %v4365_v13 = vld [vmem:[#allocation5_spill] sm:$0xff] }
 0x2d7   : > { %1759 = vst.msk [vmem:[%s3905_s20 + $0x8] sm:$0xff] %vm1092_vm1, %v1727_v23  ;;  %1760 = vst.msk [vmem:[%s3905_s20 + $0x10] sm:$0xff] %vm1092_vm1, %v1728_v50  ;;  %v1737_v6 = vadd.f32 %v1705_v4, %v4359_v63  ;;  %v1738_v34 = vadd.f32 %v1706_v44, %v4360_v40  ;;  %v1739_v26 = vadd.f32 %v1707_v16, %v4361_v9  ;;  %v4363_v0 = vld [vmem:[#allocation86_spill] sm:$0xff]  ;;  %v4366_v18 = vld [vmem:[#allocation80_spill] sm:$0xff] }
 0x2d8   : > { %v1740_v52 = vadd.f32 %v1708_v15, %v4362_v42  ;;  %1761 = vst.msk [vmem:[%s3905_s20 + $0x18] sm:$0xff] %vm1092_vm1, %v1729_v41  ;;  %1762 = vst.msk [vmem:[%s3905_s20 + $0x20] sm:$0xff] %vm1092_vm1, %v1730_v11  ;;  %v1741_v56 = vadd.f32 %v1709_v55, %v4363_v0  ;;  %v4364_v48 = vld [vmem:[#allocation82_spill] sm:$0xff]  ;;  %v1743_v17 = vadd.f32 %v1711_v51, %v4365_v13  ;;  %v4367_v46 = vld [vmem:[#allocation84_spill] sm:$0xff] }
 0x2d9   : > { %1763 = vst.msk [vmem:[%s3905_s20 + $0x28] sm:$0xff] %vm1092_vm1, %v1731_v32  ;;  %1764 = vst.msk [vmem:[%s3905_s20 + $0x30] sm:$0xff] %vm1092_vm1, %v1732_v43  ;;  %v1742_v60 = vadd.f32 %v1710_v31, %v4364_v48  ;;  %v1744_v4 = vadd.f32 %v1712_v58, %v4366_v18  ;;  %v1745_v44 = vadd.f32 %v1713_v33, %v4367_v46  ;;  %v4368_v16 = vld [vmem:[#allocation17_spill] sm:$0xff]  ;;  %v4369_v55 = vld [vmem:[#allocation30_spill] sm:$0xff] }
 0x2da   : > { %1765 = vst.msk [vmem:[%s3905_s20 + $0x38] sm:$0xff] %vm1092_vm1, %v1733_v24  ;;  %1766 = vst.msk [vmem:[%s3905_s20 + $0x40] sm:$0xff] %vm1092_vm1, %v1734_v28  ;;  %v1746_v15 = vadd.f32 %v1714_v62, %v4368_v16  ;;  %v1747_v49 = vadd.f32 %v1715_v37, %v4369_v55  ;;  %v4370_v31 = vld [vmem:[#allocation10_spill] sm:$0xff]  ;;  %v4371_v51 = vld [vmem:[#allocation23_spill] sm:$0xff] }
 0x2db   : > { %1767 = vst.msk [vmem:[%s3905_s20 + $0x48] sm:$0xff] %vm1092_vm1, %v1735_v12  ;;  %1768 = vst.msk [vmem:[%s3905_s20 + $0x50] sm:$0xff] %vm1092_vm1, %v1736_v1  ;;  %v1748_v47 = vadd.f32 %v1716_v35, %v4370_v31  ;;  %v1749_v21 = vadd.f32 %v1717_v54, %v4371_v51  ;;  %v4372_v58 = vld [vmem:[#allocation42_spill] sm:$0xff]  ;;  %v4373_v33 = vld [vmem:[#allocation47_spill] sm:$0xff] }
 0x2dc   : > { %1769 = vst.msk [vmem:[%s3905_s20 + $0x58] sm:$0xff] %vm1092_vm1, %v1737_v6  ;;  %1770 = vst.msk [vmem:[%s3905_s20 + $0x60] sm:$0xff] %vm1092_vm1, %v1738_v34  ;;  %v1750_v3 = vadd.f32 %v1718_v30, %v4372_v58  ;;  %v1751_v62 = vadd.f32 %v1719_v36, %v4373_v33  ;;  %v4374_v37 = vld [vmem:[#allocation36_spill] sm:$0xff]  ;;  %v4375_v54 = vld [vmem:[#allocation87_spill] sm:$0xff] }
 0x2dd   : > { %1771 = vst.msk [vmem:[%s3905_s20 + $0x68] sm:$0xff] %vm1092_vm1, %v1739_v26  ;;  %1772 = vst.msk [vmem:[%s3905_s20 + $0x70] sm:$0xff] %vm1092_vm1, %v1740_v52  ;;  %v1752_v35 = vadd.f32 %v1720_v29, %v4374_v37  ;;  %v1753_v30 = vadd.f32 %v1721_v19, %v4375_v54  ;;  %v4376_v36 = vld [vmem:[#allocation51_spill] sm:$0xff]  ;;  %v4377_v61 = vld [vmem:[#allocation49_spill] sm:$0xff] }
 0x2de   : > { %1773 = vst.msk [vmem:[%s3905_s20 + $0x78] sm:$0xff] %vm1092_vm1, %v1741_v56  ;;  %1774 = vst.msk [vmem:[%s3905_s20 + $0x80] sm:$0xff] %vm1092_vm1, %v1742_v60  ;;  %v1754_v29 = vadd.f32 %v1722_v38, %v4376_v36  ;;  %v1756_v2 = vadd.f32 %v1724_v39, %v4377_v61  ;;  %v4378_v7 = vld [vmem:[#allocation52_spill] sm:$0xff] }
 0x2df   : > { %1775 = vst.msk [vmem:[%s3905_s20 + $0x88] sm:$0xff] %vm1092_vm1, %v1743_v17  ;;  %1776 = vst.msk [vmem:[%s3905_s20 + $0x90] sm:$0xff] %vm1092_vm1, %v1744_v4  ;;  %v1757_v5 = vadd.f32 %v1725_v59, %v4378_v7 }
 0x2e0   : > { %1777 = vst.msk [vmem:[%s3905_s20 + $0x98] sm:$0xff] %vm1092_vm1, %v1745_v44  ;;  %1778 = vst.msk [vmem:[%s3905_s20 + $0xa0] sm:$0xff] %vm1092_vm1, %v1746_v15 }
 0x2e1   : > { %1779 = vst.msk [vmem:[%s3905_s20 + $0xa8] sm:$0xff] %vm1092_vm1, %v1747_v49  ;;  %1780 = vst.msk [vmem:[%s3905_s20 + $0xb0] sm:$0xff] %vm1092_vm1, %v1748_v47 }
 0x2e2   : > { %1781 = vst.msk [vmem:[%s3905_s20 + $0xb8] sm:$0xff] %vm1092_vm1, %v1749_v21  ;;  %1782 = vst.msk [vmem:[%s3905_s20 + $0xc0] sm:$0xff] %vm1092_vm1, %v1750_v3 }
 0x2e3   : > { %1783 = vst.msk [vmem:[%s3905_s20 + $0xc8] sm:$0xff] %vm1092_vm1, %v1751_v62  ;;  %1784 = vst.msk [vmem:[%s3905_s20 + $0xd0] sm:$0xff] %vm1092_vm1, %v1752_v35 }
 0x2e4   : > { %1785 = vst.msk [vmem:[%s3905_s20 + $0xd8] sm:$0xff] %vm1092_vm1, %v1753_v30  ;;  %1786 = vst.msk [vmem:[%s3905_s20 + $0xe0] sm:$0xff] %vm1092_vm1, %v1754_v29 }
 0x2e5   : > { %1788 = vst.msk [vmem:[%s3905_s20 + $0xf0] sm:$0xff] %vm1092_vm1, %v1756_v2  ;;  %1789 = vst.msk [vmem:[%s3905_s20 + $0xf8] sm:$0xff] %vm1092_vm1, %v1757_v5 }
 0x2e6   : > { %2453 = shalt.err (!%p2450_p3)
}
 0x2e7   : > { %s2454_s25 = scalar_lea.hbm %s4020_s26, 4096  ;;  %s2458_s17 = scalar_lea.hbm %s4105_s10, 8192 }
 0x2e8   : > { %p2455_p4 = scmp.ne.s32.totalorder %s4020_s26, %s2454_s25  ;;  %p2459_p9 = scmp.lt.u32.totalorder %s4020_s26, %s4105_s10 }
 0x2e9   : > { %p2460_p10 = scmp.lt.u32.totalorder %s2458_s17, %s2454_s25  ;;  %p2462_p12 = scmp.lt.u32.totalorder %s2454_s25, %s4020_s26 }
 0x2ea   : > { %p2456_p7 = pnand %p2455_p4, %p2601_p5 }
 0x2eb   : > { %p2461_p11 = por %p2460_p10, %p2459_p9 }
 0x2ec   : > { %p2457_p8 = pneg %p2456_p7 }
 0x2ed   : > { %p2463_p13 = por %p2462_p12, %p2461_p11 }
 0x2ef   : > { %p2464_p0 = pnand %p2463_p13, %p2457_p8 }
 0x2f1   : > { %2467 = shalt.err (!%p2464_p0)
}
 0x2f2   : > { %s2506_s27 = smov 128   ;;  %s2507_s30 = smov 8  }
 0x2f3   : > { %2042 = dma.vmem_to_hbm [thread:$0]  (%p2601_p5), %s4022_s18, 4096, %s4020_s26, %s4054_s28, %s2506_s27, %s2506_s27, %s2507_s30  }
 0x2f4 PF: > { %p2048_p1 = scmp.ge.s32.totalorder %s2502_s16, 2  ;;  %s1819_s11 = sand.u32 1, %s2490_s13  }
 0x2f5   : > { %s1820_s25 = scalar_lea.sflag [#allocation3], %s1819_s11 }
 0x2f6   : > { %p2045_p2 = pnand %p2048_p1, %p2605_p6 }
 0x2f8   : > { %2485 = dma.done.wait (!%p2045_p2), %s1820_s25, 4096  }
 0x2f9   : > { %2487 = vsyncadd (!%p2045_p2), %s1820_s25, 4294963200  ;;  %p20_p3 = scmp.ge.s32.totalorder %s2588_s19, 4   ;;  %s4379_s13 = smov %s2494_s14 }
 0x2fa   : > { %s4380_s14 = smov %s2498_s15  ;;  %s4381_s15 = smov %s2599_s22 }
 0x2fb   : > { %s4382_s16 = smov %s2588_s19  ;;  %22 = sbr.rel (!%p20_p3) target bundleno = 3 (0x3), region = 98 }
 0x302   :  { %1825 = vsyncpa [#allocation3], 1 }
 0x303   :  { %1827 = vsyncpa [#allocation3 + $0x1], 1 }

</bundles_post_ra>
